<compile_context>
chip_gen: v6e
topology: v6e:2x2x1
jax: 0.10.0
libtpu: 0.0.40
codegen_flags: <defaults>
</compile_context>

<pallas_src>
import jax
import jax.numpy as jnp
from jax import lax
from jax.experimental import pallas as pl
from jax.experimental.pallas import tpu as pltpu


def _vq_kernel(x_ref, cbt_ref, cb_ref, esq_ref, xq_ref, idx_ref, l1_ref):
    """One grid step processes a (tm, D) tile of flattened inputs.

    x_ref   : (tm, D)          input tile (native dtype)
    cbt_ref : (D, K)           codebook, pre-transposed (resident)
    cb_ref  : (K, D)           codebook (resident)
    esq_ref : (1, K)  f32      precomputed ||e||^2 (resident)
    xq_ref  : (tm, D)          quantized output tile
    idx_ref : (1, tm//128,128) argmin indices, lane-dense int32
    l1_ref  : (1, tm//128,128) per-row sum |x_q - x|, lane-dense f32
    """
    x = x_ref[...]                                   # (tm, D) native dtype
    x_f32 = x.astype(jnp.float32)
    tm = x.shape[0]
    K = cb_ref.shape[0]

    # Squared-distance matrix d = ||x||^2 + ||e||^2 - 2 x e^T  -> (tm, K).
    # (cb^T and ||e||^2 are hoisted to the wrapper; matmul on MXU, f32 acc.)
    x_sq = jnp.sum(x_f32 * x_f32, axis=-1, keepdims=True)               # (tm, 1)
    xe = jnp.dot(x, cbt_ref[...], preferred_element_type=jnp.float32)   # (tm, K)
    d = x_sq + esq_ref[...] - 2.0 * xe

    idx = jnp.argmin(d, axis=-1).astype(jnp.int32)                      # (tm,)

    # Gather codebook rows via one-hot matmul (MXU-friendly, no VMEM gather).
    onehot = (lax.broadcasted_iota(jnp.int32, (tm, K), 1)
              == idx[:, None]).astype(cb_ref.dtype)                     # (tm, K)
    x_q = jnp.dot(onehot, cb_ref[...], preferred_element_type=jnp.float32)
    xq_ref[...] = x_q.astype(xq_ref.dtype)

    # Per-row L1 partial sums; mean is taken in the wrapper (lets the grid be
    # "parallel" and makes padded rows trivially sliceable).
    row_l1 = jnp.sum(jnp.abs(x_q - x_f32), axis=-1)                     # (tm,)

    # Lane-dense stores (full-lane vst instead of masked single-lane stores).
    idx_ref[...] = idx.reshape(idx_ref.shape)
    l1_ref[...] = row_l1.reshape(l1_ref.shape)


def _daibin_quantizer_pallas(x, codebook, *, tm=1024):
    """Returns (loss, x_q, indices). x: (..., D) ; codebook: (K, D)."""
    x_size = x.shape
    K, D = codebook.shape
    assert x_size[-1] == D
    assert tm % 128 == 0, "tm must be a multiple of 128 (lane-dense outputs)"

    xf = x.reshape(-1, D)
    N = xf.shape[0]
    G = (N + tm - 1) // tm          # grid size
    N_pad = G * tm
    if N_pad != N:                  # pad to a whole number of tiles
        xf = jnp.pad(xf, ((0, N_pad - N), (0, 0)))

    tl = tm // 128                  # lane-rows per tile for idx / L1 outputs

    # Hoisted, one-time codebook preprocessing (resident in VMEM every step).
    cb_t = codebook.T                                                   # (D, K)
    e_sq = jnp.sum(codebook.astype(jnp.float32) ** 2, axis=-1)[None, :] # (1, K)

    xq_pad, idx3d, l1_3d = pl.pallas_call(
        _vq_kernel,
        out_shape=(
            jax.ShapeDtypeStruct((N_pad, D), x.dtype),
            jax.ShapeDtypeStruct((G, tl, 128), jnp.int32),
            jax.ShapeDtypeStruct((G, tl, 128), jnp.float32),
        ),
        grid_spec=pltpu.PrefetchScalarGridSpec(
            num_scalar_prefetch=0,
            grid=(G,),
            in_specs=[
                pl.BlockSpec((tm, D), lambda i: (i, 0)),      # x tile
                pl.BlockSpec((D, K), lambda i: (0, 0)),       # codebook^T
                pl.BlockSpec((K, D), lambda i: (0, 0)),       # codebook
                pl.BlockSpec((1, K), lambda i: (0, 0)),       # ||e||^2
            ],
            out_specs=[
                pl.BlockSpec((tm, D), lambda i: (i, 0)),          # x_q tile
                pl.BlockSpec((1, tl, 128), lambda i: (i, 0, 0)),  # indices
                pl.BlockSpec((1, tl, 128), lambda i: (i, 0, 0)),  # per-row L1
            ],
        ),
        compiler_params=pltpu.CompilerParams(
            dimension_semantics=("parallel",),   # no cross-step state -> safe
        ),
    )(xf, cb_t, codebook, e_sq)

    # Final reduction / un-padding on the host-graph side.
    row_l1 = l1_3d.reshape(-1)[:N]
    loss = jnp.sum(row_l1) / jnp.asarray(N * D, jnp.float32)   # l1_loss 'mean'
    x_q = xq_pad[:N].reshape(x_size)
    # Note: PyTorch uses int64 indices; int32 is sufficient for K <= 2^31.
    indices = idx3d.reshape(-1)[:N].reshape(x_size[:-1])
    return loss, x_q, indices


def daibin_quantizer_forward(x, codebook, *, tm=1024):
    """Pallas implementation of DaibinQuantizer.forward -> (loss, x_q, None, None)."""
    loss, x_q, _indices = _daibin_quantizer_pallas(x, codebook, tm=tm)
    # TODO(synk): reset_cnt / update_cnt / reinit_codebook are host-side
    # training-time bookkeeping on numpy state, not part of the forward graph.
    return loss, x_q, None, None


def _reference_forward(x, codebook):
    """Pure-JAX reference for validation."""
    D = codebook.shape[1]
    xf = x.reshape(-1, D)
    d = (jnp.sum(xf * xf, axis=1, keepdims=True)
         + jnp.sum(codebook * codebook, axis=1)[None, :]
         - 2.0 * xf @ codebook.T)
    idx = jnp.argmin(d, axis=1)
    x_q = codebook[idx]
    loss = jnp.mean(jnp.abs(x_q - xf))
    return loss, x_q.reshape(x.shape)


if __name__ == "__main__":
    feature_dim = 32
    codebook_size = 128

    key = jax.random.PRNGKey(0)
    k_cb, k_x1, k_x2, k_x3 = jax.random.split(key, 4)

    # nn.Embedding(codebook_size, feature_dim) with uniform(-1/D, 1/D) init.
    bnd = 1.0 / feature_dim
    codebook = jax.random.uniform(
        k_cb, (codebook_size, feature_dim), jnp.float32, minval=-bnd, maxval=bnd)

    # Case 1: small input (N=128 rows), default tm=1024 -> padded single tile.
    x1 = jax.random.normal(k_x1, (2, 64, feature_dim), jnp.float32) * 0.05
    # Case 2: multi-tile with a padded tail (N=200 rows, tm=128 -> G=2).
    x2 = jax.random.normal(k_x2, (2, 100, feature_dim), jnp.float32) * 0.05
    # Case 3: multi-tile, no padding (N=512 rows, tm=256 -> G=2).
    x3 = jax.random.normal(k_x3, (4, 128, feature_dim), jnp.float32) * 0.05

    for x, tm in ((x1, 1024), (x2, 128), (x3, 256)):
        loss, x_q, _, _ = daibin_quantizer_forward(x, codebook, tm=tm)
        jax.block_until_ready((loss, x_q))

        ref_loss, ref_xq = _reference_forward(x, codebook)
        assert x_q.shape == x.shape
        assert jnp.allclose(loss, ref_loss, atol=1e-6, rtol=1e-5), (loss, ref_loss)
        assert jnp.allclose(x_q, ref_xq, atol=1e-6, rtol=1e-5)

    print("KERNEL_OK")
</pallas_src>

<mosaic_0001>
module attributes {stable_mosaic.version = 11 : i64} {
  func.func @_vq_kernel(%arg0: i32, %arg1: memref<1024x32xf32, #tpu.memory_space<vmem>>, %arg2: memref<32x128xf32, #tpu.memory_space<vmem>>, %arg3: memref<128x32xf32, #tpu.memory_space<vmem>>, %arg4: memref<1x128xf32, #tpu.memory_space<vmem>>, %arg5: memref<1024x32xf32, #tpu.memory_space<vmem>>, %arg6: memref<1x8x128xi32, #tpu.memory_space<vmem>>, %arg7: memref<1x8x128xf32, #tpu.memory_space<vmem>>) attributes {dimension_semantics = [#tpu.dimension_semantics<parallel>], iteration_bounds = array<i64: 1>, scalar_prefetch = 0 : i64, scratch_operands = 0 : i64, tpu.core_type = #tpu.core_type<tc>, window_params = [{transform_indices = @transform_0, window_bounds = array<i64: 1024, 32>}, {pipeline_mode = #tpu.pipeline_mode<synchronous>, transform_indices = @transform_1, window_bounds = array<i64: 32, 128>}, {pipeline_mode = #tpu.pipeline_mode<synchronous>, transform_indices = @transform_2, window_bounds = array<i64: 128, 32>}, {pipeline_mode = #tpu.pipeline_mode<synchronous>, transform_indices = @transform_3, window_bounds = array<i64: 1, 128>}, {transform_indices = @transform_4, window_bounds = array<i64: 1024, 32>}, {transform_indices = @transform_5, window_bounds = array<i64: 1, 8, 128>}, {transform_indices = @transform_6, window_bounds = array<i64: 1, 8, 128>}]} {
    %c0 = arith.constant 0 : index
    %c0_0 = arith.constant 0 : index
    %0 = vector.load %arg1[%c0, %c0_0] : memref<1024x32xf32, #tpu.memory_space<vmem>>, vector<1024x32xf32>
    %1 = arith.mulf %0, %0 : vector<1024x32xf32>
    %cst = arith.constant dense<0.000000e+00> : vector<1024xf32>
    %2 = vector.multi_reduction <add>, %1, %cst [1] : vector<1024x32xf32> to vector<1024xf32>
    %3 = vector.shape_cast %2 : vector<1024xf32> to vector<1024x1xf32>
    %c0_1 = arith.constant 0 : index
    %c0_2 = arith.constant 0 : index
    %4 = vector.load %arg2[%c0_1, %c0_2] : memref<32x128xf32, #tpu.memory_space<vmem>>, vector<32x128xf32>
    %cst_3 = arith.constant dense<0.000000e+00> : vector<1024x128xf32>
    %5 = tpu.matmul %0, %4, %cst_3 {dimension_numbers = #tpu.dot_dimension_numbers<[1], [0], [0], [1], [0, 0, 1, 1], [], []>} : vector<1024x32xf32>, vector<32x128xf32>, vector<1024x128xf32> -> vector<1024x128xf32>
    %c0_4 = arith.constant 0 : index
    %c0_5 = arith.constant 0 : index
    %6 = vector.load %arg4[%c0_4, %c0_5] : memref<1x128xf32, #tpu.memory_space<vmem>>, vector<1x128xf32>
    %7 = vector.broadcast %3 : vector<1024x1xf32> to vector<1024x128xf32>
    %8 = vector.broadcast %6 : vector<1x128xf32> to vector<1024x128xf32>
    %9 = arith.addf %7, %8 : vector<1024x128xf32>
    %cst_6 = arith.constant 2.000000e+00 : f32
    %10 = vector.broadcast %cst_6 : f32 to vector<1024x128xf32>
    %11 = arith.mulf %10, %5 : vector<1024x128xf32>
    %12 = arith.subf %9, %11 : vector<1024x128xf32>
    %13 = tpu.reduce_index %12 {axis = 1 : i32, kind = #tpu.reduction_kind<arg_min>} : vector<1024x128xf32> -> vector<1024xi32>
    %14 = tpu.iota {dimensions = array<i32: 1>} : vector<1024x128xi32>
    %15 = vector.shape_cast %13 : vector<1024xi32> to vector<1024x1xi32>
    %16 = vector.broadcast %15 : vector<1024x1xi32> to vector<1024x128xi32>
    %17 = arith.cmpi eq, %14, %16 : vector<1024x128xi32>
    %18 = arith.extui %17 : vector<1024x128xi1> to vector<1024x128xi32>
    %19 = arith.sitofp %18 : vector<1024x128xi32> to vector<1024x128xf32>
    %c0_7 = arith.constant 0 : index
    %c0_8 = arith.constant 0 : index
    %20 = vector.load %arg3[%c0_7, %c0_8] : memref<128x32xf32, #tpu.memory_space<vmem>>, vector<128x32xf32>
    %cst_9 = arith.constant dense<0.000000e+00> : vector<1024x32xf32>
    %21 = tpu.matmul %19, %20, %cst_9 {dimension_numbers = #tpu.dot_dimension_numbers<[1], [0], [0], [1], [0, 0, 1, 1], [], []>} : vector<1024x128xf32>, vector<128x32xf32>, vector<1024x32xf32> -> vector<1024x32xf32>
    %c0_10 = arith.constant 0 : index
    %c0_11 = arith.constant 0 : index
    %22 = vector.load %arg5[%c0_10, %c0_11] : memref<1024x32xf32, #tpu.memory_space<vmem>>, vector<1024x32xf32>
    tpu.vector_store %arg5[%c0_10, %c0_11], %21 {strides = array<i32>} : memref<1024x32xf32, #tpu.memory_space<vmem>>, vector<1024x32xf32>,
    %23 = arith.subf %21, %0 : vector<1024x32xf32>
    %24 = math.absf %23 : vector<1024x32xf32>
    %cst_12 = arith.constant dense<0.000000e+00> : vector<1024xf32>
    %25 = vector.multi_reduction <add>, %24, %cst_12 [1] : vector<1024x32xf32> to vector<1024xf32>
    %26 = vector.shape_cast %13 : vector<1024xi32> to vector<1x8x128xi32>
    %c0_13 = arith.constant 0 : index
    %c0_14 = arith.constant 0 : index
    %c0_15 = arith.constant 0 : index
    %27 = vector.load %arg6[%c0_13, %c0_14, %c0_15] : memref<1x8x128xi32, #tpu.memory_space<vmem>>, vector<1x8x128xi32>
    tpu.vector_store %arg6[%c0_13, %c0_14, %c0_15], %26 {strides = array<i32>} : memref<1x8x128xi32, #tpu.memory_space<vmem>>, vector<1x8x128xi32>,
    %28 = vector.shape_cast %25 : vector<1024xf32> to vector<1x8x128xf32>
    %c0_16 = arith.constant 0 : index
    %c0_17 = arith.constant 0 : index
    %c0_18 = arith.constant 0 : index
    %29 = vector.load %arg7[%c0_16, %c0_17, %c0_18] : memref<1x8x128xf32, #tpu.memory_space<vmem>>, vector<1x8x128xf32>
    tpu.vector_store %arg7[%c0_16, %c0_17, %c0_18], %28 {strides = array<i32>} : memref<1x8x128xf32, #tpu.memory_space<vmem>>, vector<1x8x128xf32>,
    return
  }
  func.func @transform_0(%arg0: i32) -> (i32, i32) {
    %c0_i32 = arith.constant 0 : i32
    %c0_i32_0 = arith.constant 0 : i32
    return %arg0, %c0_i32 : i32, i32
  }
  func.func @transform_1(%arg0: i32) -> (i32, i32) {
    %c0_i32 = arith.constant 0 : i32
    %c0_i32_0 = arith.constant 0 : i32
    %c0_i32_1 = arith.constant 0 : i32
    return %c0_i32, %c0_i32_0 : i32, i32
  }
  func.func @transform_2(%arg0: i32) -> (i32, i32) {
    %c0_i32 = arith.constant 0 : i32
    %c0_i32_0 = arith.constant 0 : i32
    %c0_i32_1 = arith.constant 0 : i32
    return %c0_i32, %c0_i32_0 : i32, i32
  }
  func.func @transform_3(%arg0: i32) -> (i32, i32) {
    %c0_i32 = arith.constant 0 : i32
    %c0_i32_0 = arith.constant 0 : i32
    %c0_i32_1 = arith.constant 0 : i32
    return %c0_i32, %c0_i32_0 : i32, i32
  }
  func.func @transform_4(%arg0: i32) -> (i32, i32) {
    %c0_i32 = arith.constant 0 : i32
    %c0_i32_0 = arith.constant 0 : i32
    return %arg0, %c0_i32 : i32, i32
  }
  func.func @transform_5(%arg0: i32) -> (i32, i32, i32) {
    %c0_i32 = arith.constant 0 : i32
    %c0_i32_0 = arith.constant 0 : i32
    %c0_i32_1 = arith.constant 0 : i32
    return %arg0, %c0_i32, %c0_i32_0 : i32, i32, i32
  }
  func.func @transform_6(%arg0: i32) -> (i32, i32, i32) {
    %c0_i32 = arith.constant 0 : i32
    %c0_i32_0 = arith.constant 0 : i32
    %c0_i32_1 = arith.constant 0 : i32
    return %arg0, %c0_i32, %c0_i32_0 : i32, i32, i32
  }
}

</mosaic_0001>

<bundles_post_ra>
// kernel: tpu_custom_call.1
= control target key start
LH: loop header
LB: loop body
LE: loop exit
PB: predicated region body
PF: predicated region fallthrough
CT: control target
= control target key end

     0   :  { %12 = vsyncpa [#allocation3], 0  ;;  %vm11165_vm0 = vcmask 261120   ;;  %s11128_s0 = inlined_call_operand.vmem [shape: f32[1024,32], index: 0, kind: input, shape index: {}]   ;;  %s11129_s1 = inlined_call_operand.vmem [shape: f32[32,128], index: 1, kind: input, shape index: {}]   ;;  %s11130_s2 = inlined_call_operand.vmem [shape: f32[128,32], index: 2, kind: input, shape index: {}]   ;;  %s11131_s3 = inlined_call_operand.vmem [shape: f32[1,128], index: 3, kind: input, shape index: {}]   ;;  %s11132_s4 = inlined_call_operand.vmem [shape: f32[1024,32], index: 4, kind: output, shape index: {0}]   ;;  %s11133_s5 = inlined_call_operand.hbm [shape: s32[1,8,128], index: 5, kind: output, shape index: {1}]   ;;  %s11134_s6 = inlined_call_operand.hbm [shape: f32[1,8,128], index: 6, kind: output, shape index: {2}]  }
   0x1   :  { %v666_v0 = vld [vmem:[%s11129_s1 + $0x18] sm:$0xff]  ;;  %v665_v1 = vld [vmem:[%s11129_s1 + $0x10] sm:$0xff]  ;;  %v22_v4 = vld [vmem:[%s11128_s0] sm:$0xff] }
   0x2   :  { %v24_v2 = vld [vmem:[%s11128_s0 + $0x10] sm:$0xff]  ;;  %6439 = vmatprep.subr.mxu0 %v666_v0  ;;  %v664_v5 = vld [vmem:[%s11129_s1 + $0x8] sm:$0xff]  ;;  %v150_v6 = vmul.f32 %v22_v4, %v22_v4  ;;  %v25_v7 = vld [vmem:[%s11128_s0 + $0x18] sm:$0xff]  ;;  %6447 = vmatprep.mubr.msk.f32.mxu0 %vm11165_vm0, %v22_v4 }
   0x3   :  { %v152_v3 = vmul.f32 %v24_v2, %v24_v2  ;;  %6440 = vmatpush3.msra.mxu0 %v666_v0  ;;  %v23_v8 = vld [vmem:[%s11128_s0 + $0x8] sm:$0xff]  ;;  %v153_v11 = vmul.f32 %v25_v7, %v25_v7  ;;  %v26_v13 = vld [vmem:[%s11128_s0 + $0x20] sm:$0xff]  ;;  %v29_v20 = vld [vmem:[%s11128_s0 + $0x38] sm:$0xff] }
   0x4   :  { %v27_v9 = vld [vmem:[%s11128_s0 + $0x28] sm:$0xff]  ;;  %6441 = vmatprep.subr.mxu0 %v665_v1  ;;  %v151_v12 = vmul.f32 %v23_v8, %v23_v8  ;;  %v279_v14 = vsel %vm11165_vm0, %v150_v6, 0.0  ;;  %v663_v15 = vld [vmem:[%s11129_s1] sm:$0xff]  ;;  %v154_v19 = vmul.f32 %v26_v13, %v26_v13  ;;  %v28_v21 = vld [vmem:[%s11128_s0 + $0x30] sm:$0xff]  ;;  %v157_v23 = vmul.f32 %v29_v20, %v29_v20 }
   0x5   :  { %v285_v10 = vsel %vm11165_vm0, %v152_v3, 0.0  ;;  %6442 = vmatpush3.msra.mxu0 %v665_v1  ;;  %280 = vadd.xlane.f32.xlu0 %v279_v14  ;;  %v288_v16 = vsel %vm11165_vm0, %v153_v11, 0.0  ;;  %v155_v17 = vmul.f32 %v27_v9, %v27_v9  ;;  %v156_v25 = vmul.f32 %v28_v21, %v28_v21  ;;  %v31_v26 = vld [vmem:[%s11128_s0 + $0x48] sm:$0xff]  ;;  %v30_v27 = vld [vmem:[%s11128_s0 + $0x40] sm:$0xff]  ;;  %v33_v32 = vld [vmem:[%s11128_s0 + $0x58] sm:$0xff] }
   0x6   :  { %286 = vadd.xlane.f32.xlu1 %v285_v10  ;;  %6443 = vmatprep.subr.mxu0 %v664_v5  ;;  %v282_v18 = vsel %vm11165_vm0, %v151_v12, 0.0  ;;  %v291_v24 = vsel %vm11165_vm0, %v154_v19, 0.0  ;;  %v300_v28 = vsel %vm11165_vm0, %v157_v23, 0.0  ;;  %v159_v29 = vmul.f32 %v31_v26, %v31_v26  ;;  %v32_v33 = vld [vmem:[%s11128_s0 + $0x50] sm:$0xff]  ;;  %v35_v38 = vld [vmem:[%s11128_s0 + $0x68] sm:$0xff]  ;;  %v34_v39 = vld [vmem:[%s11128_s0 + $0x60] sm:$0xff] }
   0x7   :  { %6444 = vmatpush3.msra.mxu0 %v664_v5  ;;  %v294_v22 = vsel %vm11165_vm0, %v155_v17, 0.0  ;;  %v297_v30 = vsel %vm11165_vm0, %v156_v25, 0.0  ;;  %v158_v31 = vmul.f32 %v30_v27, %v30_v27  ;;  %v161_v35 = vmul.f32 %v33_v32, %v33_v32  ;;  %v37_v44 = vld [vmem:[%s11128_s0 + $0x78] sm:$0xff]  ;;  %v36_v45 = vld [vmem:[%s11128_s0 + $0x70] sm:$0xff]  ;;  %v39_v50 = vld [vmem:[%s11128_s0 + $0x88] sm:$0xff] }
   0x8   :  { %6445 = vmatprep.subr.mxu0 %v663_v15  ;;  %v306_v34 = vsel %vm11165_vm0, %v159_v29, 0.0  ;;  %v160_v37 = vmul.f32 %v32_v33, %v32_v33  ;;  %v163_v41 = vmul.f32 %v35_v38, %v35_v38  ;;  %v162_v43 = vmul.f32 %v34_v39, %v34_v39  ;;  %v38_v51 = vld [vmem:[%s11128_s0 + $0x80] sm:$0xff] }
   0x9   :  { %6446 = vmatpush3.msra.mxu0 %v663_v15  ;;  %283 = vadd.xlane.f32.xlu0 %v282_v18  ;;  %v303_v36 = vsel %vm11165_vm0, %v158_v31, 0.0  ;;  %v312_v40 = vsel %vm11165_vm0, %v161_v35, 0.0  ;;  %v165_v47 = vmul.f32 %v37_v44, %v37_v44  ;;  %v164_v49 = vmul.f32 %v36_v45, %v36_v45 }
   0xa   :  { %289 = vadd.xlane.f32.xlu1 %v288_v16  ;;  %6448 = vmatmul.mubr.msk.f32.vlgmr.msra.gmra.mxu0 %vm11165_vm0, %v23_v8  ;;  %v309_v42 = vsel %vm11165_vm0, %v160_v37, 0.0  ;;  %v318_v46 = vsel %vm11165_vm0, %v163_v41, 0.0  ;;  %v315_v48 = vsel %vm11165_vm0, %v162_v43, 0.0 }
   0xb   :  { %6450 = vmatprep.mubr.msk.f32.mxu0 %vm11165_vm0, %v24_v2 }
   0xd   :  { %292 = vadd.xlane.f32.xlu0 %v291_v24 }
   0xe   :  { %295 = vadd.xlane.f32.xlu1 %v294_v22  ;;  %6451 = vmatmul.mubr.msk.f32.gmra.mxu0 %vm11165_vm0, %v25_v7 }
   0xf   :  { %6453 = vmatprep.mubr.msk.f32.mxu0 %vm11165_vm0, %v26_v13 }
  0x11   :  { %298 = vadd.xlane.f32.xlu0 %v297_v30 }
  0x12   :  { %301 = vadd.xlane.f32.xlu1 %v300_v28  ;;  %6454 = vmatmul.mubr.msk.f32.gmra.mxu0 %vm11165_vm0, %v27_v9 }
  0x13   :  { %6456 = vmatprep.mubr.msk.f32.mxu0 %vm11165_vm0, %v28_v21 }
  0x15   :  { %304 = vadd.xlane.f32.xlu0 %v303_v36 }
  0x16   :  { %307 = vadd.xlane.f32.xlu1 %v306_v34  ;;  %6457 = vmatmul.mubr.msk.f32.gmra.mxu0 %vm11165_vm0, %v29_v20 }
  0x17   :  { %6459 = vmatprep.mubr.msk.f32.mxu0 %vm11165_vm0, %v30_v27 }
  0x19   :  { %310 = vadd.xlane.f32.xlu0 %v309_v42 }
  0x1a   :  { %313 = vadd.xlane.f32.xlu1 %v312_v40  ;;  %6460 = vmatmul.mubr.msk.f32.gmra.mxu0 %vm11165_vm0, %v31_v26 }
  0x1b   :  { %6462 = vmatprep.mubr.msk.f32.mxu0 %vm11165_vm0, %v32_v33 }
  0x1c   :  { %13 = vsyncpa [#allocation5], 0  ;;  %v324_v52 = vsel %vm11165_vm0, %v165_v47, 0.0  ;;  %v167_v53 = vmul.f32 %v39_v50, %v39_v50  ;;  %v321_v54 = vsel %vm11165_vm0, %v164_v49, 0.0  ;;  %v166_v55 = vmul.f32 %v38_v51, %v38_v51  ;;  %v41_v56 = vld [vmem:[%s11128_s0 + $0x98] sm:$0xff]  ;;  %v40_v57 = vld [vmem:[%s11128_s0 + $0x90] sm:$0xff] }
  0x1d   :  { %316 = vadd.xlane.f32.xlu0 %v315_v48  ;;  %v169_v59 = vmul.f32 %v41_v56, %v41_v56  ;;  %v168_v61 = vmul.f32 %v40_v57, %v40_v57  ;;  %v43_v62 = vld [vmem:[%s11128_s0 + $0xa8] sm:$0xff]  ;;  %v42_v63 = vld [vmem:[%s11128_s0 + $0xa0] sm:$0xff]  ;;  %v45_v4 = vld [vmem:[%s11128_s0 + $0xb8] sm:$0xff]  ;;  %vm4287_vm13 = vcmask 130112   ;;  %vm4294_vm14 = vcmask 195712  }
  0x1e   :  { %319 = vadd.xlane.f32.xlu1 %v318_v46  ;;  %6463 = vmatmul.mubr.msk.f32.gmra.mxu0 %vm11165_vm0, %v33_v32  ;;  %v330_v58 = vsel %vm11165_vm0, %v167_v53, 0.0  ;;  %v327_v60 = vsel %vm11165_vm0, %v166_v55, 0.0  ;;  %v171_v1 = vmul.f32 %v43_v62, %v43_v62  ;;  %v170_v3 = vmul.f32 %v42_v63, %v42_v63  ;;  %v44_v5 = vld [vmem:[%s11128_s0 + $0xb0] sm:$0xff]  ;;  %v47_v10 = vld [vmem:[%s11128_s0 + $0xc8] sm:$0xff]  ;;  %v46_v11 = vld [vmem:[%s11128_s0 + $0xc0] sm:$0xff] }
  0x1f   :  { %6465 = vmatprep.mubr.msk.f32.mxu0 %vm11165_vm0, %v34_v39  ;;  %v336_v0 = vsel %vm11165_vm0, %v169_v59, 0.0  ;;  %v333_v2 = vsel %vm11165_vm0, %v168_v61, 0.0  ;;  %v173_v7 = vmul.f32 %v45_v4, %v45_v4  ;;  %v172_v9 = vmul.f32 %v44_v5, %v44_v5  ;;  %v49_v16 = vld [vmem:[%s11128_s0 + $0xd8] sm:$0xff]  ;;  %v48_v17 = vld [vmem:[%s11128_s0 + $0xd0] sm:$0xff]  ;;  %v51_v22 = vld [vmem:[%s11128_s0 + $0xe8] sm:$0xff] }
  0x20   :  { %v342_v6 = vsel %vm11165_vm0, %v171_v1, 0.0  ;;  %v339_v8 = vsel %vm11165_vm0, %v170_v3, 0.0  ;;  %v175_v13 = vmul.f32 %v47_v10, %v47_v10  ;;  %v174_v15 = vmul.f32 %v46_v11, %v46_v11  ;;  %v50_v23 = vld [vmem:[%s11128_s0 + $0xe0] sm:$0xff]  ;;  %v53_v28 = vld [vmem:[%s11128_s0 + $0xf8] sm:$0xff]  ;;  %v52_v29 = vld [vmem:[%s11128_s0 + $0xf0] sm:$0xff] }
  0x21   :  { %322 = vadd.xlane.f32.xlu0 %v321_v54  ;;  %v348_v12 = vsel %vm11165_vm0, %v173_v7, 0.0  ;;  %v345_v14 = vsel %vm11165_vm0, %v172_v9, 0.0  ;;  %v177_v19 = vmul.f32 %v49_v16, %v49_v16  ;;  %v176_v21 = vmul.f32 %v48_v17, %v48_v17  ;;  %v55_v34 = vld [vmem:[%s11128_s0 + $0x108] sm:$0xff]  ;;  %v54_v35 = vld [vmem:[%s11128_s0 + $0x100] sm:$0xff]  ;;  %v57_v40 = vld [vmem:[%s11128_s0 + $0x118] sm:$0xff] }
  0x22   :  { %325 = vadd.xlane.f32.xlu1 %v324_v52  ;;  %6466 = vmatmul.mubr.msk.f32.gmra.mxu0 %vm11165_vm0, %v35_v38  ;;  %v354_v18 = vsel %vm11165_vm0, %v175_v13, 0.0  ;;  %v351_v20 = vsel %vm11165_vm0, %v174_v15, 0.0  ;;  %v179_v25 = vmul.f32 %v51_v22, %v51_v22  ;;  %v178_v27 = vmul.f32 %v50_v23, %v50_v23  ;;  %v56_v41 = vld [vmem:[%s11128_s0 + $0x110] sm:$0xff]  ;;  %v59_v46 = vld [vmem:[%s11128_s0 + $0x128] sm:$0xff]  ;;  %v58_v47 = vld [vmem:[%s11128_s0 + $0x120] sm:$0xff] }
  0x23   :  { %6468 = vmatprep.mubr.msk.f32.mxu0 %vm11165_vm0, %v36_v45  ;;  %v360_v24 = vsel %vm11165_vm0, %v177_v19, 0.0  ;;  %v357_v26 = vsel %vm11165_vm0, %v176_v21, 0.0  ;;  %v181_v31 = vmul.f32 %v53_v28, %v53_v28  ;;  %v180_v33 = vmul.f32 %v52_v29, %v52_v29  ;;  %v61_v52 = vld [vmem:[%s11128_s0 + $0x138] sm:$0xff]  ;;  %v60_v53 = vld [vmem:[%s11128_s0 + $0x130] sm:$0xff]  ;;  %v62_v59 = vld [vmem:[%s11128_s0 + $0x140] sm:$0xff] }
  0x24   :  { %v366_v30 = vsel %vm11165_vm0, %v179_v25, 0.0  ;;  %v363_v32 = vsel %vm11165_vm0, %v178_v27, 0.0  ;;  %v183_v37 = vmul.f32 %v55_v34, %v55_v34  ;;  %v182_v39 = vmul.f32 %v54_v35, %v54_v35  ;;  %v64_v1 = vld [vmem:[%s11128_s0 + $0x150] sm:$0xff]  ;;  %v66_v7 = vld [vmem:[%s11128_s0 + $0x160] sm:$0xff] }
  0x25   :  { %328 = vadd.xlane.f32.xlu0 %v327_v60  ;;  %v372_v36 = vsel %vm11165_vm0, %v181_v31, 0.0  ;;  %v369_v38 = vsel %vm11165_vm0, %v180_v33, 0.0  ;;  %v185_v43 = vmul.f32 %v57_v40, %v57_v40  ;;  %v184_v45 = vmul.f32 %v56_v41, %v56_v41  ;;  %v68_v13 = vld [vmem:[%s11128_s0 + $0x170] sm:$0xff]  ;;  %v70_v19 = vld [vmem:[%s11128_s0 + $0x180] sm:$0xff] }
  0x26   :  { %331 = vadd.xlane.f32.xlu1 %v330_v58  ;;  %6469 = vmatmul.mubr.msk.f32.gmra.mxu0 %vm11165_vm0, %v37_v44  ;;  %v378_v42 = vsel %vm11165_vm0, %v183_v37, 0.0  ;;  %v375_v44 = vsel %vm11165_vm0, %v182_v39, 0.0  ;;  %v187_v49 = vmul.f32 %v59_v46, %v59_v46  ;;  %v189_v55 = vmul.f32 %v61_v52, %v61_v52  ;;  %v63_v58 = vld [vmem:[%s11128_s0 + $0x148] sm:$0xff]  ;;  %v72_v25 = vld [vmem:[%s11128_s0 + $0x190] sm:$0xff]  ;;  %v74_v31 = vld [vmem:[%s11128_s0 + $0x1a0] sm:$0xff] }
  0x27   :  { %6471 = vmatprep.mubr.msk.f32.mxu0 %vm11165_vm0, %v38_v51  ;;  %v384_v48 = vsel %vm11165_vm0, %v185_v43, 0.0  ;;  %v186_v51 = vmul.f32 %v58_v47, %v58_v47  ;;  %v191_v61 = vmul.f32 %v63_v58, %v63_v58  ;;  %v76_v37 = vld [vmem:[%s11128_s0 + $0x1b0] sm:$0xff]  ;;  %v78_v43 = vld [vmem:[%s11128_s0 + $0x1c0] sm:$0xff] }
  0x28   :  { %v390_v54 = vsel %vm11165_vm0, %v187_v49, 0.0  ;;  %v396_v60 = vsel %vm11165_vm0, %v189_v55, 0.0  ;;  %v80_v49 = vld [vmem:[%s11128_s0 + $0x1d0] sm:$0xff]  ;;  %v82_v55 = vld [vmem:[%s11128_s0 + $0x1e0] sm:$0xff] }
  0x29   :  { %334 = vadd.xlane.f32.xlu0 %v333_v2  ;;  %v402_v2 = vsel %vm11165_vm0, %v191_v61, 0.0  ;;  %v84_v61 = vld [vmem:[%s11128_s0 + $0x1f0] sm:$0xff] }
  0x2a   :  { %337 = vadd.xlane.f32.xlu1 %v336_v0  ;;  %6472 = vmatmul.mubr.msk.f32.gmra.mxu0 %vm11165_vm0, %v39_v50  ;;  %v381_v50 = vsel %vm11165_vm0, %v184_v45, 0.0  ;;  %v65_v0 = vld [vmem:[%s11128_s0 + $0x158] sm:$0xff] }
  0x2b   :  { %6474 = vmatprep.mubr.msk.f32.mxu0 %vm11165_vm0, %v40_v57  ;;  %v188_v57 = vmul.f32 %v60_v53, %v60_v53  ;;  %v193_v3 = vmul.f32 %v65_v0, %v65_v0 }
  0x2d   :  { %340 = vadd.xlane.f32.xlu0 %v339_v8  ;;  %v408_v8 = vsel %vm11165_vm0, %v193_v3, 0.0  ;;  %v86_v3 = vld [vmem:[%s11128_s0 + $0x200] sm:$0xff] }
  0x2e   :  { %343 = vadd.xlane.f32.xlu1 %v342_v6  ;;  %6475 = vmatmul.mubr.msk.f32.gmra.mxu0 %vm11165_vm0, %v41_v56  ;;  %v387_v56 = vsel %vm11165_vm0, %v186_v51, 0.0  ;;  %v67_v6 = vld [vmem:[%s11128_s0 + $0x168] sm:$0xff] }
  0x2f   :  { %6477 = vmatprep.mubr.msk.f32.mxu0 %vm11165_vm0, %v42_v63  ;;  %v190_v63 = vmul.f32 %v62_v59, %v62_v59  ;;  %v195_v9 = vmul.f32 %v67_v6, %v67_v6 }
  0x31   :  { %346 = vadd.xlane.f32.xlu0 %v345_v14  ;;  %v414_v14 = vsel %vm11165_vm0, %v195_v9, 0.0  ;;  %v88_v9 = vld [vmem:[%s11128_s0 + $0x210] sm:$0xff] }
  0x32   :  { %349 = vadd.xlane.f32.xlu1 %v348_v12  ;;  %6478 = vmatmul.mubr.msk.f32.gmra.mxu0 %vm11165_vm0, %v43_v62  ;;  %v393_v62 = vsel %vm11165_vm0, %v188_v57, 0.0  ;;  %v69_v12 = vld [vmem:[%s11128_s0 + $0x178] sm:$0xff] }
  0x33   :  { %6480 = vmatprep.mubr.msk.f32.mxu0 %vm11165_vm0, %v44_v5  ;;  %v192_v5 = vmul.f32 %v64_v1, %v64_v1  ;;  %v197_v15 = vmul.f32 %v69_v12, %v69_v12 }
  0x35   :  { %352 = vadd.xlane.f32.xlu0 %v351_v20  ;;  %v420_v20 = vsel %vm11165_vm0, %v197_v15, 0.0  ;;  %v90_v15 = vld [vmem:[%s11128_s0 + $0x220] sm:$0xff] }
  0x36   :  { %355 = vadd.xlane.f32.xlu1 %v354_v18  ;;  %6481 = vmatmul.mubr.msk.f32.gmra.mxu0 %vm11165_vm0, %v45_v4  ;;  %v399_v4 = vsel %vm11165_vm0, %v190_v63, 0.0  ;;  %v71_v18 = vld [vmem:[%s11128_s0 + $0x188] sm:$0xff] }
  0x37   :  { %6483 = vmatprep.mubr.msk.f32.mxu0 %vm11165_vm0, %v46_v11  ;;  %v194_v11 = vmul.f32 %v66_v7, %v66_v7  ;;  %v199_v21 = vmul.f32 %v71_v18, %v71_v18 }
  0x39   :  { %358 = vadd.xlane.f32.xlu0 %v357_v26  ;;  %v426_v26 = vsel %vm11165_vm0, %v199_v21, 0.0  ;;  %v92_v21 = vld [vmem:[%s11128_s0 + $0x230] sm:$0xff] }
  0x3a   :  { %361 = vadd.xlane.f32.xlu1 %v360_v24  ;;  %6484 = vmatmul.mubr.msk.f32.gmra.mxu0 %vm11165_vm0, %v47_v10  ;;  %v405_v10 = vsel %vm11165_vm0, %v192_v5, 0.0  ;;  %v73_v24 = vld [vmem:[%s11128_s0 + $0x198] sm:$0xff] }
  0x3b   :  { %6486 = vmatprep.mubr.msk.f32.mxu0 %vm11165_vm0, %v48_v17  ;;  %v196_v17 = vmul.f32 %v68_v13, %v68_v13  ;;  %v201_v27 = vmul.f32 %v73_v24, %v73_v24 }
  0x3d   :  { %364 = vadd.xlane.f32.xlu0 %v363_v32  ;;  %v432_v32 = vsel %vm11165_vm0, %v201_v27, 0.0  ;;  %v94_v27 = vld [vmem:[%s11128_s0 + $0x240] sm:$0xff] }
  0x3e   :  { %367 = vadd.xlane.f32.xlu1 %v366_v30  ;;  %6487 = vmatmul.mubr.msk.f32.gmra.mxu0 %vm11165_vm0, %v49_v16  ;;  %v411_v16 = vsel %vm11165_vm0, %v194_v11, 0.0  ;;  %v75_v30 = vld [vmem:[%s11128_s0 + $0x1a8] sm:$0xff] }
  0x3f   :  { %6489 = vmatprep.mubr.msk.f32.mxu0 %vm11165_vm0, %v50_v23  ;;  %v198_v23 = vmul.f32 %v70_v19, %v70_v19  ;;  %v203_v33 = vmul.f32 %v75_v30, %v75_v30 }
  0x41   :  { %370 = vadd.xlane.f32.xlu0 %v369_v38  ;;  %v438_v38 = vsel %vm11165_vm0, %v203_v33, 0.0  ;;  %v222_v33 = vmul.f32 %v94_v27, %v94_v27 }
  0x42   :  { %373 = vadd.xlane.f32.xlu1 %v372_v36  ;;  %6490 = vmatmul.mubr.msk.f32.gmra.mxu0 %vm11165_vm0, %v51_v22  ;;  %v417_v22 = vsel %vm11165_vm0, %v196_v17, 0.0  ;;  %v77_v36 = vld [vmem:[%s11128_s0 + $0x1b8] sm:$0xff] }
  0x43   :  { %6492 = vmatprep.mubr.msk.f32.mxu0 %vm11165_vm0, %v52_v29  ;;  %v200_v29 = vmul.f32 %v72_v25, %v72_v25  ;;  %v205_v39 = vmul.f32 %v77_v36, %v77_v36 }
  0x45   :  { %376 = vadd.xlane.f32.xlu0 %v375_v44  ;;  %v444_v44 = vsel %vm11165_vm0, %v205_v39, 0.0 }
  0x46   :  { %379 = vadd.xlane.f32.xlu1 %v378_v42  ;;  %6493 = vmatmul.mubr.msk.f32.gmra.mxu0 %vm11165_vm0, %v53_v28  ;;  %v423_v28 = vsel %vm11165_vm0, %v198_v23, 0.0  ;;  %v79_v42 = vld [vmem:[%s11128_s0 + $0x1c8] sm:$0xff] }
  0x47   :  { %6495 = vmatprep.mubr.msk.f32.mxu0 %vm11165_vm0, %v54_v35  ;;  %v202_v35 = vmul.f32 %v74_v31, %v74_v31  ;;  %v207_v45 = vmul.f32 %v79_v42, %v79_v42 }
  0x49   :  { %382 = vadd.xlane.f32.xlu0 %v381_v50  ;;  %v450_v50 = vsel %vm11165_vm0, %v207_v45, 0.0 }
  0x4a   :  { %385 = vadd.xlane.f32.xlu1 %v384_v48  ;;  %6496 = vmatmul.mubr.msk.f32.gmra.mxu0 %vm11165_vm0, %v55_v34  ;;  %v429_v34 = vsel %vm11165_vm0, %v200_v29, 0.0  ;;  %v81_v48 = vld [vmem:[%s11128_s0 + $0x1d8] sm:$0xff] }
  0x4b   :  { %6498 = vmatprep.mubr.msk.f32.mxu0 %vm11165_vm0, %v56_v41  ;;  %v204_v41 = vmul.f32 %v76_v37, %v76_v37  ;;  %v209_v51 = vmul.f32 %v81_v48, %v81_v48 }
  0x4d   :  { %388 = vadd.xlane.f32.xlu0 %v387_v56  ;;  %v456_v56 = vsel %vm11165_vm0, %v209_v51, 0.0  ;;  %v100_v51 = vld [vmem:[%s11128_s0 + $0x270] sm:$0xff] }
  0x4e   :  { %391 = vadd.xlane.f32.xlu1 %v390_v54  ;;  %6499 = vmatmul.mubr.msk.f32.gmra.mxu0 %vm11165_vm0, %v57_v40  ;;  %v435_v40 = vsel %vm11165_vm0, %v202_v35, 0.0  ;;  %v83_v54 = vld [vmem:[%s11128_s0 + $0x1e8] sm:$0xff]  ;;  %v96_v35 = vld [vmem:[%s11128_s0 + $0x250] sm:$0xff] }
  0x4f   :  { %6501 = vmatprep.mubr.msk.f32.mxu0 %vm11165_vm0, %v58_v47  ;;  %v206_v47 = vmul.f32 %v78_v43, %v78_v43  ;;  %v211_v57 = vmul.f32 %v83_v54, %v83_v54 }
  0x51   :  { %394 = vadd.xlane.f32.xlu0 %v393_v62  ;;  %v462_v62 = vsel %vm11165_vm0, %v211_v57, 0.0  ;;  %v228_v57 = vmul.f32 %v100_v51, %v100_v51 }
  0x52   :  { %397 = vadd.xlane.f32.xlu1 %v396_v60  ;;  %6502 = vmatmul.mubr.msk.f32.gmra.mxu0 %vm11165_vm0, %v59_v46  ;;  %v441_v46 = vsel %vm11165_vm0, %v204_v41, 0.0  ;;  %v85_v60 = vld [vmem:[%s11128_s0 + $0x1f8] sm:$0xff]  ;;  %v224_v41 = vmul.f32 %v96_v35, %v96_v35 }
  0x53   :  { %6504 = vmatprep.mubr.msk.f32.mxu0 %vm11165_vm0, %v60_v53  ;;  %v208_v53 = vmul.f32 %v80_v49, %v80_v49  ;;  %v213_v63 = vmul.f32 %v85_v60, %v85_v60 }
  0x55   :  { %400 = vadd.xlane.f32.xlu0 %v399_v4  ;;  %v468_v4 = vsel %vm11165_vm0, %v213_v63, 0.0 }
  0x56   :  { %403 = vadd.xlane.f32.xlu1 %v402_v2  ;;  %6505 = vmatmul.mubr.msk.f32.gmra.mxu0 %vm11165_vm0, %v61_v52  ;;  %v447_v52 = vsel %vm11165_vm0, %v206_v47, 0.0  ;;  %v87_v2 = vld [vmem:[%s11128_s0 + $0x208] sm:$0xff] }
  0x57   :  { %6507 = vmatprep.mubr.msk.f32.mxu0 %vm11165_vm0, %v62_v59  ;;  %v210_v59 = vmul.f32 %v82_v55, %v82_v55  ;;  %v215_v5 = vmul.f32 %v87_v2, %v87_v2 }
  0x59   :  { %406 = vadd.xlane.f32.xlu0 %v405_v10  ;;  %v474_v10 = vsel %vm11165_vm0, %v215_v5, 0.0 }
  0x5a   :  { %409 = vadd.xlane.f32.xlu1 %v408_v8  ;;  %6508 = vmatmul.mubr.msk.f32.gmra.mxu0 %vm11165_vm0, %v63_v58  ;;  %v453_v58 = vsel %vm11165_vm0, %v208_v53, 0.0  ;;  %v89_v8 = vld [vmem:[%s11128_s0 + $0x218] sm:$0xff] }
  0x5b   :  { %6510 = vmatprep.mubr.msk.f32.mxu0 %vm11165_vm0, %v64_v1  ;;  %v212_v1 = vmul.f32 %v84_v61, %v84_v61  ;;  %v217_v11 = vmul.f32 %v89_v8, %v89_v8 }
  0x5d   :  { %412 = vadd.xlane.f32.xlu0 %v411_v16  ;;  %v480_v16 = vsel %vm11165_vm0, %v217_v11, 0.0  ;;  %v106_v11 = vld [vmem:[%s11128_s0 + $0x2a0] sm:$0xff] }
  0x5e   :  { %415 = vadd.xlane.f32.xlu1 %v414_v14  ;;  %6511 = vmatmul.mubr.msk.f32.gmra.mxu0 %vm11165_vm0, %v65_v0  ;;  %v459_v0 = vsel %vm11165_vm0, %v210_v59, 0.0  ;;  %v91_v14 = vld [vmem:[%s11128_s0 + $0x228] sm:$0xff]  ;;  %v102_v59 = vld [vmem:[%s11128_s0 + $0x280] sm:$0xff] }
  0x5f   :  { %6513 = vmatprep.mubr.msk.f32.mxu0 %vm11165_vm0, %v66_v7  ;;  %v214_v7 = vmul.f32 %v86_v3, %v86_v3  ;;  %v219_v17 = vmul.f32 %v91_v14, %v91_v14 }
  0x61   :  { %418 = vadd.xlane.f32.xlu0 %v417_v22  ;;  %v486_v22 = vsel %vm11165_vm0, %v219_v17, 0.0  ;;  %v234_v17 = vmul.f32 %v106_v11, %v106_v11 }
  0x62   :  { %421 = vadd.xlane.f32.xlu1 %v420_v20  ;;  %6514 = vmatmul.mubr.msk.f32.gmra.mxu0 %vm11165_vm0, %v67_v6  ;;  %v465_v6 = vsel %vm11165_vm0, %v212_v1, 0.0  ;;  %v93_v20 = vld [vmem:[%s11128_s0 + $0x238] sm:$0xff]  ;;  %v230_v1 = vmul.f32 %v102_v59, %v102_v59 }
  0x63   :  { %6516 = vmatprep.mubr.msk.f32.mxu0 %vm11165_vm0, %v68_v13  ;;  %v216_v13 = vmul.f32 %v88_v9, %v88_v9  ;;  %v221_v23 = vmul.f32 %v93_v20, %v93_v20 }
  0x65   :  { %424 = vadd.xlane.f32.xlu0 %v423_v28  ;;  %v492_v29 = vsel %vm11165_vm0, %v221_v23, 0.0 }
  0x66   :  { %427 = vadd.xlane.f32.xlu1 %v426_v26  ;;  %6517 = vmatmul.mubr.msk.f32.gmra.mxu0 %vm11165_vm0, %v69_v12  ;;  %v471_v12 = vsel %vm11165_vm0, %v214_v7, 0.0  ;;  %v95_v26 = vld [vmem:[%s11128_s0 + $0x248] sm:$0xff] }
  0x67   :  { %6519 = vmatprep.mubr.msk.f32.mxu0 %vm11165_vm0, %v70_v19  ;;  %v218_v19 = vmul.f32 %v90_v15, %v90_v15 }
  0x69   :  { %430 = vadd.xlane.f32.xlu0 %v429_v34  ;;  %v97_v34 = vld [vmem:[%s11128_s0 + $0x258] sm:$0xff] }
  0x6a   :  { %433 = vadd.xlane.f32.xlu1 %v432_v32  ;;  %6520 = vmatmul.mubr.msk.f32.gmra.mxu0 %vm11165_vm0, %v71_v18  ;;  %v477_v18 = vsel %vm11165_vm0, %v216_v13, 0.0 }
  0x6b   :  { %6522 = vmatprep.mubr.msk.f32.mxu0 %vm11165_vm0, %v72_v25  ;;  %v220_v25 = vmul.f32 %v92_v21, %v92_v21 }
  0x6d   :  { %436 = vadd.xlane.f32.xlu0 %v435_v40  ;;  %v489_v32 = vsel %vm11165_vm0, %v220_v25, 0.0  ;;  %v495_v40 = vsel %vm11165_vm0, %v222_v33, 0.0 }
  0x6e   :  { %439 = vadd.xlane.f32.xlu1 %v438_v38  ;;  %6523 = vmatmul.mubr.msk.f32.gmra.mxu0 %vm11165_vm0, %v73_v24  ;;  %v483_v24 = vsel %vm11165_vm0, %v218_v19, 0.0  ;;  %v225_v38 = vmul.f32 %v97_v34, %v97_v34  ;;  %v108_v19 = vld [vmem:[%s11128_s0 + $0x2b0] sm:$0xff] }
  0x6f   :  { %6525 = vmatprep.mubr.msk.f32.mxu0 %vm11165_vm0, %v74_v31  ;;  %v236_v25 = vmul.f32 %v108_v19, %v108_v19 }
  0x70   :  { %v504_v45 = vsel %vm11165_vm0, %v225_v38, 0.0  ;;  %v112_v38 = vld [vmem:[%s11128_s0 + $0x2d0] sm:$0xff] }
  0x71   :  { %442 = vadd.xlane.f32.xlu0 %v441_v46 }
  0x72   :  { %445 = vadd.xlane.f32.xlu1 %v444_v44  ;;  %6526 = vmatmul.mubr.msk.f32.gmra.mxu0 %vm11165_vm0, %v75_v30  ;;  %v223_v30 = vmul.f32 %v95_v26, %v95_v26 }
  0x73   :  { %6528 = vmatprep.mubr.msk.f32.mxu0 %vm11165_vm0, %v76_v37 }
  0x74   :  { %v498_v37 = vsel %vm11165_vm0, %v223_v30, 0.0 }
  0x75   :  { %448 = vadd.xlane.f32.xlu0 %v447_v52 }
  0x76   :  { %451 = vadd.xlane.f32.xlu1 %v450_v50  ;;  %6529 = vmatmul.mubr.msk.f32.gmra.mxu0 %vm11165_vm0, %v77_v36  ;;  %v101_v50 = vld [vmem:[%s11128_s0 + $0x278] sm:$0xff] }
  0x77   :  { %6531 = vmatprep.mubr.msk.f32.mxu0 %vm11165_vm0, %v78_v43  ;;  %v98_v43 = vld [vmem:[%s11128_s0 + $0x260] sm:$0xff] }
  0x79   :  { %454 = vadd.xlane.f32.xlu0 %v453_v58  ;;  %v103_v58 = vld [vmem:[%s11128_s0 + $0x288] sm:$0xff] }
  0x7a   :  { %457 = vadd.xlane.f32.xlu1 %v456_v56  ;;  %6532 = vmatmul.mubr.msk.f32.gmra.mxu0 %vm11165_vm0, %v79_v42  ;;  %v99_v42 = vld [vmem:[%s11128_s0 + $0x268] sm:$0xff] }
  0x7b   :  { %6534 = vmatprep.mubr.msk.f32.mxu0 %vm11165_vm0, %v80_v49  ;;  %v227_v46 = vmul.f32 %v99_v42, %v99_v42  ;;  %v226_v49 = vmul.f32 %v98_v43, %v98_v43 }
  0x7d   :  { %460 = vadd.xlane.f32.xlu0 %v459_v0  ;;  %v510_v53 = vsel %vm11165_vm0, %v227_v46, 0.0  ;;  %v507_v56 = vsel %vm11165_vm0, %v226_v49, 0.0  ;;  %v513_v0 = vsel %vm11165_vm0, %v228_v57, 0.0  ;;  %v240_v46 = vmul.f32 %v112_v38, %v112_v38  ;;  %v114_v49 = vld [vmem:[%s11128_s0 + $0x2e0] sm:$0xff] }
  0x7e   :  { %463 = vadd.xlane.f32.xlu1 %v462_v62  ;;  %6535 = vmatmul.mubr.msk.f32.gmra.mxu0 %vm11165_vm0, %v81_v48  ;;  %v501_v48 = vsel %vm11165_vm0, %v224_v41, 0.0  ;;  %v231_v62 = vmul.f32 %v103_v58, %v103_v58  ;;  %v242_v57 = vmul.f32 %v114_v49, %v114_v49 }
  0x7f   :  { %6537 = vmatprep.mubr.msk.f32.mxu0 %vm11165_vm0, %v82_v55 }
  0x80   :  { %v522_v5 = vsel %vm11165_vm0, %v231_v62, 0.0 }
  0x81   :  { %466 = vadd.xlane.f32.xlu0 %v465_v6 }
  0x82   :  { %469 = vadd.xlane.f32.xlu1 %v468_v4  ;;  %6538 = vmatmul.mubr.msk.f32.gmra.mxu0 %vm11165_vm0, %v83_v54  ;;  %v229_v54 = vmul.f32 %v101_v50, %v101_v50 }
  0x83   :  { %6540 = vmatprep.mubr.msk.f32.mxu0 %vm11165_vm0, %v84_v61 }
  0x84   :  { %v516_v61 = vsel %vm11165_vm0, %v229_v54, 0.0 }
  0x85   :  { %472 = vadd.xlane.f32.xlu0 %v471_v12 }
  0x86   :  { %475 = vadd.xlane.f32.xlu1 %v474_v10  ;;  %6541 = vmatmul.mubr.msk.f32.gmra.mxu0 %vm11165_vm0, %v85_v60  ;;  %v107_v10 = vld [vmem:[%s11128_s0 + $0x2a8] sm:$0xff] }
  0x87   :  { %6543 = vmatprep.mubr.msk.f32.mxu0 %vm11165_vm0, %v86_v3  ;;  %v104_v3 = vld [vmem:[%s11128_s0 + $0x290] sm:$0xff] }
  0x89   :  { %478 = vadd.xlane.f32.xlu0 %v477_v18  ;;  %v109_v18 = vld [vmem:[%s11128_s0 + $0x2b8] sm:$0xff] }
  0x8a   :  { %481 = vadd.xlane.f32.xlu1 %v480_v16  ;;  %6544 = vmatmul.mubr.msk.f32.gmra.mxu0 %vm11165_vm0, %v87_v2  ;;  %v105_v2 = vld [vmem:[%s11128_s0 + $0x298] sm:$0xff] }
  0x8b   :  { %6546 = vmatprep.mubr.msk.f32.mxu0 %vm11165_vm0, %v88_v9  ;;  %v233_v6 = vmul.f32 %v105_v2, %v105_v2  ;;  %v232_v9 = vmul.f32 %v104_v3, %v104_v3 }
  0x8d   :  { %484 = vadd.xlane.f32.xlu0 %v483_v24  ;;  %v528_v13 = vsel %vm11165_vm0, %v233_v6, 0.0  ;;  %v525_v16 = vsel %vm11165_vm0, %v232_v9, 0.0  ;;  %v531_v24 = vsel %vm11165_vm0, %v234_v17, 0.0  ;;  %v118_v6 = vld [vmem:[%s11128_s0 + $0x300] sm:$0xff]  ;;  %v120_v17 = vld [vmem:[%s11128_s0 + $0x310] sm:$0xff] }
  0x8e   :  { %487 = vadd.xlane.f32.xlu1 %v486_v22  ;;  %6547 = vmatmul.mubr.msk.f32.gmra.mxu0 %vm11165_vm0, %v89_v8  ;;  %v7495_v31 = vpop.xlane.xlu0 %280  ;;  %v519_v8 = vsel %vm11165_vm0, %v230_v1, 0.0  ;;  %v237_v22 = vmul.f32 %v109_v18, %v109_v18 }
  0x8f   :  { %v7491_v28 = vpop.xlane.xlu1 %286  ;;  %6549 = vmatprep.mubr.msk.f32.mxu0 %vm11165_vm0, %v90_v15 }
  0x90   :  { %v540_v30 = vsel %vm11165_vm0, %v237_v22, 0.0 }
  0x91   :  { %490 = vadd.xlane.f32.xlu0 %v489_v32 }
  0x92   :  { %493 = vadd.xlane.f32.xlu1 %v492_v29  ;;  %6550 = vmatmul.mubr.msk.f32.gmra.mxu0 %vm11165_vm0, %v91_v14  ;;  %v7509_v39 = vpop.xlane.xlu0 %283  ;;  %v235_v14 = vmul.f32 %v107_v10, %v107_v10 }
  0x93   :  { %v7505_v36 = vpop.xlane.xlu1 %289  ;;  %6552 = vmatprep.mubr.msk.f32.mxu0 %vm11165_vm0, %v92_v21 }
  0x94   :  { %v534_v21 = vsel %vm11165_vm0, %v235_v14, 0.0  ;;  %v246_v14 = vmul.f32 %v118_v6, %v118_v6 }
  0x95   :  { %496 = vadd.xlane.f32.xlu0 %v495_v40 }
  0x96   :  { %499 = vadd.xlane.f32.xlu1 %v498_v37  ;;  %6553 = vmatmul.mubr.msk.f32.gmra.mxu0 %vm11165_vm0, %v93_v20  ;;  %v7523_v47 = vpop.xlane.xlu0 %292  ;;  %v113_v37 = vld [vmem:[%s11128_s0 + $0x2d8] sm:$0xff] }
  0x97   :  { %v7519_v44 = vpop.xlane.xlu1 %295  ;;  %6555 = vmatprep.mubr.msk.f32.mxu0 %vm11165_vm0, %v94_v27  ;;  %v110_v27 = vld [vmem:[%s11128_s0 + $0x2c0] sm:$0xff] }
  0x99   :  { %502 = vadd.xlane.f32.xlu0 %v501_v48  ;;  %v115_v48 = vld [vmem:[%s11128_s0 + $0x2e8] sm:$0xff] }
  0x9a   :  { %505 = vadd.xlane.f32.xlu1 %v504_v45  ;;  %6556 = vmatmul.mubr.msk.f32.gmra.mxu0 %vm11165_vm0, %v95_v26  ;;  %v7537_v55 = vpop.xlane.xlu0 %298  ;;  %v111_v26 = vld [vmem:[%s11128_s0 + $0x2c8] sm:$0xff] }
  0x9b   :  { %v7533_v52 = vpop.xlane.xlu1 %301  ;;  %6558 = vmatprep.mubr.msk.f32.mxu0 %vm11165_vm0, %v96_v35  ;;  %v239_v32 = vmul.f32 %v111_v26, %v111_v26  ;;  %v238_v35 = vmul.f32 %v110_v27, %v110_v27 }
  0x9d   :  { %508 = vadd.xlane.f32.xlu0 %v507_v56  ;;  %v546_v41 = vsel %vm11165_vm0, %v239_v32, 0.0  ;;  %v543_v45 = vsel %vm11165_vm0, %v238_v35, 0.0  ;;  %v549_v56 = vsel %vm11165_vm0, %v240_v46, 0.0  ;;  %v7715_v46 = vld [vmem:[%s11131_s3] ss:$0 sm:$0xff] }
  0x9e   :  { %511 = vadd.xlane.f32.xlu1 %v510_v53  ;;  %6559 = vmatmul.mubr.msk.f32.gmra.mxu0 %vm11165_vm0, %v97_v34  ;;  %v7551_v63 = vpop.xlane.xlu0 %304  ;;  %v537_v34 = vsel %vm11165_vm0, %v236_v25, 0.0  ;;  %v243_v53 = vmul.f32 %v115_v48, %v115_v48  ;;  %v248_v25 = vmul.f32 %v120_v17, %v120_v17 }
  0x9f   :  { %v7547_v60 = vpop.xlane.xlu1 %307  ;;  %6561 = vmatprep.mubr.msk.f32.mxu0 %vm11165_vm0, %v98_v43 }
  0xa0   :  { %v558_v62 = vsel %vm11165_vm0, %v243_v53, 0.0 }
  0xa1   :  { %514 = vadd.xlane.f32.xlu0 %v513_v0 }
  0xa2   :  { %517 = vadd.xlane.f32.xlu1 %v516_v61  ;;  %6562 = vmatmul.mubr.msk.f32.gmra.mxu0 %vm11165_vm0, %v99_v42  ;;  %v7565_v7 = vpop.xlane.xlu0 %310  ;;  %v241_v42 = vmul.f32 %v113_v37, %v113_v37 }
  0xa3   :  { %v7561_v4 = vpop.xlane.xlu1 %313  ;;  %6564 = vmatprep.mubr.msk.f32.mxu0 %vm11165_vm0, %v100_v51 }
  0xa4   :  { %v552_v51 = vsel %vm11165_vm0, %v241_v42, 0.0  ;;  %v7707_v42 = vld [vmem:[%s11128_s0 + $0x330] sm:$0xff] }
  0xa5   :  { %520 = vadd.xlane.f32.xlu0 %v519_v8 }
  0xa6   :  { %523 = vadd.xlane.f32.xlu1 %v522_v5  ;;  %6565 = vmatmul.mubr.msk.f32.gmra.mxu0 %vm11165_vm0, %v101_v50  ;;  %v7579_v15 = vpop.xlane.xlu0 %316  ;;  %v119_v5 = vld [vmem:[%s11128_s0 + $0x308] sm:$0xff] }
  0xa7   :  { %v7575_v12 = vpop.xlane.xlu1 %319  ;;  %6567 = vmatprep.mubr.msk.f32.mxu0 %vm11165_vm0, %v102_v59  ;;  %v116_v59 = vld [vmem:[%s11128_s0 + $0x2f0] sm:$0xff] }
  0xa9   :  { %526 = vadd.xlane.f32.xlu0 %v525_v16  ;;  %v121_v16 = vld [vmem:[%s11128_s0 + $0x318] sm:$0xff] }
  0xaa   :  { %529 = vadd.xlane.f32.xlu1 %v528_v13  ;;  %6568 = vmatmul.mubr.msk.f32.gmra.mxu0 %vm11165_vm0, %v103_v58  ;;  %v7593_v23 = vpop.xlane.xlu0 %322  ;;  %v117_v58 = vld [vmem:[%s11128_s0 + $0x2f8] sm:$0xff] }
  0xab   :  { %v7589_v20 = vpop.xlane.xlu1 %325  ;;  %6570 = vmatprep.mubr.msk.f32.mxu0 %vm11165_vm0, %v104_v3  ;;  %v245_v0 = vmul.f32 %v117_v58, %v117_v58  ;;  %v244_v3 = vmul.f32 %v116_v59, %v116_v59 }
  0xad   :  { %532 = vadd.xlane.f32.xlu0 %v531_v24  ;;  %v564_v9 = vsel %vm11165_vm0, %v245_v0, 0.0  ;;  %v561_v13 = vsel %vm11165_vm0, %v244_v3, 0.0  ;;  %v567_v24 = vsel %vm11165_vm0, %v246_v14, 0.0  ;;  %v7738_v0 = vld [vmem:[%s11128_s0 + $0x348] sm:$0xff] }
  0xae   :  { %535 = vadd.xlane.f32.xlu1 %v534_v21  ;;  %6571 = vmatmul.mubr.msk.f32.gmra.mxu0 %vm11165_vm0, %v105_v2  ;;  %v7607_v33 = vpop.xlane.xlu0 %328  ;;  %v555_v2 = vsel %vm11165_vm0, %v242_v57, 0.0  ;;  %v249_v21 = vmul.f32 %v121_v16, %v121_v16 }
  0xaf   :  { %v7603_v29 = vpop.xlane.xlu1 %331  ;;  %6573 = vmatprep.mubr.msk.f32.mxu0 %vm11165_vm0, %v106_v11 }
  0xb0   :  { %v576_v32 = vsel %vm11165_vm0, %v249_v21, 0.0  ;;  %v7774_v21 = vadd.f32 %v7715_v46, %v7505_v36 }
  0xb1   :  { %538 = vadd.xlane.f32.xlu0 %v537_v34 }
  0xb2   :  { %541 = vadd.xlane.f32.xlu1 %v540_v30  ;;  %6574 = vmatmul.mubr.msk.f32.gmra.mxu0 %vm11165_vm0, %v107_v10  ;;  %v7621_v43 = vpop.xlane.xlu0 %334  ;;  %v247_v10 = vmul.f32 %v119_v5, %v119_v5  ;;  %11261 = vst [vmem:[#allocation12_spill] sm:$0xff] %v7774_v21 }
  0xb3   :  { %v7617_v40 = vpop.xlane.xlu1 %337  ;;  %6576 = vmatprep.mubr.msk.f32.mxu0 %vm11165_vm0, %v108_v19 }
  0xb4   :  { %v570_v19 = vsel %vm11165_vm0, %v247_v10, 0.0  ;;  %v7762_v10 = vld [vmem:[%s11130_s2 + $0x68] sm:$0xff] }
  0xb5   :  { %544 = vadd.xlane.f32.xlu0 %v543_v45  ;;  %v2804_v45 = vld [vmem:[%s11130_s2 + $0x78] sm:$0xff] }
  0xb6   :  { %547 = vadd.xlane.f32.xlu1 %v546_v41  ;;  %6577 = vmatmul.mubr.msk.f32.gmra.mxu0 %vm11165_vm0, %v109_v18  ;;  %v7635_v54 = vpop.xlane.xlu0 %340  ;;  %v7702_v41 = vld [vmem:[%s11128_s0 + $0x338] sm:$0xff] }
  0xb7   :  { %v7631_v50 = vpop.xlane.xlu1 %343  ;;  %6579 = vmatprep.mubr.msk.f32.mxu0 %vm11165_vm0, %v110_v27  ;;  %v122_v27 = vld [vmem:[%s11128_s0 + $0x320] sm:$0xff]  ;;  %v253_v53 = vmul.f32 %v7702_v41, %v7702_v41  ;;  %6863 = vmatprep.subr.mxu1 %v2804_v45 }
  0xb8   :  { %6879 = vmatpush3.msra.mxu1 %v2804_v45  ;;  %6639 = vmatprep.subr.mxu0 %v2804_v45 }
  0xb9   :  { %550 = vadd.xlane.f32.xlu0 %v549_v56  ;;  %v7725_v56 = vadd.f32 %v7715_v46, %v7509_v39  ;;  %v7743_v39 = vld [vmem:[%s11128_s0 + $0x340] sm:$0xff]  ;;  %6640 = vmatpush3.msra.mxu0 %v2804_v45 }
  0xba   :  { %553 = vadd.xlane.f32.xlu1 %v552_v51  ;;  %6580 = vmatmul.mubr.msk.f32.gmra.mxu0 %vm11165_vm0, %v111_v26  ;;  %v7649_v1 = vpop.xlane.xlu0 %346  ;;  %v7684_v26 = vld [vmem:[%s11128_s0 + $0x328] sm:$0xff] }
  0xbb   :  { %v7645_v61 = vpop.xlane.xlu1 %349  ;;  %6582 = vmatprep.mubr.msk.f32.mxu0 %vm11165_vm0, %v112_v38  ;;  %v251_v34 = vmul.f32 %v7684_v26, %v7684_v26  ;;  %v250_v38 = vmul.f32 %v122_v27, %v122_v27  ;;  %11257 = vst [vmem:[#allocation8_spill] sm:$0xff] %v7725_v56  ;;  %v140_v56 = vld [vmem:[%s11128_s0 + $0x3b0] sm:$0xff] }
  0xbd   :  { %556 = vadd.xlane.f32.xlu0 %v555_v2  ;;  %v582_v51 = vsel %vm11165_vm0, %v251_v34, 0.0  ;;  %v7748_v2 = vld [vmem:[%s11130_s2 + $0x70] sm:$0xff]  ;;  %v7787_v34 = vld [vmem:[%s11128_s0 + $0x358] sm:$0xff] }
  0xbe   :  { %559 = vadd.xlane.f32.xlu1 %v558_v62  ;;  %6583 = vmatmul.mubr.msk.f32.gmra.mxu0 %vm11165_vm0, %v113_v37  ;;  %v7663_v11 = vpop.xlane.xlu0 %352  ;;  %v573_v37 = vsel %vm11165_vm0, %v248_v25, 0.0  ;;  %v252_v62 = vmul.f32 %v7707_v42, %v7707_v42 }
  0xbf   :  { %v7659_v8 = vpop.xlane.xlu1 %355  ;;  %6585 = vmatprep.mubr.msk.f32.mxu0 %vm11165_vm0, %v114_v49  ;;  %6864 = vmatprep.subr.mxu1 %v7748_v2 }
  0xc0   :  { %6880 = vmatpush3.msra.mxu1 %v7748_v2  ;;  %6641 = vmatprep.subr.mxu0 %v7748_v2 }
  0xc1   :  { %562 = vadd.xlane.f32.xlu0 %v561_v13  ;;  %6865 = vmatprep.subr.mxu1 %v7762_v10 }
  0xc2   :  { %565 = vadd.xlane.f32.xlu1 %v564_v9  ;;  %6586 = vmatmul.mubr.msk.f32.gmra.mxu0 %vm11165_vm0, %v115_v48  ;;  %v7677_v22 = vpop.xlane.xlu0 %358 }
  0xc3   :  { %v7673_v18 = vpop.xlane.xlu1 %361  ;;  %6588 = vmatprep.mubr.msk.f32.mxu0 %vm11165_vm0, %v116_v59  ;;  %v579_v59 = vsel %vm11165_vm0, %v250_v38, 0.0  ;;  %v7801_v38 = vadd.f32 %v7715_v46, %v7491_v28  ;;  %6881 = vmatpush3.msra.mxu1 %v7762_v10 }
  0xc4   :  { %6642 = vmatpush3.msra.mxu0 %v7748_v2  ;;  %v7882_v2 = vld [vmem:[%s11130_s2 + $0x40] sm:$0xff] }
  0xc5   :  { %568 = vadd.xlane.f32.xlu0 %v567_v24  ;;  %11263 = vst [vmem:[#allocation14_spill] sm:$0xff] %v7801_v38  ;;  %6643 = vmatprep.subr.mxu0 %v7762_v10  ;;  %v7989_v38 = vld [vmem:[%s11128_s0 + $0x390] sm:$0xff] }
  0xc6   :  { %571 = vadd.xlane.f32.xlu1 %v570_v19  ;;  %6589 = vmatmul.mubr.msk.f32.gmra.mxu0 %vm11165_vm0, %v117_v58  ;;  %v7695_v35 = vpop.xlane.xlu0 %364  ;;  %v254_v19 = vmul.f32 %v7743_v39, %v7743_v39  ;;  %11269 = vst [vmem:[#allocation20_spill] sm:$0xff] %v7989_v38 }
  0xc7   :  { %v7689_v30 = vpop.xlane.xlu1 %367  ;;  %6591 = vmatprep.mubr.msk.f32.mxu0 %vm11165_vm0, %v118_v6  ;;  %v7891_v6 = vld [vmem:[%s11128_s0 + $0x360] sm:$0xff]  ;;  %6644 = vmatpush3.msra.mxu0 %v7762_v10  ;;  %v7943_v10 = vld [vmem:[%s11130_s2 + $0x28] sm:$0xff] }
  0xc8   :  { %v591_v28 = vsel %vm11165_vm0, %v254_v19, 0.0 }
  0xc9   :  { %574 = vadd.xlane.f32.xlu0 %v573_v37  ;;  %v128_v37 = vld [vmem:[%s11128_s0 + $0x350] sm:$0xff] }
  0xca   :  { %577 = vadd.xlane.f32.xlu1 %v576_v32  ;;  %v6449_v49 = vpop.f32.mrf.mxu0  ;;  %6592 = vmatmul.mubr.msk.f32.gmra.mxu0 %vm11165_vm0, %v119_v5  ;;  %v7729_v58 = vpop.xlane.xlu0 %370  ;;  %v7752_v5 = vadd.f32 %v7715_v46, %v7495_v31  ;;  %v588_v31 = vsel %vm11165_vm0, %v253_v53, 0.0  ;;  %v256_v19 = vmul.f32 %v128_v37, %v128_v37 }
  0xcb   :  { %v7717_v48 = vpop.xlane.xlu1 %373  ;;  %v7727_v57 = vmul.f32 2.0, %v6449_v49  ;;  %6594 = vmatprep.mubr.msk.f32.mxu0 %vm11165_vm0, %v120_v17  ;;  %v255_v17 = vmul.f32 %v7738_v0, %v7738_v0 }
  0xcc   :  { %v1117_v3 = vpop.f32.mrf.mxu0  ;;  %11259 = vst [vmem:[#allocation10_spill] sm:$0xff] %v7752_v5 }
  0xcd   :  { %11258 = vst [vmem:[#allocation9_spill] sm:$0xff] %v7727_v57  ;;  %v7756_v9 = vmul.f32 2.0, %v1117_v3  ;;  %580 = vadd.xlane.f32.xlu0 %v579_v59  ;;  %v594_v45 = vsel %vm11165_vm0, %v255_v17, 0.0  ;;  %v7819_v3 = vld [vmem:[%s11130_s2 + $0x58] sm:$0xff] }
  0xce   :  { %583 = vadd.xlane.f32.xlu1 %v582_v51  ;;  %v6452_v14 = vpop.f32.mrf.mxu0  ;;  %6595 = vmatmul.mubr.msk.f32.gmra.mxu0 %vm11165_vm0, %v121_v16  ;;  %v7780_v32 = vpop.xlane.xlu0 %376  ;;  %v585_v16 = vsel %vm11165_vm0, %v252_v62, 0.0  ;;  %v257_v62 = vmul.f32 %v7787_v34, %v7787_v34 }
  0xcf   :  { %11260 = vst [vmem:[#allocation11_spill] sm:$0xff] %v7756_v9  ;;  %v7764_v13 = vpop.xlane.xlu1 %379  ;;  %v7778_v25 = vmul.f32 2.0, %v6452_v14  ;;  %6597 = vmatprep.mubr.msk.f32.mxu0 %vm11165_vm0, %v122_v27  ;;  %v7797_v27 = vld [vmem:[%s11130_s2 + $0x60] sm:$0xff]  ;;  %v7823_v14 = vadd.f32 %v7715_v46, %v7519_v44  ;;  %v7838_v44 = vadd.f32 %v7715_v46, %v7523_v47 }
  0xd0   :  { %v1127_v36 = vpop.f32.mrf.mxu0  ;;  %6866 = vmatprep.subr.mxu1 %v7797_v27  ;;  %v600_v47 = vsel %vm11165_vm0, %v257_v62, 0.0  ;;  %v1769_v62 = vadd.f32 %v7715_v46, %v7537_v55  ;;  %6645 = vmatprep.subr.mxu0 %v7797_v27  ;;  %v8025_v9 = vld [vmem:[%s11128_s0 + $0x3a0] sm:$0xff] }
  0xd1   :  { %11262 = vst [vmem:[#allocation13_spill] sm:$0xff] %v7778_v25  ;;  %v7805_v51 = vmul.f32 2.0, %v1127_v36  ;;  %586 = vadd.xlane.f32.xlu0 %v585_v16  ;;  %11265 = vst [vmem:[#allocation16_spill] sm:$0xff] %v7823_v14  ;;  %6882 = vmatpush3.msra.mxu1 %v7797_v27  ;;  %v597_v36 = vsel %vm11165_vm0, %v256_v19, 0.0 }
  0xd2   :  { %589 = vadd.xlane.f32.xlu1 %v588_v31  ;;  %v6455_v59 = vpop.f32.mrf.mxu0  ;;  %6598 = vmatmul.mubr.msk.f32.gmra.mxu0 %vm11165_vm0, %v7684_v26  ;;  %v7829_v17 = vpop.xlane.xlu0 %382  ;;  %11267 = vst [vmem:[#allocation18_spill] sm:$0xff] %v7838_v44  ;;  %11271 = vst [vmem:[#allocation22_spill] sm:$0xff] %v8025_v9 }
  0xd3   :  { %11264 = vst [vmem:[#allocation15_spill] sm:$0xff] %v7805_v51  ;;  %v7808_v53 = vpop.xlane.xlu1 %385  ;;  %v7827_v26 = vmul.f32 2.0, %v6455_v59  ;;  %6600 = vmatprep.mubr.msk.f32.mxu0 %vm11165_vm0, %v7707_v42  ;;  %6867 = vmatprep.subr.mxu1 %v7819_v3  ;;  %v7848_v42 = vld [vmem:[%s11130_s2 + $0x50] sm:$0xff] }
  0xd4   :  { %v1137_v16 = vpop.f32.mrf.mxu0  ;;  %6883 = vmatpush3.msra.mxu1 %v7819_v3  ;;  %6646 = vmatpush3.msra.mxu0 %v7797_v27  ;;  %v8010_v27 = vld [vmem:[%s11130_s2 + $0x10] sm:$0xff] }
  0xd5   :  { %11266 = vst [vmem:[#allocation17_spill] sm:$0xff] %v7827_v26  ;;  %v7842_v59 = vmul.f32 2.0, %v1137_v16  ;;  %592 = vadd.xlane.f32.xlu0 %v591_v28  ;;  %6868 = vmatprep.subr.mxu1 %v7848_v42  ;;  %v7958_v26 = vld [vmem:[%s11128_s0 + $0x380] sm:$0xff] }
  0xd6   :  { %595 = vadd.xlane.f32.xlu1 %v594_v45  ;;  %v6458_v49 = vpop.f32.mrf.mxu0  ;;  %6601 = vmatmul.mubr.msk.f32.gmra.mxu0 %vm11165_vm0, %v7702_v41  ;;  %v7857_v45 = vpop.xlane.xlu0 %388  ;;  %v7867_v41 = vld [vmem:[%s11130_s2 + $0x48] sm:$0xff] }
  0xd7   :  { %11268 = vst [vmem:[#allocation19_spill] sm:$0xff] %v7842_v59  ;;  %v7850_v31 = vpop.xlane.xlu1 %391  ;;  %6603 = vmatprep.mubr.msk.f32.mxu0 %vm11165_vm0, %v7743_v39  ;;  %v1898_v28 = vmul.f32 2.0, %v6458_v49  ;;  %6884 = vmatpush3.msra.mxu1 %v7848_v42  ;;  %v1770_v39 = vadd.f32 %v7715_v46, %v7533_v52 }
  0xd8   :  { %v1147_v24 = vpop.f32.mrf.mxu0  ;;  %6869 = vmatprep.subr.mxu1 %v7867_v41  ;;  %6647 = vmatprep.subr.mxu0 %v7819_v3 }
  0xd9   :  { %v1897_v16 = vmul.f32 2.0, %v1147_v24  ;;  %598 = vadd.xlane.f32.xlu0 %v597_v36  ;;  %v2026_v52 = vsub.f32 %v1770_v39, %v1898_v28  ;;  %6885 = vmatpush3.msra.mxu1 %v7867_v41  ;;  %v1772_v28 = vadd.f32 %v7715_v46, %v7547_v60 }
  0xda   :  { %601 = vadd.xlane.f32.xlu1 %v600_v47  ;;  %v6461_v19 = vpop.f32.mrf.mxu0  ;;  %6604 = vmatmul.mubr.msk.f32.gmra.mxu0 %vm11165_vm0, %v7738_v0  ;;  %v7884_v24 = vpop.xlane.xlu0 %394  ;;  %v1771_v0 = vadd.f32 %v7715_v46, %v7551_v63 }
  0xdb   :  { %v7875_v49 = vpop.xlane.xlu1 %397  ;;  %v2025_v55 = vsub.f32 %v1769_v62, %v1897_v16  ;;  %6606 = vmatprep.mubr.msk.f32.mxu0 %vm11165_vm0, %v128_v37  ;;  %v1900_v36 = vmul.f32 2.0, %v6461_v19  ;;  %6870 = vmatprep.subr.mxu1 %v7882_v2  ;;  %v7901_v37 = vld [vmem:[%s11130_s2 + $0x38] sm:$0xff] }
  0xdc   :  { %v1157_v47 = vpop.f32.mrf.mxu0  ;;  %6886 = vmatpush3.msra.mxu1 %v7882_v2  ;;  %6648 = vmatpush3.msra.mxu0 %v7819_v3 }
  0xdd   :  { %v1899_v16 = vmul.f32 2.0, %v1157_v47  ;;  %2161 = vmin.index.xlane.f32.xlu0 %v2026_v52  ;;  %v2028_v60 = vsub.f32 %v1772_v28, %v1900_v36  ;;  %6871 = vmatprep.subr.mxu1 %v7901_v37  ;;  %v1774_v28 = vadd.f32 %v7715_v46, %v7561_v4  ;;  %v7952_v4 = vld [vmem:[%s11128_s0 + $0x378] sm:$0xff] }
  0xde   :  { %2159 = vmin.index.xlane.f32.xlu1 %v2025_v55  ;;  %v6464_v39 = vpop.f32.mrf.mxu0  ;;  %6607 = vmatmul.mubr.msk.f32.gmra.mxu0 %vm11165_vm0, %v7787_v34  ;;  %v7909_v19 = vpop.xlane.xlu0 %400  ;;  %v7916_v55 = vld [vmem:[%s11128_s0 + $0x368] sm:$0xff]  ;;  %v7922_v34 = vld [vmem:[%s11128_s0 + $0x370] sm:$0xff] }
  0xdf   :  { %v7905_v62 = vpop.xlane.xlu1 %403  ;;  %v2027_v63 = vsub.f32 %v1771_v0, %v1899_v16  ;;  %6609 = vmatprep.mubr.msk.f32.mxu0 %vm11165_vm0, %v7891_v6  ;;  %v1902_v52 = vmul.f32 2.0, %v6464_v39  ;;  %v7928_v0 = vld [vmem:[%s11130_s2 + $0x30] sm:$0xff]  ;;  %v1773_v16 = vadd.f32 %v7715_v46, %v7565_v7  ;;  %6887 = vmatpush3.msra.mxu1 %v7901_v37 }
  0xe0   :  { %v1167_v47 = vpop.f32.mrf.mxu0  ;;  %6872 = vmatprep.subr.mxu1 %v7928_v0  ;;  %6649 = vmatprep.subr.mxu0 %v7848_v42 }
  0xe1   :  { %v1901_v36 = vmul.f32 2.0, %v1167_v47  ;;  %2165 = vmin.index.xlane.f32.xlu0 %v2028_v60  ;;  %6888 = vmatpush3.msra.mxu1 %v7928_v0 }
  0xe2   :  { %2163 = vmin.index.xlane.f32.xlu1 %v2027_v63  ;;  %v6467_v59 = vpop.f32.mrf.mxu0  ;;  %6610 = vmatmul.mubr.msk.f32.gmra.mxu0 %vm11165_vm0, %v7916_v55  ;;  %v7945_v47 = vpop.xlane.xlu0 %406  ;;  %v2030_v63 = vsub.f32 %v1774_v28, %v1902_v52  ;;  %v1776_v52 = vadd.f32 %v7715_v46, %v7575_v12 }
  0xe3   :  { %v7936_v39 = vpop.xlane.xlu1 %409  ;;  %v2029_v7 = vsub.f32 %v1773_v16, %v1901_v36  ;;  %6612 = vmatprep.mubr.msk.f32.mxu0 %vm11165_vm0, %v7922_v34  ;;  %v1904_v60 = vmul.f32 2.0, %v6467_v59  ;;  %v1775_v16 = vadd.f32 %v7715_v46, %v7579_v15  ;;  %6873 = vmatprep.subr.mxu1 %v7943_v10  ;;  %v7968_v59 = vld [vmem:[%s11130_s2 + $0x20] sm:$0xff] }
  0xe4   :  { %v1177_v44 = vpop.f32.mrf.mxu0  ;;  %6889 = vmatpush3.msra.mxu1 %v7943_v10  ;;  %6650 = vmatpush3.msra.mxu0 %v7848_v42 }
  0xe5   :  { %v1903_v36 = vmul.f32 2.0, %v1177_v44  ;;  %2169 = vmin.index.xlane.f32.xlu0 %v2030_v63  ;;  %v2032_v12 = vsub.f32 %v1776_v52, %v1904_v60  ;;  %6874 = vmatprep.subr.mxu1 %v7968_v59 }
  0xe6   :  { %2167 = vmin.index.xlane.f32.xlu1 %v2029_v7  ;;  %v6470_v14 = vpop.f32.mrf.mxu0  ;;  %6613 = vmatmul.mubr.msk.f32.gmra.mxu0 %vm11165_vm0, %v7952_v4  ;;  %v7976_v44 = vpop.xlane.xlu0 %412  ;;  %v7983_v7 = vld [vmem:[%s11128_s0 + $0x388] sm:$0xff] }
  0xe7   :  { %v7972_v28 = vpop.xlane.xlu1 %415  ;;  %v2031_v15 = vsub.f32 %v1775_v16, %v1903_v36  ;;  %6615 = vmatprep.mubr.msk.f32.mxu0 %vm11165_vm0, %v7958_v26  ;;  %v1906_v63 = vmul.f32 2.0, %v6470_v14  ;;  %v7995_v16 = vld [vmem:[%s11130_s2 + $0x18] sm:$0xff]  ;;  %v1777_v36 = vadd.f32 %v7715_v46, %v7593_v23  ;;  %6890 = vmatpush3.msra.mxu1 %v7968_v59  ;;  %v1778_v14 = vadd.f32 %v7715_v46, %v7589_v20 }
  0xe8   :  { %v1187_v51 = vpop.f32.mrf.mxu0  ;;  %v8019_v20 = vld [vmem:[%s11128_s0 + $0x398] sm:$0xff]  ;;  %6875 = vmatprep.subr.mxu1 %v7995_v16  ;;  %6651 = vmatprep.subr.mxu0 %v7867_v41 }
  0xe9   :  { %v1905_v60 = vmul.f32 2.0, %v1187_v51  ;;  %2173 = vmin.index.xlane.f32.xlu0 %v2032_v12  ;;  %11270 = vst [vmem:[#allocation21_spill] sm:$0xff] %v8019_v20  ;;  %6891 = vmatpush3.msra.mxu1 %v7995_v16 }
  0xea   :  { %2171 = vmin.index.xlane.f32.xlu1 %v2031_v15  ;;  %v6473_v25 = vpop.f32.mrf.mxu0  ;;  %6616 = vmatmul.mubr.msk.f32.gmra.mxu0 %vm11165_vm0, %v7983_v7  ;;  %v8012_v51 = vpop.xlane.xlu0 %418  ;;  %v2034_v15 = vsub.f32 %v1778_v14, %v1906_v63  ;;  %v1780_v63 = vadd.f32 %v7715_v46, %v7603_v29 }
  0xeb   :  { %v8003_v52 = vpop.xlane.xlu1 %421  ;;  %v2033_v23 = vsub.f32 %v1777_v36, %v1905_v60  ;;  %6618 = vmatprep.mubr.msk.f32.mxu0 %vm11165_vm0, %v7989_v38  ;;  %v1908_v12 = vmul.f32 2.0, %v6473_v25  ;;  %v1779_v36 = vadd.f32 %v7715_v46, %v7607_v33  ;;  %6876 = vmatprep.subr.mxu1 %v8010_v27  ;;  %v8035_v25 = vld [vmem:[%s11130_s2 + $0x8] sm:$0xff] }
  0xec   :  { %v1197_v21 = vpop.f32.mrf.mxu0  ;;  %6892 = vmatpush3.msra.mxu1 %v8010_v27  ;;  %6652 = vmatpush3.msra.mxu0 %v7867_v41 }
  0xed   :  { %v1907_v60 = vmul.f32 2.0, %v1197_v21  ;;  %2177 = vmin.index.xlane.f32.xlu0 %v2034_v15  ;;  %v2036_v29 = vsub.f32 %v1780_v63, %v1908_v12  ;;  %6877 = vmatprep.subr.mxu1 %v8035_v25 }
  0xee   :  { %2175 = vmin.index.xlane.f32.xlu1 %v2033_v23  ;;  %v6476_v5 = vpop.f32.mrf.mxu0  ;;  %6619 = vmatmul.mubr.msk.f32.gmra.mxu0 %vm11165_vm0, %v8019_v20  ;;  %v8043_v21 = vpop.xlane.xlu0 %424  ;;  %v8050_v23 = vld [vmem:[%s11128_s0 + $0x3a8] sm:$0xff] }
  0xef   :  { %v8039_v14 = vpop.xlane.xlu1 %427  ;;  %v2035_v33 = vsub.f32 %v1779_v36, %v1907_v60  ;;  %6621 = vmatprep.mubr.msk.f32.mxu0 %vm11165_vm0, %v8025_v9  ;;  %v1910_v15 = vmul.f32 2.0, %v6476_v5  ;;  %v8060_v36 = vld [vmem:[%s11130_s2] sm:$0xff]  ;;  %v1781_v60 = vadd.f32 %v7715_v46, %v7621_v43  ;;  %6893 = vmatpush3.msra.mxu1 %v8035_v25  ;;  %v1782_v5 = vadd.f32 %v7715_v46, %v7617_v40  ;;  %v141_v43 = vld [vmem:[%s11128_s0 + $0x3b8] sm:$0xff] }
  0xf0   :  { %v1207_v57 = vpop.f32.mrf.mxu0  ;;  %6878 = vmatprep.subr.mxu1 %v8060_v36  ;;  %6653 = vmatprep.subr.mxu0 %v7882_v2 }
  0xf1   :  { %v1909_v9 = vmul.f32 2.0, %v1207_v57  ;;  %2181 = vmin.index.xlane.f32.xlu0 %v2036_v29  ;;  %v2038_v57 = vsub.f32 %v1782_v5, %v1910_v15  ;;  %6894 = vmatpush3.msra.mxu1 %v8060_v36  ;;  %v1784_v29 = vadd.f32 %v7715_v46, %v7631_v50 }
  0xf2   :  { %2179 = vmin.index.xlane.f32.xlu1 %v2035_v33  ;;  %v6479_v63 = vpop.f32.mrf.mxu0  ;;  %6622 = vmatmul.mubr.msk.f32.gmra.mxu0 %vm11165_vm0, %v8050_v23  ;;  %v8072_v20 = vpop.xlane.xlu0 %430  ;;  %v142_v33 = vld [vmem:[%s11128_s0 + $0x3c0] sm:$0xff] }
  0xf3   :  { %v8068_v12 = vpop.xlane.xlu1 %433  ;;  %v2037_v38 = vsub.f32 %v1781_v60, %v1909_v9  ;;  %6624 = vmatprep.mubr.msk.f32.mxu0 %vm11165_vm0, %v140_v56  ;;  %v1912_v40 = vmul.f32 2.0, %v6479_v63  ;;  %v1783_v56 = vadd.f32 %v7715_v46, %v7635_v54  ;;  %v143_v54 = vld [vmem:[%s11128_s0 + $0x3c8] sm:$0xff]  ;;  %6654 = vmatpush3.msra.mxu0 %v7882_v2 }
  0xf4   :  { %v1217_v3 = vpop.f32.mrf.mxu0  ;;  %6655 = vmatprep.subr.mxu0 %v7901_v37 }
  0xf5   :  { %v1911_v9 = vmul.f32 2.0, %v1217_v3  ;;  %2185 = vmin.index.xlane.f32.xlu0 %v2038_v57  ;;  %v144_v57 = vld [vmem:[%s11128_s0 + $0x3d0] sm:$0xff]  ;;  %6656 = vmatpush3.msra.mxu0 %v7901_v37 }
  0xf6   :  { %2183 = vmin.index.xlane.f32.xlu1 %v2037_v38  ;;  %v6482_v60 = vpop.f32.mrf.mxu0  ;;  %6625 = vmatmul.mubr.msk.f32.gmra.mxu0 %vm11165_vm0, %v141_v43  ;;  %v8092_v63 = vpop.xlane.xlu0 %436  ;;  %v2040_v38 = vsub.f32 %v1784_v29, %v1912_v40  ;;  %v1785_v43 = vadd.f32 %v7715_v46, %v7649_v1  ;;  %v145_v1 = vld [vmem:[%s11128_s0 + $0x3d8] sm:$0xff] }
  0xf7   :  { %v8089_v15 = vpop.xlane.xlu1 %439  ;;  %v2039_v5 = vsub.f32 %v1783_v56, %v1911_v9  ;;  %6627 = vmatprep.mubr.msk.f32.mxu0 %vm11165_vm0, %v142_v33  ;;  %v1914_v42 = vmul.f32 2.0, %v6482_v60  ;;  %v1786_v33 = vadd.f32 %v7715_v46, %v7645_v61  ;;  %6657 = vmatprep.subr.mxu0 %v7928_v0 }
  0xf8   :  { %v1227_v50 = vpop.f32.mrf.mxu0  ;;  %6658 = vmatpush3.msra.mxu0 %v7928_v0 }
  0xf9   :  { %v1913_v3 = vmul.f32 2.0, %v1227_v50  ;;  %2189 = vmin.index.xlane.f32.xlu0 %v2040_v38  ;;  %v2042_v41 = vsub.f32 %v1786_v33, %v1914_v42  ;;  %v1788_v50 = vadd.f32 %v7715_v46, %v7659_v8  ;;  %v148_v33 = vld [vmem:[%s11128_s0 + $0x3f0] sm:$0xff]  ;;  %6659 = vmatprep.subr.mxu0 %v7943_v10 }
  0xfa   :  { %2187 = vmin.index.xlane.f32.xlu1 %v2039_v5  ;;  %v6485_v56 = vpop.f32.mrf.mxu0  ;;  %6628 = vmatmul.mubr.msk.f32.gmra.mxu0 %vm11165_vm0, %v143_v54  ;;  %v8111_v29 = vpop.xlane.xlu0 %442  ;;  %v146_v5 = vld [vmem:[%s11128_s0 + $0x3e0] sm:$0xff]  ;;  %v1787_v54 = vadd.f32 %v7715_v46, %v7663_v11  ;;  %v147_v11 = vld [vmem:[%s11128_s0 + $0x3e8] sm:$0xff] }
  0xfb   :  { %v8108_v40 = vpop.xlane.xlu1 %445  ;;  %v2041_v9 = vsub.f32 %v1785_v43, %v1913_v3  ;;  %6630 = vmatprep.mubr.msk.f32.mxu0 %vm11165_vm0, %v144_v57  ;;  %v1916_v60 = vmul.f32 2.0, %v6485_v56  ;;  %v1789_v56 = vadd.f32 %v7715_v46, %v7677_v22  ;;  %v149_v22 = vld [vmem:[%s11128_s0 + $0x3f8] sm:$0xff]  ;;  %6660 = vmatpush3.msra.mxu0 %v7943_v10 }
  0xfc   :  { %v1237_v61 = vpop.f32.mrf.mxu0  ;;  %6661 = vmatprep.subr.mxu0 %v7968_v59 }
  0xfd   :  { %v1915_v38 = vmul.f32 2.0, %v1237_v61  ;;  %2193 = vmin.index.xlane.f32.xlu0 %v2042_v41  ;;  %v2044_v37 = vsub.f32 %v1788_v50, %v1916_v60  ;;  %6662 = vmatpush3.msra.mxu0 %v7968_v59  ;;  %v1793_v59 = vadd.f32 %v7715_v46, %v7729_v58 }
  0xfe   :  { %2191 = vmin.index.xlane.f32.xlu1 %v2041_v9  ;;  %v6488_v42 = vpop.f32.mrf.mxu0  ;;  %6631 = vmatmul.mubr.msk.f32.gmra.mxu0 %vm11165_vm0, %v145_v1  ;;  %v8130_v43 = vpop.xlane.xlu0 %448  ;;  %v1790_v1 = vadd.f32 %v7715_v46, %v7673_v18 }
  0xff   :  { %v8127_v2 = vpop.xlane.xlu1 %451  ;;  %v2043_v57 = vsub.f32 %v1787_v54, %v1915_v38  ;;  %6633 = vmatprep.mubr.msk.f32.mxu0 %vm11165_vm0, %v146_v5  ;;  %v1918_v3 = vmul.f32 2.0, %v6488_v42  ;;  %v1791_v38 = vadd.f32 %v7715_v46, %v7695_v35  ;;  %v1792_v42 = vadd.f32 %v7715_v46, %v7689_v30  ;;  %6663 = vmatprep.subr.mxu0 %v7995_v16 }
 0x100   :  { %v1247_v8 = vpop.f32.mrf.mxu0  ;;  %6664 = vmatpush3.msra.mxu0 %v7995_v16 }
 0x101   :  { %v1917_v9 = vmul.f32 2.0, %v1247_v8  ;;  %2197 = vmin.index.xlane.f32.xlu0 %v2044_v37  ;;  %v2046_v0 = vsub.f32 %v1790_v1, %v1918_v3  ;;  %6665 = vmatprep.subr.mxu0 %v8010_v27 }
 0x102   :  { %2195 = vmin.index.xlane.f32.xlu1 %v2043_v57  ;;  %v6491_v60 = vpop.f32.mrf.mxu0  ;;  %6634 = vmatmul.mubr.msk.f32.gmra.mxu0 %vm11165_vm0, %v147_v11  ;;  %v8149_v5 = vpop.xlane.xlu0 %454 }
 0x103   :  { %v8146_v41 = vpop.xlane.xlu1 %457  ;;  %v2045_v61 = vsub.f32 %v1789_v56, %v1917_v9  ;;  %6636 = vmatprep.mubr.msk.f32.mxu0 %vm11165_vm0, %v148_v33  ;;  %v1920_v54 = vmul.f32 2.0, %v6491_v60  ;;  %v1794_v33 = vadd.f32 %v7715_v46, %v7717_v48  ;;  %6666 = vmatpush3.msra.mxu0 %v8010_v27  ;;  %v1796_v27 = vadd.f32 %v7715_v46, %v7764_v13 }
 0x104   :  { %v1257_v18 = vpop.f32.mrf.mxu0  ;;  %6667 = vmatprep.subr.mxu0 %v8035_v25  ;;  %v1798_v13 = vadd.f32 %v7715_v46, %v7808_v53 }
 0x105   :  { %v1919_v50 = vmul.f32 2.0, %v1257_v18  ;;  %2201 = vmin.index.xlane.f32.xlu0 %v2046_v0  ;;  %v2048_v3 = vsub.f32 %v1792_v42, %v1920_v54  ;;  %6668 = vmatpush3.msra.mxu0 %v8035_v25 }
 0x106   :  { %2199 = vmin.index.xlane.f32.xlu1 %v2045_v61  ;;  %v6494_v11 = vpop.f32.mrf.mxu0  ;;  %6637 = vmatmul.mubr.msk.f32.gmra.mxu0 %vm11165_vm0, %v149_v22  ;;  %v8165_v37 = vpop.xlane.xlu0 %460  ;;  %v1795_v22 = vadd.f32 %v7715_v46, %v7780_v32  ;;  %v1797_v32 = vadd.f32 %v7715_v46, %v7829_v17  ;;  %v1800_v17 = vadd.f32 %v7715_v46, %v7850_v31 }
 0x107   :  { %v8162_v57 = vpop.xlane.xlu1 %463  ;;  %v2047_v10 = vsub.f32 %v1791_v38, %v1919_v50  ;;  %v1922_v35 = vmul.f32 2.0, %v6494_v11  ;;  %6669 = vmatprep.subr.mxu0 %v8060_v36 }
 0x108   :  { %v1267_v8 = vpop.f32.mrf.mxu0  ;;  %6670 = vmatpush3.msra.mxu0 %v8060_v36 }
 0x109   :  { %v1921_v30 = vmul.f32 2.0, %v1267_v8  ;;  %2205 = vmin.index.xlane.f32.xlu0 %v2048_v3  ;;  %v2050_v16 = vsub.f32 %v1794_v33, %v1922_v35  ;;  %v1799_v33 = vadd.f32 %v7715_v46, %v7857_v45  ;;  %v1802_v45 = vadd.f32 %v7715_v46, %v7875_v49 }
 0x10a   :  { %2203 = vmin.index.xlane.f32.xlu1 %v2047_v10  ;;  %v6497_v9 = vpop.f32.mrf.mxu0  ;;  %v8177_v60 = vpop.xlane.xlu0 %466 }
 0x10b   :  { %v8174_v56 = vpop.xlane.xlu1 %469  ;;  %v2049_v1 = vsub.f32 %v1793_v59, %v1921_v30  ;;  %v1924_v58 = vmul.f32 2.0, %v6497_v9 }
 0x10c   :  { %v1277_v61 = vpop.f32.mrf.mxu0 }
 0x10d   :  { %v1923_v48 = vmul.f32 2.0, %v1277_v61  ;;  %2209 = vmin.index.xlane.f32.xlu0 %v2050_v16  ;;  %v2052_v25 = vsub.f32 %v1796_v27, %v1924_v58  ;;  %v1801_v27 = vadd.f32 %v7715_v46, %v7884_v24  ;;  %v1804_v24 = vadd.f32 %v7715_v46, %v7905_v62 }
 0x10e   :  { %2207 = vmin.index.xlane.f32.xlu1 %v2049_v1  ;;  %v6500_v54 = vpop.f32.mrf.mxu0  ;;  %v8189_v38 = vpop.xlane.xlu0 %472 }
 0x10f   :  { %v8186_v0 = vpop.xlane.xlu1 %475  ;;  %v2051_v18 = vsub.f32 %v1795_v22, %v1923_v48  ;;  %v1926_v50 = vmul.f32 2.0, %v6500_v54 }
 0x110   :  { %v1287_v42 = vpop.f32.mrf.mxu0 }
 0x111   :  { %v1925_v11 = vmul.f32 2.0, %v1287_v42  ;;  %2213 = vmin.index.xlane.f32.xlu0 %v2052_v25  ;;  %v2054_v8 = vsub.f32 %v1798_v13, %v1926_v50  ;;  %v1803_v13 = vadd.f32 %v7715_v46, %v7909_v19  ;;  %v1806_v19 = vadd.f32 %v7715_v46, %v7936_v39 }
 0x112   :  { %2211 = vmin.index.xlane.f32.xlu1 %v2051_v18  ;;  %v6503_v3 = vpop.f32.mrf.mxu0  ;;  %v8197_v36 = vpop.xlane.xlu0 %478 }
 0x113   :  { %v8195_v10 = vpop.xlane.xlu1 %481  ;;  %v2053_v35 = vsub.f32 %v1797_v32, %v1925_v11  ;;  %v1928_v59 = vmul.f32 2.0, %v6503_v3 }
 0x114   :  { %v1297_v30 = vpop.f32.mrf.mxu0 }
 0x115   :  { %v1927_v9 = vmul.f32 2.0, %v1297_v30  ;;  %2217 = vmin.index.xlane.f32.xlu0 %v2054_v8  ;;  %v2056_v61 = vsub.f32 %v1800_v17, %v1928_v59  ;;  %v1805_v17 = vadd.f32 %v7715_v46, %v7945_v47  ;;  %v1808_v47 = vadd.f32 %v7715_v46, %v7972_v28 }
 0x116   :  { %2215 = vmin.index.xlane.f32.xlu1 %v2053_v35  ;;  %v6506_v1 = vpop.f32.mrf.mxu0  ;;  %v8205_v58 = vpop.xlane.xlu0 %484 }
 0x117   :  { %v8203_v53 = vpop.xlane.xlu1 %487  ;;  %v2055_v16 = vsub.f32 %v1799_v33, %v1927_v9  ;;  %v1930_v22 = vmul.f32 2.0, %v6506_v1 }
 0x118   :  { %v1307_v48 = vpop.f32.mrf.mxu0 }
 0x119   :  { %v1929_v54 = vmul.f32 2.0, %v1307_v48  ;;  %2221 = vmin.index.xlane.f32.xlu0 %v2056_v61  ;;  %v2058_v42 = vsub.f32 %v1802_v45, %v1930_v22  ;;  %v1807_v45 = vadd.f32 %v7715_v46, %v7976_v44  ;;  %v1810_v44 = vadd.f32 %v7715_v46, %v8003_v52 }
 0x11a   :  { %2219 = vmin.index.xlane.f32.xlu1 %v2055_v16  ;;  %v6509_v18 = vpop.f32.mrf.mxu0  ;;  %v8213_v50 = vpop.xlane.xlu0 %490 }
 0x11b   :  { %v8211_v31 = vpop.xlane.xlu1 %493  ;;  %v2057_v25 = vsub.f32 %v1801_v27, %v1929_v54  ;;  %v1932_v32 = vmul.f32 2.0, %v6509_v18 }
 0x11c   :  { %v1317_v11 = vpop.f32.mrf.mxu0 }
 0x11d   :  { %v1931_v3 = vmul.f32 2.0, %v1317_v11  ;;  %2225 = vmin.index.xlane.f32.xlu0 %v2058_v42  ;;  %v2060_v30 = vsub.f32 %v1804_v24, %v1932_v32  ;;  %v1809_v24 = vadd.f32 %v7715_v46, %v8012_v51  ;;  %v1812_v51 = vadd.f32 %v7715_v46, %v8039_v14 }
 0x11e   :  { %2223 = vmin.index.xlane.f32.xlu1 %v2057_v25  ;;  %v6512_v35 = vpop.f32.mrf.mxu0  ;;  %v8221_v59 = vpop.xlane.xlu0 %496 }
 0x11f   :  { %v8219_v49 = vpop.xlane.xlu1 %499  ;;  %v2059_v8 = vsub.f32 %v1803_v13, %v1931_v3  ;;  %v1934_v33 = vmul.f32 2.0, %v6512_v35 }
 0x120   :  { %v1327_v9 = vpop.f32.mrf.mxu0 }
 0x121   :  { %v1933_v1 = vmul.f32 2.0, %v1327_v9  ;;  %2229 = vmin.index.xlane.f32.xlu0 %v2060_v30  ;;  %v2062_v48 = vsub.f32 %v1806_v19, %v1934_v33  ;;  %v1811_v19 = vadd.f32 %v7715_v46, %v8043_v21  ;;  %v1814_v21 = vadd.f32 %v7715_v46, %v8068_v12 }
 0x122   :  { %2227 = vmin.index.xlane.f32.xlu1 %v2059_v8  ;;  %v6515_v16 = vpop.f32.mrf.mxu0  ;;  %v8229_v22 = vpop.xlane.xlu0 %502 }
 0x123   :  { %v8227_v62 = vpop.xlane.xlu1 %505  ;;  %v2061_v61 = vsub.f32 %v1805_v17, %v1933_v1  ;;  %v1936_v27 = vmul.f32 2.0, %v6515_v16 }
 0x124   :  { %v1337_v54 = vpop.f32.mrf.mxu0 }
 0x125   :  { %v1935_v18 = vmul.f32 2.0, %v1337_v54  ;;  %2233 = vmin.index.xlane.f32.xlu0 %v2062_v48  ;;  %v2064_v11 = vsub.f32 %v1808_v47, %v1936_v27  ;;  %v1813_v47 = vadd.f32 %v7715_v46, %v8072_v20  ;;  %v1816_v20 = vadd.f32 %v7715_v46, %v8089_v15 }
 0x126   :  { %2231 = vmin.index.xlane.f32.xlu1 %v2061_v61  ;;  %v6518_v25 = vpop.f32.mrf.mxu0  ;;  %v8237_v32 = vpop.xlane.xlu0 %508 }
 0x127   :  { %v8235_v39 = vpop.xlane.xlu1 %511  ;;  %v2063_v42 = vsub.f32 %v1807_v45, %v1935_v18  ;;  %v1938_v13 = vmul.f32 2.0, %v6518_v25 }
 0x128   :  { %v1347_v3 = vpop.f32.mrf.mxu0 }
 0x129   :  { %v1937_v35 = vmul.f32 2.0, %v1347_v3  ;;  %2237 = vmin.index.xlane.f32.xlu0 %v2064_v11  ;;  %v2066_v9 = vsub.f32 %v1810_v44, %v1938_v13  ;;  %v1815_v44 = vadd.f32 %v7715_v46, %v8092_v63  ;;  %v1818_v63 = vadd.f32 %v7715_v46, %v8108_v40 }
 0x12a   :  { %2235 = vmin.index.xlane.f32.xlu1 %v2063_v42  ;;  %v6521_v8 = vpop.f32.mrf.mxu0  ;;  %v8245_v33 = vpop.xlane.xlu0 %514  ;;  %v1817_v40 = vadd.f32 %v7715_v46, %v8111_v29 }
 0x12b   :  { %v8243_v28 = vpop.xlane.xlu1 %517  ;;  %v2065_v30 = vsub.f32 %v1809_v24, %v1937_v35  ;;  %v1940_v17 = vmul.f32 2.0, %v6521_v8 }
 0x12c   :  { %v1357_v1 = vpop.f32.mrf.mxu0 }
 0x12d   :  { %v1939_v16 = vmul.f32 2.0, %v1357_v1  ;;  %2241 = vmin.index.xlane.f32.xlu0 %v2066_v9  ;;  %v2068_v54 = vsub.f32 %v1812_v51, %v1940_v17 }
 0x12e   :  { %2239 = vmin.index.xlane.f32.xlu1 %v2065_v30  ;;  %v6524_v61 = vpop.f32.mrf.mxu0  ;;  %v8253_v27 = vpop.xlane.xlu0 %520 }
 0x12f   :  { %v8251_v52 = vpop.xlane.xlu1 %523  ;;  %v2067_v48 = vsub.f32 %v1811_v19, %v1939_v16  ;;  %v1942_v45 = vmul.f32 2.0, %v6524_v61  ;;  %v258_v19 = vmul.f32 %v7891_v6, %v7891_v6  ;;  %v1820_v6 = vadd.f32 %v7715_v46, %v8127_v2 }
 0x130   :  { %v1367_v18 = vpop.f32.mrf.mxu0  ;;  %v1819_v2 = vadd.f32 %v7715_v46, %v8130_v43 }
 0x131   :  { %v1941_v25 = vmul.f32 2.0, %v1367_v18  ;;  %2245 = vmin.index.xlane.f32.xlu0 %v2068_v54  ;;  %v2070_v3 = vsub.f32 %v1814_v21, %v1942_v45  ;;  %v603_v18 = vsel %vm11165_vm0, %v258_v19, 0.0 }
 0x132   :  { %2243 = vmin.index.xlane.f32.xlu1 %v2067_v48  ;;  %v6527_v42 = vpop.f32.mrf.mxu0  ;;  %v8261_v13 = vpop.xlane.xlu0 %526 }
 0x133   :  { %v8259_v14 = vpop.xlane.xlu1 %529  ;;  %v2069_v11 = vsub.f32 %v1813_v47, %v1941_v25  ;;  %v1944_v24 = vmul.f32 2.0, %v6527_v42 }
 0x134   :  { %v1377_v35 = vpop.f32.mrf.mxu0 }
 0x135   :  { %v1943_v8 = vmul.f32 2.0, %v1377_v35  ;;  %2249 = vmin.index.xlane.f32.xlu0 %v2070_v3  ;;  %v2072_v16 = vsub.f32 %v1816_v20, %v1944_v24  ;;  %v1822_v20 = vadd.f32 %v7715_v46, %v8146_v41 }
 0x136   :  { %2247 = vmin.index.xlane.f32.xlu1 %v2069_v11  ;;  %v6530_v30 = vpop.f32.mrf.mxu0  ;;  %v8269_v1 = vpop.xlane.xlu0 %532 }
 0x137   :  { %v8267_v12 = vpop.xlane.xlu1 %535  ;;  %v2071_v9 = vsub.f32 %v1815_v44, %v1943_v8  ;;  %v1946_v17 = vmul.f32 2.0, %v6530_v30 }
 0x138   :  { %v1387_v51 = vpop.f32.mrf.mxu0 }
 0x139   :  { %2253 = vmin.index.xlane.f32.xlu0 %v2072_v16  ;;  %v2074_v48 = vsub.f32 %v1818_v63, %v1946_v17  ;;  %v1945_v47 = vmul.f32 2.0, %v1387_v51 }
 0x13a   :  { %2251 = vmin.index.xlane.f32.xlu1 %v2071_v9  ;;  %v6533_v15 = vpop.f32.mrf.mxu0  ;;  %v8277_v45 = vpop.xlane.xlu0 %538 }
 0x13b   :  { %v8275_v61 = vpop.xlane.xlu1 %541  ;;  %v1948_v54 = vmul.f32 2.0, %v6533_v15  ;;  %v2073_v35 = vsub.f32 %v1817_v40, %v1945_v47  ;;  %v8299_v15 = vld [vmem:[%s11131_s3] ss:$0 sm:$0xff] }
 0x13c   :  { %v1397_v25 = vpop.f32.mrf.mxu0  ;;  %v1824_v41 = vadd.f32 %v8299_v15, %v8162_v57  ;;  %v1821_v46 = vadd.f32 %v8299_v15, %v8149_v5  ;;  %v1823_v57 = vadd.f32 %v8299_v15, %v8165_v37 }
 0x13d   :  { %604 = vadd.xlane.f32.xlu0 %v603_v18  ;;  %v2076_v11 = vsub.f32 %v1820_v6, %v1948_v54  ;;  %v1947_v44 = vmul.f32 2.0, %v1397_v25 }
 0x13e   :  { %2257 = vmin.index.xlane.f32.xlu1 %v2074_v48  ;;  %v6536_v42 = vpop.f32.mrf.mxu0  ;;  %v8286_v24 = vpop.xlane.xlu0 %544 }
 0x13f   :  { %v8284_v21 = vpop.xlane.xlu1 %547  ;;  %v1950_v3 = vmul.f32 2.0, %v6536_v42  ;;  %v2075_v16 = vsub.f32 %v1819_v2, %v1947_v44  ;;  %v1826_v42 = vadd.f32 %v8299_v15, %v8174_v56  ;;  %v1825_v56 = vadd.f32 %v8299_v15, %v8177_v60 }
 0x140   :  { %v1407_v8 = vpop.f32.mrf.mxu0 }
 0x141   :  { %2255 = vmin.index.xlane.f32.xlu0 %v2073_v35  ;;  %v2078_v9 = vsub.f32 %v1822_v20, %v1950_v3  ;;  %v1949_v51 = vmul.f32 2.0, %v1407_v8 }
 0x142   :  { %2261 = vmin.index.xlane.f32.xlu1 %v2076_v11  ;;  %v6539_v30 = vpop.f32.mrf.mxu0  ;;  %v8294_v19 = vpop.xlane.xlu0 %550 }
 0x143   :  { %v8292_v29 = vpop.xlane.xlu1 %553  ;;  %v1952_v17 = vmul.f32 2.0, %v6539_v30  ;;  %v2077_v25 = vsub.f32 %v1821_v46, %v1949_v51  ;;  %v1828_v30 = vadd.f32 %v8299_v15, %v8186_v0  ;;  %v1827_v0 = vadd.f32 %v8299_v15, %v8189_v38 }
 0x144   :  { %v1417_v63 = vpop.f32.mrf.mxu0 }
 0x145   :  { %2259 = vmin.index.xlane.f32.xlu0 %v2075_v16  ;;  %v2080_v54 = vsub.f32 %v1824_v41, %v1952_v17  ;;  %v1951_v6 = vmul.f32 2.0, %v1417_v63 }
 0x146   :  { %2265 = vmin.index.xlane.f32.xlu1 %v2078_v9  ;;  %v6542_v48 = vpop.f32.mrf.mxu0  ;;  %v8307_v47 = vpop.xlane.xlu0 %556 }
 0x147   :  { %v8305_v43 = vpop.xlane.xlu1 %559  ;;  %v1954_v18 = vmul.f32 2.0, %v6542_v48  ;;  %v2079_v8 = vsub.f32 %v1823_v57, %v1951_v6  ;;  %v1830_v48 = vadd.f32 %v8299_v15, %v8195_v10  ;;  %v1829_v10 = vadd.f32 %v8299_v15, %v8197_v36 }
 0x148   :  { %v1427_v40 = vpop.f32.mrf.mxu0 }
 0x149   :  { %2263 = vmin.index.xlane.f32.xlu0 %v2077_v25  ;;  %v2082_v3 = vsub.f32 %v1826_v42, %v1954_v18  ;;  %v1953_v20 = vmul.f32 2.0, %v1427_v40 }
 0x14a   :  { %2269 = vmin.index.xlane.f32.xlu1 %v2080_v54  ;;  %v6545_v11 = vpop.f32.mrf.mxu0  ;;  %v8315_v44 = vpop.xlane.xlu0 %562 }
 0x14b   :  { %v8313_v5 = vpop.xlane.xlu1 %565  ;;  %v1956_v35 = vmul.f32 2.0, %v6545_v11  ;;  %v2081_v63 = vsub.f32 %v1825_v56, %v1953_v20  ;;  %v1832_v11 = vadd.f32 %v8299_v15, %v8203_v53  ;;  %v1831_v53 = vadd.f32 %v8299_v15, %v8205_v58 }
 0x14c   :  { %v1437_v2 = vpop.f32.mrf.mxu0 }
 0x14d   :  { %2267 = vmin.index.xlane.f32.xlu0 %v2079_v8  ;;  %v2084_v17 = vsub.f32 %v1828_v30, %v1956_v35  ;;  %v1955_v41 = vmul.f32 2.0, %v1437_v2 }
 0x14e   :  { %2273 = vmin.index.xlane.f32.xlu1 %v2082_v3  ;;  %v6548_v9 = vpop.f32.mrf.mxu0  ;;  %v8323_v51 = vpop.xlane.xlu0 %568 }
 0x14f   :  { %v8321_v37 = vpop.xlane.xlu1 %571  ;;  %v1958_v16 = vmul.f32 2.0, %v6548_v9  ;;  %v2083_v40 = vsub.f32 %v1827_v0, %v1955_v41  ;;  %v1834_v9 = vadd.f32 %v8299_v15, %v8211_v31  ;;  %v1833_v31 = vadd.f32 %v8299_v15, %v8213_v50 }
 0x150   :  { %v1447_v46 = vpop.f32.mrf.mxu0  ;;  %v1835_v50 = vadd.f32 %v8299_v15, %v8221_v59 }
 0x151   :  { %2271 = vmin.index.xlane.f32.xlu0 %v2081_v63  ;;  %v2086_v18 = vsub.f32 %v1830_v48, %v1958_v16  ;;  %v1957_v42 = vmul.f32 2.0, %v1447_v46  ;;  %v259_v16 = vmul.f32 %v7916_v55, %v7916_v55 }
 0x152   :  { %2277 = vmin.index.xlane.f32.xlu1 %v2084_v17  ;;  %v6551_v54 = vpop.f32.mrf.mxu0  ;;  %v8331_v6 = vpop.xlane.xlu0 %574 }
 0x153   :  { %v8329_v60 = vpop.xlane.xlu1 %577  ;;  %v1960_v25 = vmul.f32 2.0, %v6551_v54  ;;  %v2085_v2 = vsub.f32 %v1829_v10, %v1957_v42  ;;  %v2403_v10 = vlaneseq }
 0x154   :  { %v1457_v57 = vpop.f32.mrf.mxu0 }
 0x155   :  { %2275 = vmin.index.xlane.f32.xlu0 %v2083_v40  ;;  %v2088_v35 = vsub.f32 %v1832_v11, %v1960_v25  ;;  %v1959_v30 = vmul.f32 2.0, %v1457_v57  ;;  %v1836_v11 = vadd.f32 %v8299_v15, %v8219_v49 }
 0x156   :  { %2281 = vmin.index.xlane.f32.xlu1 %v2086_v18  ;;  %v6554_v3 = vpop.f32.mrf.mxu0  ;;  %v8339_v20 = vpop.xlane.xlu0 %580  ;;  %v606_v18 = vsel %vm11165_vm0, %v259_v16, 0.0 }
 0x157   :  { %v8337_v38 = vpop.xlane.xlu1 %583  ;;  %v1962_v8 = vmul.f32 2.0, %v6554_v3  ;;  %v2087_v46 = vsub.f32 %v1831_v53, %v1959_v30  ;;  %v8371_v53 = vand.u32 127, %v2403_v10 }
 0x158   :  { %v1467_v56 = vpop.f32.mrf.mxu0 }
 0x159   :  { %2279 = vmin.index.xlane.f32.xlu0 %v2085_v2  ;;  %v2090_v63 = vsub.f32 %v1834_v9, %v1962_v8  ;;  %v1961_v48 = vmul.f32 2.0, %v1467_v56  ;;  %v261_v8 = vmul.f32 %v7952_v4, %v7952_v4  ;;  %v260_v56 = vmul.f32 %v7922_v34, %v7922_v34 }
 0x15a   :  { %2285 = vmin.index.xlane.f32.xlu1 %v2088_v35  ;;  %v6557_v17 = vpop.f32.mrf.mxu0  ;;  %v8349_v41 = vpop.xlane.xlu0 %586 }
 0x15b   :  { %v8345_v36 = vpop.xlane.xlu1 %589  ;;  %11272 = vst [vmem:[#allocation23_spill] sm:$0xff] %v8349_v41  ;;  %v1964_v25 = vmul.f32 2.0, %v6557_v17  ;;  %v2089_v55 = vsub.f32 %v1833_v31, %v1961_v48  ;;  %v612_v16 = vsel %vm11165_vm0, %v261_v8, 0.0  ;;  %v609_v34 = vsel %vm11165_vm0, %v260_v56, 0.0 }
 0x15c   :  { %v1477_v0 = vpop.f32.mrf.mxu0  ;;  %v1838_v31 = vadd.f32 %v8299_v15, %v8227_v62  ;;  %v262_v62 = vmul.f32 %v7958_v26, %v7958_v26 }
 0x15d   :  { %2283 = vmin.index.xlane.f32.xlu0 %v2087_v46  ;;  %v1963_v42 = vmul.f32 2.0, %v1477_v0  ;;  %v2092_v2 = vsub.f32 %v1836_v11, %v1964_v25  ;;  %v11156_v0 = vmov 1.0  }
 0x15e   :  { %2289 = vmin.index.xlane.f32.xlu1 %v2090_v63  ;;  %v6560_v58 = vpop.f32.mrf.mxu0  ;;  %v8356_v40 = vpop.xlane.xlu0 %592  ;;  %v615_v56 = vsel %vm11165_vm0, %v262_v62, 0.0 }
 0x15f   :  { %v8353_v54 = vpop.xlane.xlu1 %595  ;;  %11274 = vst [vmem:[#allocation25_spill] sm:$0xff] %v8356_v40  ;;  %v2091_v9 = vsub.f32 %v1835_v50, %v1963_v42  ;;  %v1966_v4 = vmul.f32 2.0, %v6560_v58  ;;  %v1837_v58 = vadd.f32 %v8299_v15, %v8229_v22 }
 0x160   :  { %11273 = vst [vmem:[#allocation24_spill] sm:$0xff] %v8353_v54  ;;  %v1487_v57 = vpop.f32.mrf.mxu0 }
 0x161   :  { %2287 = vmin.index.xlane.f32.xlu0 %v2089_v55  ;;  %v1965_v46 = vmul.f32 2.0, %v1487_v57  ;;  %v263_v55 = vmul.f32 %v7983_v7, %v7983_v7  ;;  %v2094_v42 = vsub.f32 %v1838_v31, %v1966_v4  ;;  %v1840_v4 = vadd.f32 %v8299_v15, %v8235_v39  ;;  %v11286_v39 = vld [vmem:[#allocation20_spill] sm:$0xff] }
 0x162   :  { %607 = vadd.xlane.f32.xlu1 %v606_v18  ;;  %v6563_v35 = vpop.f32.mrf.mxu0  ;;  %v8366_v30 = vpop.xlane.xlu0 %598 }
 0x163   :  { %v8362_v3 = vpop.xlane.xlu1 %601  ;;  %11276 = vst [vmem:[#allocation27_spill] sm:$0xff] %v8366_v30  ;;  %v2093_v11 = vsub.f32 %v1837_v58, %v1965_v46  ;;  %v618_v8 = vsel %vm11165_vm0, %v263_v55, 0.0  ;;  %v11284_v46 = vld [vmem:[#allocation21_spill] sm:$0xff] }
 0x164   :  { %11275 = vst [vmem:[#allocation26_spill] sm:$0xff] %v8362_v3  ;;  %v1497_v49 = vpop.f32.mrf.mxu0  ;;  %v265_v31 = vmul.f32 %v11284_v46, %v11284_v46 }
 0x165   :  { %2291 = vmin.index.xlane.f32.xlu0 %v2091_v9  ;;  %v1967_v9 = vmul.f32 2.0, %v1497_v49 }
 0x166   :  { %2293 = vmin.index.xlane.f32.xlu1 %v2092_v2  ;;  %v8373_v59 = vpop.f32.mrf.mxu0  ;;  %v8378_v63 = vpop.xlane.xlu0 %2161  ;;  %v1968_v2 = vmul.f32 2.0, %v6563_v35  ;;  %v1839_v35 = vadd.f32 %v8299_v15, %v8237_v32  ;;  %v4282_v32 = vadd.s32 4294967288, %v8371_v53 }
 0x167   :  { %v8375_v17 = vpop.xlane.xlu1 %2159  ;;  %11278 = vst [vmem:[#allocation29_spill] sm:$0xff] %v8378_v63  ;;  %vm2412_vm2 = vcmp.eq.s32.totalorder %v8371_v53, %v8378_v63  ;;  %v11294_v63 = vmov 1.0  }
 0x168   :  { %11277 = vst [vmem:[#allocation28_spill] sm:$0xff] %v8375_v17  ;;  %vm2411_vm1 = vcmp.eq.s32.totalorder %v8371_v53, %v8375_v17  ;;  %v8383_v48 = vpop.f32.mrf.mxu0  ;;  %v2096_v58 = vsub.f32 %v1840_v4, %v1968_v2  ;;  %v2095_v62 = vsub.f32 %v1839_v35, %v1967_v9  ;;  %v8452_v2 = vshrl.u32 %v2403_v10, 7 }
 0x169   :  { %6680 = vmatprep.mubr.msk.f32.mxu1 %vm2411_vm1, %v11156_v0  ;;  %610 = vadd.xlane.f32.xlu0 %v609_v34  ;;  %v624_v4 = vsel %vm11165_vm0, %v265_v31, 0.0  ;;  %v1970_v35 = vmul.f32 2.0, %v8373_v59  ;;  %v1969_v10 = vmul.f32 2.0, %v8383_v48 }
 0x16a   :  { %613 = vadd.xlane.f32.xlu1 %v612_v16  ;;  %6681 = vmatmul.mubr.msk.f32.vlgmr.msra.gmra.mxu1 %vm2412_vm2, %v11156_v0  ;;  %v8393_v18 = vpop.f32.mrf.mxu0  ;;  %v8399_v57 = vpop.xlane.xlu0 %2165  ;;  %v8474_v59 = vsub.s32 %v8371_v53, %v8452_v2  ;;  %v8477_v31 = vsub.s32 %v4282_v32, %v8452_v2  ;;  %v267_v32 = vmul.f32 %v8050_v23, %v8050_v23  ;;  %vm4301_vm2 = vcmask 261312  }
 0x16b   :  { %v8395_v25 = vpop.xlane.xlu1 %2163  ;;  %11280 = vst [vmem:[#allocation31_spill] sm:$0xff] %v8399_v57  ;;  %vm2414_vm4 = vcmp.eq.s32.totalorder %v8371_v53, %v8399_v57 }
 0x16c   :  { %11279 = vst [vmem:[#allocation30_spill] sm:$0xff] %v8395_v25  ;;  %vm2413_vm3 = vcmp.eq.s32.totalorder %v8371_v53, %v8395_v25  ;;  %v8405_v50 = vpop.f32.mrf.mxu0  ;;  %11289 = vst [vmem:[#allocation36_spill] sm:$0xff] %v8474_v59 }
 0x16d   :  { %6683 = vmatprep.mubr.msk.f32.mxu1 %vm2413_vm3, %v11156_v0  ;;  %2295 = vmin.index.xlane.f32.xlu0 %v2093_v11  ;;  %11290 = vst [vmem:[#allocation37_spill] sm:$0xff] %v8477_v31  ;;  %vm4308_vm3 = vcmask 326912  }
 0x16e   :  { %2297 = vmin.index.xlane.f32.xlu1 %v2094_v42  ;;  %6684 = vmatmul.mubr.msk.f32.gmra.mxu1 %vm2414_vm4, %v11156_v0  ;;  %v8411_v7 = vpop.f32.mrf.mxu0  ;;  %v8416_v26 = vpop.xlane.xlu0 %2169  ;;  %v264_v42 = vmul.f32 %v11286_v39, %v11286_v39  ;;  %v4296_v39 = vadd.s32 4294967272, %v8371_v53 }
 0x16f   :  { %v8413_v22 = vpop.xlane.xlu1 %2167  ;;  %11282 = vst [vmem:[#allocation33_spill] sm:$0xff] %v8416_v26  ;;  %vm2416_vm6 = vcmp.eq.s32.totalorder %v8371_v53, %v8416_v26  ;;  %v11292_v26 = vld [vmem:[#allocation22_spill] sm:$0xff] }
 0x170   :  { %11281 = vst [vmem:[#allocation32_spill] sm:$0xff] %v8413_v22  ;;  %vm2415_vm5 = vcmp.eq.s32.totalorder %v8371_v53, %v8413_v22  ;;  %v8421_v16 = vpop.f32.mrf.mxu0 }
 0x171   :  { %6686 = vmatprep.mubr.msk.f32.mxu1 %vm2415_vm5, %v11156_v0  ;;  %616 = vadd.xlane.f32.xlu0 %v615_v56 }
 0x172   :  { %619 = vadd.xlane.f32.xlu1 %v618_v8  ;;  %6687 = vmatmul.mubr.msk.f32.gmra.mxu1 %vm2416_vm6, %v11156_v0  ;;  %v8431_v34 = vpop.f32.mrf.mxu0  ;;  %v8437_v55 = vpop.xlane.xlu0 %2173  ;;  %v4289_v8 = vadd.s32 4294967280, %v8371_v53  ;;  %vm4315_vm6 = vcmask 392512  }
 0x173   :  { %v8433_v49 = vpop.xlane.xlu1 %2171  ;;  %11285 = vst [vmem:[#allocation21_spill] sm:$0xff] %v8437_v55  ;;  %vm2418_vm8 = vcmp.eq.s32.totalorder %v8371_v53, %v8437_v55 }
 0x174   :  { %11283 = vst [vmem:[#allocation34_spill] sm:$0xff] %v8433_v49  ;;  %vm2417_vm7 = vcmp.eq.s32.totalorder %v8371_v53, %v8433_v49  ;;  %v8443_v11 = vpop.f32.mrf.mxu0  ;;  %v8484_v48 = vsub.s32 %v4289_v8, %v8452_v2  ;;  %v8497_v8 = vsub.s32 %v4296_v39, %v8452_v2  ;;  %v4331_v39 = vadd.s32 4294967232, %v8371_v53 }
 0x175   :  { %6689 = vmatprep.mubr.msk.f32.mxu1 %vm2417_vm7, %v11156_v0  ;;  %2299 = vmin.index.xlane.f32.xlu0 %v2095_v62  ;;  %vm4322_vm7 = vcmask 458112  }
 0x176   :  { %2301 = vmin.index.xlane.f32.xlu1 %v2096_v58  ;;  %6690 = vmatmul.mubr.msk.f32.gmra.mxu1 %vm2418_vm8, %v11156_v0  ;;  %v8454_v56 = vpop.f32.mrf.mxu0  ;;  %v8460_v46 = vpop.xlane.xlu0 %2177  ;;  %v621_v58 = vsel %vm11165_vm0, %v264_v42, 0.0  ;;  %v1842_v42 = vadd.f32 %v8299_v15, %v8243_v28  ;;  %11291 = vst [vmem:[#allocation38_spill] sm:$0xff] %v8484_v48  ;;  %v266_v28 = vmul.f32 %v11292_v26, %v11292_v26  ;;  %11293 = vst [vmem:[#allocation22_spill] sm:$0xff] %v8497_v8 }
 0x177   :  { %v8456_v9 = vpop.xlane.xlu1 %2175  ;;  %11288 = vst [vmem:[#allocation35_spill] sm:$0xff] %v8460_v46  ;;  %vm2420_vm10 = vcmp.eq.s32.totalorder %v8371_v53, %v8460_v46  ;;  %v1841_v46 = vadd.f32 %v8299_v15, %v8245_v33  ;;  %v4310_v33 = vadd.s32 4294967256, %v8371_v53 }
 0x178   :  { %11287 = vst [vmem:[#allocation20_spill] sm:$0xff] %v8456_v9  ;;  %vm2419_vm9 = vcmp.eq.s32.totalorder %v8371_v53, %v8456_v9  ;;  %v8467_v62 = vpop.f32.mrf.mxu0  ;;  %v4317_v9 = vadd.s32 4294967248, %v8371_v53  ;;  %v2098_v22 = vsub.f32 %v1842_v42, %v1970_v35  ;;  %v4324_v35 = vadd.s32 4294967240, %v8371_v53 }
 0x179   :  { %6692 = vmatprep.mubr.msk.f32.mxu1 %vm2419_vm9, %v11156_v0  ;;  %622 = vadd.xlane.f32.xlu0 %v621_v58  ;;  %v2097_v58 = vsub.f32 %v1841_v46, %v1969_v10  ;;  %v630_v46 = vsel %vm11165_vm0, %v267_v32, 0.0  ;;  %v627_v10 = vsel %vm11165_vm0, %v266_v28, 0.0 }
 0x17a   :  { %625 = vadd.xlane.f32.xlu1 %v624_v4  ;;  %6693 = vmatmul.mubr.msk.f32.gmra.mxu1 %vm2420_vm10, %v11156_v0  ;;  %v8488_v55 = vpop.f32.mrf.mxu0  ;;  %v4303_v4 = vadd.s32 4294967264, %v8371_v53  ;;  %v2182_v0 = vpop.xlane.xlu0 %2181  ;;  %v8507_v26 = vsub.s32 %v4317_v9, %v8452_v2  ;;  %v1972_v9 = vmul.f32 2.0, %v8393_v18  ;;  %v1844_v18 = vadd.f32 %v8299_v15, %v8251_v52  ;;  %v6899_v52 = vld [vmem:[%s11128_s0 + $0x3b8] sm:$0xff] }
 0x17b   :  { %v2180_v49 = vpop.xlane.xlu1 %2179  ;;  %v4396_v25 = vrot.slane %v2182_v0, %v8477_v31  ;;  %vm2422_vm12 = vcmp.eq.s32.totalorder %v8371_v53, %v2182_v0  ;;  %vm4329_vm10 = vcmask 523712  }
 0x17c   :  { %vm2421_vm11 = vcmp.eq.s32.totalorder %v8371_v53, %v2180_v49  ;;  %v4392_v57 = vrot.slane %v2180_v49, %v8474_v59  ;;  %v8502_v23 = vpop.f32.mrf.mxu0  ;;  %11295 = vst [vmem:[#allocation39_spill] sm:$0xff] %v8507_v26  ;;  %v8515_v0 = vsub.s32 %v4303_v4, %v8452_v2  ;;  %v4338_v4 = vadd.s32 4294967224, %v8371_v53 }
 0x17d   :  { %6695 = vmatprep.mubr.msk.f32.mxu1 %vm2421_vm11, %v11294_v63  ;;  %2303 = vmin.index.xlane.f32.xlu0 %v2097_v58  ;;  %v1971_v58 = vmul.f32 2.0, %v8405_v50  ;;  %v269_v50 = vmul.f32 %v6899_v52, %v6899_v52  ;;  %vm11166_vm11 = vcmask 589312  }
 0x17e   :  { %2305 = vmin.index.xlane.f32.xlu1 %v2098_v22  ;;  %6696 = vmatmul.mubr.msk.f32.gmra.mxu1 %vm2422_vm12, %v11294_v63  ;;  %11296 = vst [vmem:[#allocation40_spill] sm:$0xff] %v8515_v0  ;;  %v8518_v42 = vpop.f32.mrf.mxu0  ;;  %v2186_v30 = vpop.xlane.xlu0 %2185  ;;  %v8523_v22 = vsub.s32 %v4310_v33, %v8452_v2  ;;  %v4397_v32 = vsel %vm4287_vm13, %v4396_v25, %v4392_v57 }
 0x17f   :  { %v2184_v49 = vpop.xlane.xlu1 %2183  ;;  %v4406_v28 = vrot.slane %v2186_v30, %v8497_v8  ;;  %vm2424_vm1 = vcmp.eq.s32.totalorder %v8371_v53, %v2186_v30  ;;  %v1843_v25 = vadd.f32 %v8299_v15, %v8253_v27  ;;  %v8538_v57 = vsub.s32 %v4324_v35, %v8452_v2  ;;  %v6900_v27 = vld [vmem:[%s11128_s0 + $0x3b0] sm:$0xff] }
 0x180   :  { %v4401_v17 = vrot.slane %v2184_v49, %v8484_v48  ;;  %vm2423_vm15 = vcmp.eq.s32.totalorder %v8371_v53, %v2184_v49  ;;  %11297 = vst [vmem:[#allocation41_spill] sm:$0xff] %v8523_v22  ;;  %v2100_v33 = vsub.f32 %v1844_v18, %v1972_v9  ;;  %v268_v35 = vmul.f32 %v6900_v27, %v6900_v27 }
 0x181   :  { %6698 = vmatprep.mubr.msk.f32.mxu1 %vm2423_vm15, %v11294_v63  ;;  %11298 = vst [vmem:[#allocation42_spill] sm:$0xff] %v8538_v57  ;;  %628 = vadd.xlane.f32.xlu0 %v627_v10  ;;  %v2099_v10 = vsub.f32 %v1843_v25, %v1971_v58  ;;  %v8555_v9 = vsub.s32 %v4331_v39, %v8452_v2  ;;  %v4345_v58 = vadd.s32 4294967216, %v8371_v53  ;;  %v636_v25 = vsel %vm11165_vm0, %v269_v50, 0.0 }
 0x182   :  { %v4402_v49 = vsel %vm4294_vm14, %v4401_v17, %v4397_v32  ;;  %631 = vadd.xlane.f32.xlu1 %v630_v46  ;;  %6699 = vmatmul.mubr.msk.f32.gmra.mxu1 %vm2424_vm1, %v11294_v63  ;;  %v8543_v17 = vpop.f32.mrf.mxu0  ;;  %v2190_v32 = vpop.xlane.xlu0 %2189  ;;  %v8558_v18 = vsub.s32 %v4338_v4, %v8452_v2  ;;  %v1974_v39 = vmul.f32 2.0, %v8411_v7  ;;  %v1846_v7 = vadd.f32 %v8299_v15, %v8259_v14  ;;  %v6901_v14 = vld [vmem:[%s11128_s0 + $0x3c8] sm:$0xff] }
 0x183   :  { %v2188_v30 = vpop.xlane.xlu1 %2187  ;;  %v4407_v3 = vsel %vm4301_vm2, %v4406_v28, %v4402_v49  ;;  %v4416_v40 = vrot.slane %v2190_v32, %v8523_v22  ;;  %vm2426_vm5 = vcmp.eq.s32.totalorder %v8371_v53, %v2190_v32  ;;  %11299 = vst [vmem:[#allocation43_spill] sm:$0xff] %v8555_v9  ;;  %v4352_v28 = vadd.s32 4294967208, %v8371_v53 }
 0x184   :  { %v4411_v46 = vrot.slane %v2188_v30, %v8515_v0  ;;  %vm2425_vm4 = vcmp.eq.s32.totalorder %v8371_v53, %v2188_v30  ;;  %v8566_v52 = vpop.f32.mrf.mxu0  ;;  %v4359_v50 = vadd.s32 4294967200, %v8371_v53  ;;  %vm11220_vm1 = vcmask 654912  }
 0x185   :  { %6701 = vmatprep.mubr.msk.f32.mxu1 %vm2425_vm4, %v11294_v63  ;;  %2307 = vmin.index.xlane.f32.xlu0 %v2099_v10  ;;  %vm11163_vm4 = vcmask 720512  }
 0x186   :  { %v4412_v30 = vsel %vm4308_vm3, %v4411_v46, %v4407_v3  ;;  %2309 = vmin.index.xlane.f32.xlu1 %v2100_v33  ;;  %6702 = vmatmul.mubr.msk.f32.gmra.mxu1 %vm2426_vm5, %v11294_v63  ;;  %v2194_v3 = vpop.xlane.xlu0 %2193  ;;  %v633_v33 = vsel %vm11165_vm0, %v268_v35, 0.0  ;;  %v1973_v46 = vmul.f32 2.0, %v8421_v16  ;;  %v4366_v16 = vadd.s32 4294967192, %v8371_v53 }
 0x187   :  { %v2192_v49 = vpop.xlane.xlu1 %2191  ;;  %v4417_v32 = vsel %vm4315_vm6, %v4416_v40, %v4412_v30  ;;  %v4426_v27 = vrot.slane %v2194_v3, %v8538_v57  ;;  %vm2428_vm9 = vcmp.eq.s32.totalorder %v8371_v53, %v2194_v3  ;;  %v1845_v40 = vadd.f32 %v8299_v15, %v8261_v13  ;;  %v8587_v3 = vpop.f32.mrf.mxu0  ;;  %v6902_v13 = vld [vmem:[%s11128_s0 + $0x3c0] sm:$0xff] }
 0x188   :  { %v4421_v4 = vrot.slane %v2192_v49, %v8507_v26  ;;  %vm2427_vm8 = vcmp.eq.s32.totalorder %v8371_v53, %v2192_v49  ;;  %v271_v30 = vmul.f32 %v6901_v14, %v6901_v14  ;;  %v2102_v49 = vsub.f32 %v1846_v7, %v1974_v39 }
 0x189   :  { %6704 = vmatprep.mubr.msk.f32.mxu1 %vm2427_vm8, %v11294_v63  ;;  %634 = vadd.xlane.f32.xlu0 %v633_v33  ;;  %v270_v33 = vmul.f32 %v6902_v13, %v6902_v13  ;;  %v8599_v39 = vsub.s32 %v4345_v58, %v8452_v2  ;;  %v8602_v7 = vsub.s32 %v4352_v28, %v8452_v2  ;;  %v1976_v28 = vmul.f32 2.0, %v8431_v34 }
 0x18a   :  { %v4422_v10 = vsel %vm4322_vm7, %v4421_v4, %v4417_v32  ;;  %637 = vadd.xlane.f32.xlu1 %v636_v25  ;;  %6705 = vmatmul.mubr.msk.f32.gmra.mxu1 %vm2428_vm9, %v11294_v63  ;;  %v2198_v4 = vpop.xlane.xlu0 %2197  ;;  %v2101_v32 = vsub.f32 %v1845_v40, %v1973_v46  ;;  %v8607_v46 = vsub.s32 %v4359_v50, %v8452_v2  ;;  %v642_v58 = vsel %vm11165_vm0, %v271_v30, 0.0  ;;  %v8614_v40 = vpop.f32.mrf.mxu0 }
 0x18b   :  { %v2196_v35 = vpop.xlane.xlu1 %2195  ;;  %v4427_v54 = vsel %vm4329_vm10, %v4426_v27, %v4422_v10  ;;  %v4436_v41 = vrot.slane %v2198_v4, %v8558_v18  ;;  %vm2430_vm15 = vcmp.eq.s32.totalorder %v8371_v53, %v2198_v4  ;;  %v8610_v27 = vsub.s32 %v4366_v16, %v8452_v2 }
 0x18c   :  { %v4431_v25 = vrot.slane %v2196_v35, %v8555_v9  ;;  %vm2429_vm12 = vcmp.eq.s32.totalorder %v8371_v53, %v2196_v35  ;;  %v639_v50 = vsel %vm11165_vm0, %v270_v33, 0.0  ;;  %v1848_v34 = vadd.f32 %v8299_v15, %v8267_v12  ;;  %v6903_v12 = vld [vmem:[%s11128_s0 + $0x3d8] sm:$0xff] }
 0x18d   :  { %6707 = vmatprep.mubr.msk.f32.mxu1 %vm2429_vm12, %v11294_v63  ;;  %2311 = vmin.index.xlane.f32.xlu0 %v2101_v32  ;;  %v4373_v30 = vadd.s32 4294967184, %v8371_v53  ;;  %vm11162_vm9 = vcmask 786112   ;;  %vm4364_vm12 = vcmask 851712   ;;  %v273_v33 = vmul.f32 %v6903_v12, %v6903_v12 }
 0x18e   :  { %v4432_v35 = vsel %vm11166_vm11, %v4431_v25, %v4427_v54  ;;  %2313 = vmin.index.xlane.f32.xlu1 %v2102_v49  ;;  %6708 = vmatmul.mubr.msk.f32.gmra.mxu1 %vm2430_vm15, %v11294_v63  ;;  %v2202_v14 = vpop.xlane.xlu0 %2201  ;;  %v1975_v49 = vmul.f32 2.0, %v8443_v11  ;;  %v4380_v11 = vadd.s32 4294967176, %v8371_v53  ;;  %v2104_v32 = vsub.f32 %v1848_v34, %v1976_v28 }
 0x18f   :  { %v2200_v10 = vpop.xlane.xlu1 %2199  ;;  %v4437_v16 = vsel %vm11220_vm1, %v4436_v41, %v4432_v35  ;;  %v4446_v25 = vrot.slane %v2202_v14, %v8602_v7  ;;  %vm2432_vm8 = vcmp.eq.s32.totalorder %v8371_v53, %v2202_v14  ;;  %v1847_v41 = vadd.f32 %v8299_v15, %v8269_v1  ;;  %v8635_v35 = vpop.f32.mrf.mxu0  ;;  %v6904_v1 = vld [vmem:[%s11128_s0 + $0x3d0] sm:$0xff] }
 0x190   :  { %v4441_v54 = vrot.slane %v2200_v10, %v8599_v39  ;;  %vm2431_vm5 = vcmp.eq.s32.totalorder %v8371_v53, %v2200_v10  ;;  %v8647_v28 = vsub.s32 %v4373_v30, %v8452_v2 }
 0x191   :  { %6710 = vmatprep.mubr.msk.f32.mxu1 %vm2431_vm5, %v11294_v63  ;;  %640 = vadd.xlane.f32.xlu0 %v639_v50  ;;  %v2103_v14 = vsub.f32 %v1847_v41, %v1975_v49  ;;  %v8656_v41 = vpop.f32.mrf.mxu0 }
 0x192   :  { %v4442_v4 = vsel %vm11163_vm4, %v4441_v54, %v4437_v16  ;;  %643 = vadd.xlane.f32.xlu1 %v642_v58  ;;  %6711 = vmatmul.mubr.msk.f32.gmra.mxu1 %vm2432_vm8, %v11294_v63  ;;  %v2206_v58 = vpop.xlane.xlu0 %2205  ;;  %v272_v54 = vmul.f32 %v6904_v1, %v6904_v1  ;;  %vm4371_vm8 = vcmask 917312   ;;  %vm11164_vm4 = vcmask 1048512  }
 0x193   :  { %v2204_v13 = vpop.xlane.xlu1 %2203  ;;  %v4447_v50 = vsel %vm11162_vm9, %v4446_v25, %v4442_v4  ;;  %v4456_v16 = vrot.slane %v2206_v58, %v8610_v27  ;;  %vm2434_vm5 = vcmp.eq.s32.totalorder %v8371_v53, %v2206_v58  ;;  %vm4378_vm9 = vcmask 982912  }
 0x194   :  { %v4451_v10 = vrot.slane %v2204_v13, %v8607_v46  ;;  %vm2433_vm15 = vcmp.eq.s32.totalorder %v8371_v53, %v2204_v13  ;;  %v8652_v13 = vsub.s32 %v4380_v11, %v8452_v2  ;;  %v648_v25 = vsel %vm11165_vm0, %v273_v33, 0.0 }
 0x195   :  { %6713 = vmatprep.mubr.msk.f32.mxu1 %vm2433_vm15, %v11294_v63  ;;  %2315 = vmin.index.xlane.f32.xlu0 %v2103_v14  ;;  %v1978_v4 = vmul.f32 2.0, %v8454_v56  ;;  %v1977_v2 = vmul.f32 2.0, %v8467_v62  ;;  %v1850_v56 = vadd.f32 %v8299_v15, %v8275_v61  ;;  %v1849_v58 = vadd.f32 %v8299_v15, %v8277_v45  ;;  %v6906_v45 = vld [vmem:[%s11128_s0 + $0x3e0] sm:$0xff] }
 0x196   :  { %v4452_v34 = vsel %vm4364_vm12, %v4451_v10, %v4447_v50  ;;  %2317 = vmin.index.xlane.f32.xlu1 %v2104_v32  ;;  %6714 = vmatmul.mubr.msk.f32.gmra.mxu1 %vm2434_vm5, %v11294_v63  ;;  %11300 = vst [vmem:[#allocation44_spill] sm:$0xff] %v8652_v13  ;;  %v2210_v12 = vpop.xlane.xlu0 %2209  ;;  %v645_v32 = vsel %vm11165_vm0, %v272_v54, 0.0  ;;  %v6905_v54 = vld [vmem:[%s11128_s0 + $0x3e8] sm:$0xff] }
 0x197   :  { %v2208_v49 = vpop.xlane.xlu1 %2207  ;;  %v4457_v11 = vsel %vm4371_vm8, %v4456_v16, %v4452_v34  ;;  %v4466_v10 = vrot.slane %v2210_v12, %v8652_v13  ;;  %vm2436_vm5 = vcmp.eq.s32.totalorder %v8371_v53, %v2210_v12  ;;  %v275_v14 = vmul.f32 %v6905_v54, %v6905_v54  ;;  %v8676_v16 = vpop.f32.mrf.mxu0 }
 0x198   :  { %v4461_v30 = vrot.slane %v2208_v49, %v8647_v28  ;;  %vm2435_vm15 = vcmp.eq.s32.totalorder %v8371_v53, %v2208_v49  ;;  %v2106_v50 = vsub.f32 %v1850_v56, %v1978_v4  ;;  %v274_v34 = vmul.f32 %v6906_v45, %v6906_v45 }
 0x199   :  { %6716 = vmatprep.mubr.msk.f32.mxu1 %vm2435_vm15, %v11294_v63  ;;  %646 = vadd.xlane.f32.xlu0 %v645_v32  ;;  %v2105_v49 = vsub.f32 %v1849_v58, %v1977_v2  ;;  %v654_v12 = vsel %vm11165_vm0, %v275_v14, 0.0  ;;  %v1980_v32 = vmul.f32 2.0, %v8488_v55  ;;  %v1852_v55 = vadd.f32 %v8299_v15, %v8284_v21  ;;  %v6907_v14 = vld [vmem:[%s11128_s0 + $0x3f8] sm:$0xff] }
 0x19a   :  { %v4462_v33 = vsel %vm4378_vm9, %v4461_v30, %v4457_v11  ;;  %649 = vadd.xlane.f32.xlu1 %v648_v25  ;;  %6717 = vmatmul.mubr.msk.f32.gmra.mxu1 %vm2436_vm5, %v11294_v63  ;;  %v2214_v61 = vpop.xlane.xlu0 %2213  ;;  %v8689_v11 = vpop.f32.mrf.mxu0  ;;  %v651_v56 = vsel %vm11165_vm0, %v274_v34, 0.0  ;;  %v1851_v54 = vadd.f32 %v8299_v15, %v8286_v24 }
 0x19b   :  { %v4467_v62 = vsel %vm11164_vm4, %v4466_v10, %v4462_v33  ;;  %v2212_v1 = vpop.xlane.xlu1 %2211  ;;  %v4478_v30 = vrot.slane %v2214_v61, %v8477_v31  ;;  %vm2438_vm5 = vcmp.eq.s32.totalorder %v8371_v53, %v2214_v61  ;;  %v1979_v33 = vmul.f32 2.0, %v8502_v23 }
 0x19c   :  { %4469 = vst [vmem:[#allocation2 + $0x1] ss:$8 sm:$0x1] %v4467_v62  ;;  %vm2437_vm15 = vcmp.eq.s32.totalorder %v8371_v53, %v2212_v1  ;;  %v4474_v25 = vrot.slane %v2212_v1, %v8474_v59  ;;  %v2108_v61 = vsub.f32 %v1852_v55, %v1980_v32  ;;  %v8708_v45 = vpop.f32.mrf.mxu0  ;;  %v1981_v55 = vmul.f32 2.0, %v8543_v17 }
 0x19d   :  { %6719 = vmatprep.mubr.msk.f32.mxu1 %vm2437_vm15, %v11294_v63  ;;  %2319 = vmin.index.xlane.f32.xlu0 %v2105_v49  ;;  %v6908_v49 = vld [vmem:[%s11128_s0 + $0x3f0] sm:$0xff]  ;;  %v1856_v17 = vadd.f32 %v8299_v15, %v8305_v43  ;;  %v1855_v43 = vadd.f32 %v8299_v15, %v8307_v47  ;;  %v1985_v47 = vmul.f32 2.0, %v8635_v35  ;;  %v1860_v35 = vadd.f32 %v8299_v15, %v8321_v37 }
 0x19e   :  { %2321 = vmin.index.xlane.f32.xlu1 %v2106_v50  ;;  %6720 = vmatmul.mubr.msk.f32.gmra.mxu1 %vm2438_vm5, %v11294_v63  ;;  %v2218_v10 = vpop.xlane.xlu0 %2217  ;;  %v4479_v58 = vsel %vm4287_vm13, %v4478_v30, %v4474_v25  ;;  %v277_v50 = vmul.f32 %v6907_v14, %v6907_v14  ;;  %v276_v24 = vmul.f32 %v6908_v49, %v6908_v49 }
 0x19f   :  { %v2216_v4 = vpop.xlane.xlu1 %2215  ;;  %v4488_v62 = vrot.slane %v2218_v10, %v8497_v8  ;;  %vm2440_vm15 = vcmp.eq.s32.totalorder %v8371_v53, %v2218_v10  ;;  %v2107_v25 = vsub.f32 %v1851_v54, %v1979_v33  ;;  %v1982_v10 = vmul.f32 2.0, %v8518_v42 }
 0x1a0   :  { %v4483_v2 = vrot.slane %v2216_v4, %v8484_v48  ;;  %vm2439_vm4 = vcmp.eq.s32.totalorder %v8371_v53, %v2216_v4  ;;  %v1854_v42 = vadd.f32 %v8299_v15, %v8292_v29  ;;  %v1853_v14 = vadd.f32 %v8299_v15, %v8294_v19 }
 0x1a1   :  { %6722 = vmatprep.mubr.msk.f32.mxu1 %vm2439_vm4, %v11294_v63  ;;  %652 = vadd.xlane.f32.xlu0 %v651_v56  ;;  %v8723_v56 = vpop.f32.mrf.mxu0  ;;  %v1859_v37 = vadd.f32 %v8299_v15, %v8323_v51 }
 0x1a2   :  { %v4484_v1 = vsel %vm4294_vm14, %v4483_v2, %v4479_v58  ;;  %655 = vadd.xlane.f32.xlu1 %v654_v12  ;;  %6723 = vmatmul.mubr.msk.f32.gmra.mxu1 %vm2440_vm15, %v11294_v63  ;;  %v2222_v34 = vpop.xlane.xlu0 %2221  ;;  %v660_v2 = vsel %vm11165_vm0, %v277_v50, 0.0  ;;  %v1984_v50 = vmul.f32 2.0, %v8566_v52 }
 0x1a3   :  { %v2220_v23 = vpop.xlane.xlu1 %2219  ;;  %v4489_v30 = vsel %vm4301_vm2, %v4488_v62, %v4484_v1  ;;  %v4498_v4 = vrot.slane %v2222_v34, %v8523_v22  ;;  %vm2442_vm5 = vcmp.eq.s32.totalorder %v8371_v53, %v2222_v34  ;;  %v657_v62 = vsel %vm11165_vm0, %v276_v24, 0.0  ;;  %v8743_v49 = vpop.f32.mrf.mxu0 }
 0x1a4   :  { %v4493_v21 = vrot.slane %v2220_v23, %v8515_v0  ;;  %vm2441_vm4 = vcmp.eq.s32.totalorder %v8371_v53, %v2220_v23  ;;  %v1983_v34 = vmul.f32 2.0, %v8587_v3  ;;  %v2112_v3 = vsub.f32 %v1856_v17, %v1984_v50 }
 0x1a5   :  { %6725 = vmatprep.mubr.msk.f32.mxu1 %vm2441_vm4, %v11294_v63  ;;  %2323 = vmin.index.xlane.f32.xlu0 %v2107_v25  ;;  %v2109_v25 = vsub.f32 %v1853_v14, %v1981_v55  ;;  %v1987_v14 = vmul.f32 2.0, %v8676_v16  ;;  %vm11309_vm0 = vcmask 720512  }
 0x1a6   :  { %v4494_v12 = vsel %vm4308_vm3, %v4493_v21, %v4489_v30  ;;  %2325 = vmin.index.xlane.f32.xlu1 %v2108_v61  ;;  %6726 = vmatmul.mubr.msk.f32.gmra.mxu1 %vm2442_vm5, %v11294_v63  ;;  %v2226_v58 = vpop.xlane.xlu0 %2225  ;;  %v2110_v21 = vsub.f32 %v1854_v42, %v1982_v10 }
 0x1a7   :  { %v2224_v32 = vpop.xlane.xlu1 %2223  ;;  %v4499_v1 = vsel %vm4315_vm6, %v4498_v4, %v4494_v12  ;;  %v4508_v54 = vrot.slane %v2226_v58, %v8538_v57  ;;  %vm2444_vm4 = vcmp.eq.s32.totalorder %v8371_v53, %v2226_v58  ;;  %v2111_v12 = vsub.f32 %v1855_v43, %v1983_v34 }
 0x1a8   :  { %v4503_v33 = vrot.slane %v2224_v32, %v8507_v26  ;;  %vm2443_vm15 = vcmp.eq.s32.totalorder %v8371_v53, %v2224_v32  ;;  %v1986_v32 = vmul.f32 2.0, %v8614_v40  ;;  %v1858_v40 = vadd.f32 %v8299_v15, %v8313_v5 }
 0x1a9   :  { %6728 = vmatprep.mubr.msk.f32.mxu1 %vm2443_vm15, %v11294_v63  ;;  %658 = vadd.xlane.f32.xlu0 %v657_v62  ;;  %v1989_v43 = vmul.f32 2.0, %v8708_v45  ;;  %v8800_v45 = vld [vmem:[%s11131_s3] ss:$0 sm:$0xff] }
 0x1aa   :  { %v4504_v23 = vsel %vm4322_vm7, %v4503_v33, %v4499_v1  ;;  %661 = vadd.xlane.f32.xlu1 %v660_v2  ;;  %6729 = vmatmul.mubr.msk.f32.gmra.mxu1 %vm2444_vm4, %v11294_v63  ;;  %v2230_v24 = vpop.xlane.xlu0 %2229  ;;  %v8756_v2 = vpop.f32.mrf.mxu0  ;;  %v1857_v1 = vadd.f32 %v8299_v15, %v8315_v44 }
 0x1ab   :  { %v2228_v61 = vpop.xlane.xlu1 %2227  ;;  %v4509_v19 = vsel %vm4329_vm10, %v4508_v54, %v4504_v23  ;;  %v4518_v30 = vrot.slane %v2230_v24, %v8558_v18  ;;  %vm2446_vm15 = vcmp.eq.s32.totalorder %v8371_v53, %v2230_v24  ;;  %v1988_v54 = vmul.f32 2.0, %v8656_v41 }
 0x1ac   :  { %v4513_v29 = vrot.slane %v2228_v61, %v8555_v9  ;;  %vm2445_vm5 = vcmp.eq.s32.totalorder %v8371_v53, %v2228_v61  ;;  %v2114_v23 = vsub.f32 %v1858_v40, %v1986_v32  ;;  %v1627_v17 = vpop.f32.mrf.mxu0  ;;  %v2113_v61 = vsub.f32 %v1857_v1, %v1985_v47 }
 0x1ad   :  { %6731 = vmatprep.mubr.msk.f32.mxu1 %vm2445_vm5, %v11294_v63  ;;  %2327 = vmin.index.xlane.f32.xlu0 %v2109_v25  ;;  %v2116_v16 = vsub.f32 %v1860_v35, %v1988_v54  ;;  %v1990_v24 = vmul.f32 2.0, %v8689_v11  ;;  %v1993_v54 = vmul.f32 2.0, %v1627_v17 }
 0x1ae   :  { %v4514_v52 = vsel %vm11166_vm11, %v4513_v29, %v4509_v19  ;;  %2329 = vmin.index.xlane.f32.xlu1 %v2110_v21  ;;  %6732 = vmatmul.mubr.msk.f32.gmra.mxu1 %vm2446_vm15, %v11294_v63  ;;  %v2234_v33 = vpop.xlane.xlu0 %2233  ;;  %vm11301_vm15 = vcmask 720512   ;;  %v2115_v29 = vsub.f32 %v1859_v37, %v1987_v14  ;;  %v6605_v25 = vpop.f32.mrf.mxu0  ;;  %v11305_v37 = vld [vmem:[#allocation24_spill] sm:$0xff] }
 0x1af   :  { %v2232_v4 = vpop.xlane.xlu1 %2231  ;;  %v4519_v58 = vsel %vm11220_vm1, %v4518_v30, %v4514_v52  ;;  %v4528_v62 = vrot.slane %v2234_v33, %v8602_v7  ;;  %vm2448_vm5 = vcmp.eq.s32.totalorder %v8371_v53, %v2234_v33 }
 0x1b0   :  { %v4523_v10 = vrot.slane %v2232_v4, %v8599_v39  ;;  %vm2447_vm4 = vcmp.eq.s32.totalorder %v8371_v53, %v2232_v4  ;;  %v1861_v4 = vadd.f32 %v8800_v45, %v8331_v6  ;;  %v1864_v6 = vadd.f32 %v8800_v45, %v8337_v38 }
 0x1b1   :  { %6734 = vmatprep.mubr.msk.f32.mxu1 %vm2447_vm4, %v11294_v63  ;;  %2331 = vmin.index.xlane.f32.xlu0 %v2111_v12  ;;  %v1866_v38 = vadd.f32 %v8800_v45, %v8345_v36 }
 0x1b2   :  { %v4524_v55 = vsel %vm11301_vm15, %v4523_v10, %v4519_v58  ;;  %2333 = vmin.index.xlane.f32.xlu1 %v2112_v3  ;;  %6735 = vmatmul.mubr.msk.f32.gmra.mxu1 %vm2448_vm5, %v11294_v63  ;;  %v2238_v50 = vpop.xlane.xlu0 %2237  ;;  %vm11302_vm5 = vcmask 786112   ;;  %v1862_v3 = vadd.f32 %v8299_v15, %v8329_v60  ;;  %v1992_v15 = vmul.f32 2.0, %v8723_v56  ;;  %v1637_v60 = vpop.f32.mrf.mxu0 }
 0x1b3   :  { %v2236_v42 = vpop.xlane.xlu1 %2235  ;;  %v4529_v21 = vsel %vm11302_vm5, %v4528_v62, %v4524_v55  ;;  %v4538_v44 = vrot.slane %v2238_v50, %v8610_v27  ;;  %vm2450_vm15 = vcmp.eq.s32.totalorder %v8371_v53, %v2238_v50  ;;  %v2117_v47 = vsub.f32 %v1861_v4, %v1989_v43 }
 0x1b4   :  { %v4533_v5 = vrot.slane %v2236_v42, %v8607_v46  ;;  %vm2449_vm4 = vcmp.eq.s32.totalorder %v8371_v53, %v2236_v42  ;;  %v2118_v10 = vsub.f32 %v1862_v3, %v1990_v24  ;;  %v1991_v58 = vmul.f32 2.0, %v8743_v49  ;;  %v6608_v1 = vpop.f32.mrf.mxu0  ;;  %v11306_v24 = vld [vmem:[#allocation25_spill] sm:$0xff] }
 0x1b5   :  { %6737 = vmatprep.mubr.msk.f32.mxu1 %vm2449_vm4, %v11294_v63  ;;  %2335 = vmin.index.xlane.f32.xlu0 %v2113_v61  ;;  %v1863_v56 = vadd.f32 %v8800_v45, %v8339_v20  ;;  %v2120_v40 = vsub.f32 %v1864_v6, %v1992_v15  ;;  %v1994_v55 = vmul.f32 2.0, %v8756_v2  ;;  %v11304_v2 = vld [vmem:[#allocation23_spill] sm:$0xff]  ;;  %v1996_v50 = vmul.f32 2.0, %v6605_v25 }
 0x1b6   :  { %v4534_v41 = vsel %vm4364_vm12, %v4533_v5, %v4529_v21  ;;  %2337 = vmin.index.xlane.f32.xlu1 %v2114_v23  ;;  %6738 = vmatmul.mubr.msk.f32.gmra.mxu1 %vm2450_vm15, %v11294_v63  ;;  %v2242_v30 = vpop.xlane.xlu0 %2241  ;;  %vm11303_vm15 = vcmask 1048512   ;;  %v1865_v23 = vadd.f32 %v8800_v45, %v11304_v2  ;;  %v1647_v61 = vpop.f32.mrf.mxu0  ;;  %v1867_v25 = vadd.f32 %v8800_v45, %v11306_v24 }
 0x1b7   :  { %v2240_v34 = vpop.xlane.xlu1 %2239  ;;  %v4539_v51 = vsel %vm4371_vm8, %v4538_v44, %v4534_v41  ;;  %v4548_v52 = vrot.slane %v2242_v30, %v8652_v13  ;;  %vm2452_vm5 = vcmp.eq.s32.totalorder %v8371_v53, %v2242_v30  ;;  %v2119_v35 = vsub.f32 %v1863_v56, %v1991_v58 }
 0x1b8   :  { %v4543_v19 = vrot.slane %v2240_v34, %v8647_v28  ;;  %vm2451_vm4 = vcmp.eq.s32.totalorder %v8371_v53, %v2240_v34  ;;  %v2122_v5 = vsub.f32 %v1866_v38, %v1994_v55  ;;  %v2121_v36 = vsub.f32 %v1865_v23, %v1993_v54 }
 0x1b9   :  { %6740 = vmatprep.mubr.msk.f32.mxu1 %vm2451_vm4, %v11294_v63  ;;  %2339 = vmin.index.xlane.f32.xlu0 %v2115_v29  ;;  %v1995_v44 = vmul.f32 2.0, %v1637_v60  ;;  %v1868_v41 = vadd.f32 %v8800_v45, %v11305_v37  ;;  %v8834_v29 = vpop.f32.mrf.mxu0  ;;  %v1997_v3 = vmul.f32 2.0, %v1647_v61 }
 0x1ba   :  { %v4544_v11 = vsel %vm4378_vm9, %v4543_v19, %v4539_v51  ;;  %2341 = vmin.index.xlane.f32.xlu1 %v2116_v16  ;;  %6741 = vmatmul.mubr.msk.f32.gmra.mxu1 %vm2452_vm5, %v11294_v63  ;;  %v2246_v33 = vpop.xlane.xlu0 %2245 }
 0x1bb   :  { %v4549_v12 = vsel %vm11303_vm15, %v4548_v52, %v4544_v11  ;;  %v2244_v32 = vpop.xlane.xlu1 %2243  ;;  %vm2454_vm5 = vcmp.eq.s32.totalorder %v8371_v53, %v2246_v33  ;;  %v4560_v42 = vrot.slane %v2246_v33, %v8477_v31  ;;  %v2124_v51 = vsub.f32 %v1868_v41, %v1996_v50 }
 0x1bc   :  { %4551 = vst [vmem:[#allocation2 + $0x2] ss:$8 sm:$0x1] %v4549_v12  ;;  %vm2453_vm4 = vcmp.eq.s32.totalorder %v8371_v53, %v2244_v32  ;;  %v4556_v20 = vrot.slane %v2244_v32, %v8474_v59  ;;  %v1998_v52 = vmul.f32 2.0, %v6608_v1  ;;  %v2123_v4 = vsub.f32 %v1867_v25, %v1995_v44  ;;  %v11307_v12 = vld [vmem:[#allocation26_spill] sm:$0xff] }
 0x1bd   :  { %6743 = vmatprep.mubr.msk.f32.mxu1 %vm2453_vm4, %v11294_v63  ;;  %2343 = vmin.index.xlane.f32.xlu0 %v2117_v47  ;;  %v1870_v32 = vadd.f32 %v8800_v45, %v11307_v12  ;;  %v1657_v47 = vpop.f32.mrf.mxu0 }
 0x1be   :  { %2345 = vmin.index.xlane.f32.xlu1 %v2118_v10  ;;  %6744 = vmatmul.mubr.msk.f32.gmra.mxu1 %vm2454_vm5, %v11294_v63  ;;  %v2250_v49 = vpop.xlane.xlu0 %2249  ;;  %v4561_v16 = vsel %vm4287_vm13, %v4560_v42, %v4556_v20  ;;  %v11308_v10 = vld [vmem:[#allocation27_spill] sm:$0xff]  ;;  %v1999_v55 = vmul.f32 2.0, %v1657_v47  ;;  %v2000_v47 = vmul.f32 2.0, %v8834_v29 }
 0x1bf   :  { %v2248_v62 = vpop.xlane.xlu1 %2247  ;;  %vm2456_vm4 = vcmp.eq.s32.totalorder %v8371_v53, %v2250_v49  ;;  %v4570_v34 = vrot.slane %v2250_v49, %v8497_v8  ;;  %v1869_v15 = vadd.f32 %v8800_v45, %v11308_v10  ;;  %v2126_v56 = vsub.f32 %v1870_v32, %v1998_v52 }
 0x1c0   :  { %vm2455_vm15 = vcmp.eq.s32.totalorder %v8371_v53, %v2248_v62  ;;  %v4565_v14 = vrot.slane %v2248_v62, %v8484_v48 }
 0x1c1   :  { %6746 = vmatprep.mubr.msk.f32.mxu1 %vm2455_vm15, %v11294_v63  ;;  %2347 = vmin.index.xlane.f32.xlu0 %v2119_v35  ;;  %v2125_v62 = vsub.f32 %v1869_v15, %v1997_v3 }
 0x1c2   :  { %2349 = vmin.index.xlane.f32.xlu1 %v2120_v40  ;;  %6747 = vmatmul.mubr.msk.f32.gmra.mxu1 %vm2456_vm4, %v11294_v63  ;;  %v2254_v21 = vpop.xlane.xlu0 %2253  ;;  %v4566_v19 = vsel %vm4294_vm14, %v4565_v14, %v4561_v16 }
 0x1c3   :  { %v2252_v17 = vpop.xlane.xlu1 %2251  ;;  %vm2458_vm15 = vcmp.eq.s32.totalorder %v8371_v53, %v2254_v21  ;;  %v4571_v60 = vsel %vm4301_vm2, %v4570_v34, %v4566_v19  ;;  %v4580_v33 = vrot.slane %v2254_v21, %v8523_v22 }
 0x1c4   :  { %vm2457_vm5 = vcmp.eq.s32.totalorder %v8371_v53, %v2252_v17  ;;  %v4575_v30 = vrot.slane %v2252_v17, %v8515_v0 }
 0x1c5   :  { %6749 = vmatprep.mubr.msk.f32.mxu1 %vm2457_vm5, %v11294_v63  ;;  %2351 = vmin.index.xlane.f32.xlu0 %v2121_v36 }
 0x1c6   :  { %2353 = vmin.index.xlane.f32.xlu1 %v2122_v5  ;;  %6750 = vmatmul.mubr.msk.f32.gmra.mxu1 %vm2458_vm15, %v11294_v63  ;;  %v605_v11 = vpop.xlane.xlu0 %604  ;;  %v4576_v58 = vsel %vm4308_vm3, %v4575_v30, %v4571_v60 }
 0x1c7   :  { %v2258_v43 = vpop.xlane.xlu1 %2257  ;;  %v1871_v1 = vadd.f32 %v8800_v45, %v605_v11  ;;  %v4581_v35 = vsel %vm4315_vm6, %v4580_v33, %v4576_v58 }
 0x1c8   :  { %vm2460_vm5 = vcmp.eq.s32.totalorder %v8371_v53, %v2258_v43  ;;  %v4590_v20 = vrot.slane %v2258_v43, %v8538_v57 }
 0x1c9   :  { %2355 = vmin.index.xlane.f32.xlu0 %v2123_v4  ;;  %v2127_v2 = vsub.f32 %v1871_v1, %v1999_v55 }
 0x1ca   :  { %2357 = vmin.index.xlane.f32.xlu1 %v2124_v51  ;;  %v2256_v40 = vpop.xlane.xlu0 %2255 }
 0x1cb   :  { %v2262_v6 = vpop.xlane.xlu1 %2261  ;;  %v4585_v49 = vrot.slane %v2256_v40, %v8507_v26  ;;  %vm2459_vm4 = vcmp.eq.s32.totalorder %v8371_v53, %v2256_v40 }
 0x1cc   :  { %6752 = vmatprep.mubr.msk.f32.mxu1 %vm2459_vm4, %v11294_v63  ;;  %vm2462_vm4 = vcmp.eq.s32.totalorder %v8371_v53, %v2262_v6  ;;  %v4600_v50 = vrot.slane %v2262_v6, %v8558_v18 }
 0x1cd   :  { %v4586_v54 = vsel %vm4322_vm7, %v4585_v49, %v4581_v35  ;;  %2359 = vmin.index.xlane.f32.xlu0 %v2125_v62  ;;  %6753 = vmatmul.mubr.msk.f32.gmra.mxu1 %vm2460_vm5, %v11294_v63  ;;  %v6614_v62 = vpop.f32.mrf.mxu0 }
 0x1ce   :  { %2361 = vmin.index.xlane.f32.xlu1 %v2126_v56  ;;  %v2260_v42 = vpop.xlane.xlu0 %2259  ;;  %v4591_v14 = vsel %vm4329_vm10, %v4590_v20, %v4586_v54  ;;  %v2002_v20 = vmul.f32 2.0, %v6614_v62 }
 0x1cf   :  { %v2266_v38 = vpop.xlane.xlu1 %2265  ;;  %v4595_v23 = vrot.slane %v2260_v42, %v8555_v9  ;;  %vm2461_vm15 = vcmp.eq.s32.totalorder %v8371_v53, %v2260_v42  ;;  %v1667_v54 = vpop.f32.mrf.mxu0 }
 0x1d0   :  { %6755 = vmatprep.mubr.msk.f32.mxu1 %vm2461_vm15, %v11294_v63  ;;  %vm2464_vm15 = vcmp.eq.s32.totalorder %v8371_v53, %v2266_v38  ;;  %v4610_v41 = vrot.slane %v2266_v38, %v8602_v7 }
 0x1d1   :  { %v4596_v17 = vsel %vm11166_vm11, %v4595_v23, %v4591_v14  ;;  %2363 = vmin.index.xlane.f32.xlu0 %v2127_v2  ;;  %6756 = vmatmul.mubr.msk.f32.gmra.mxu1 %vm2462_vm4, %v11294_v63  ;;  %vm11310_vm11 = vcmask 786112   ;;  %v2001_v23 = vmul.f32 2.0, %v1667_v54 }
 0x1d2   :  { %v2264_v61 = vpop.xlane.xlu0 %2263  ;;  %v4601_v36 = vsel %vm11220_vm1, %v4600_v50, %v4596_v17 }
 0x1d3   :  { %v2270_v5 = vpop.xlane.xlu1 %2269  ;;  %v4605_v21 = vrot.slane %v2264_v61, %v8599_v39  ;;  %vm2463_vm5 = vcmp.eq.s32.totalorder %v8371_v53, %v2264_v61  ;;  %v6617_v61 = vpop.f32.mrf.mxu0 }
 0x1d4   :  { %6758 = vmatprep.mubr.msk.f32.mxu1 %vm2463_vm5, %v11294_v63  ;;  %vm2466_vm5 = vcmp.eq.s32.totalorder %v8371_v53, %v2270_v5  ;;  %v4620_v30 = vrot.slane %v2270_v5, %v8610_v27 }
 0x1d5   :  { %v4606_v44 = vsel %vm11309_vm0, %v4605_v21, %v4601_v36  ;;  %6759 = vmatmul.mubr.msk.f32.gmra.mxu1 %vm2464_vm15, %v11294_v63  ;;  %vm11311_vm15 = vcmask 1048512  }
 0x1d6   :  { %v2268_v16 = vpop.xlane.xlu0 %2267  ;;  %v4611_v24 = vsel %vm11310_vm11, %v4610_v41, %v4606_v44 }
 0x1d7   :  { %v2274_v37 = vpop.xlane.xlu1 %2273  ;;  %v4615_v34 = vrot.slane %v2268_v16, %v8607_v46  ;;  %vm2465_vm4 = vcmp.eq.s32.totalorder %v8371_v53, %v2268_v16 }
 0x1d8   :  { %6761 = vmatprep.mubr.msk.f32.mxu1 %vm2465_vm4, %v11294_v63  ;;  %v4630_v52 = vrot.slane %v2274_v37, %v8652_v13  ;;  %vm2468_vm11 = vcmp.eq.s32.totalorder %v8371_v53, %v2274_v37 }
 0x1d9   :  { %v4616_v25 = vsel %vm4364_vm12, %v4615_v34, %v4611_v24  ;;  %6762 = vmatmul.mubr.msk.f32.gmra.mxu1 %vm2466_vm5, %v11294_v63 }
 0x1da   :  { %v2272_v43 = vpop.xlane.xlu0 %2271  ;;  %v4621_v3 = vsel %vm4371_vm8, %v4620_v30, %v4616_v25 }
 0x1db   :  { %v2278_v19 = vpop.xlane.xlu1 %2277  ;;  %v4625_v51 = vrot.slane %v2272_v43, %v8647_v28  ;;  %vm2467_vm0 = vcmp.eq.s32.totalorder %v8371_v53, %v2272_v43  ;;  %v2004_v43 = vmul.f32 2.0, %v6617_v61 }
 0x1dc   :  { %6764 = vmatprep.mubr.msk.f32.mxu1 %vm2467_vm0, %v11294_v63  ;;  %vm2470_vm5 = vcmp.eq.s32.totalorder %v8371_v53, %v2278_v19  ;;  %v4642_v49 = vrot.slane %v2278_v19, %v8477_v31  ;;  %v1677_v19 = vpop.f32.mrf.mxu0 }
 0x1dd   :  { %v4626_v11 = vsel %vm4378_vm9, %v4625_v51, %v4621_v3  ;;  %6765 = vmatmul.mubr.msk.f32.gmra.mxu1 %vm2468_vm11, %v11294_v63  ;;  %v2003_v3 = vmul.f32 2.0, %v1677_v19 }
 0x1de   :  { %v4631_v12 = vsel %vm11311_vm15, %v4630_v52, %v4626_v11  ;;  %v2276_v32 = vpop.xlane.xlu0 %2275 }
 0x1df   :  { %v2282_v4 = vpop.xlane.xlu1 %2281  ;;  %4633 = vst [vmem:[#allocation2 + $0x3] ss:$8 sm:$0x1] %v4631_v12  ;;  %vm2469_vm4 = vcmp.eq.s32.totalorder %v8371_v53, %v2276_v32  ;;  %v4638_v40 = vrot.slane %v2276_v32, %v8474_v59 }
 0x1e0   :  { %6767 = vmatprep.mubr.msk.f32.mxu1 %vm2469_vm4, %v11294_v63  ;;  %vm2472_vm11 = vcmp.eq.s32.totalorder %v8371_v53, %v2282_v4  ;;  %v4652_v17 = vrot.slane %v2282_v4, %v8497_v8 }
 0x1e1   :  { %6768 = vmatmul.mubr.msk.f32.gmra.mxu1 %vm2470_vm5, %v11294_v63  ;;  %v4643_v38 = vsel %vm4287_vm13, %v4642_v49, %v4638_v40 }
 0x1e2   :  { %v2280_v15 = vpop.xlane.xlu0 %2279 }
 0x1e3   :  { %v2286_v10 = vpop.xlane.xlu1 %2285  ;;  %vm2471_vm0 = vcmp.eq.s32.totalorder %v8371_v53, %v2280_v15  ;;  %v4647_v29 = vrot.slane %v2280_v15, %v8484_v48 }
 0x1e4   :  { %6770 = vmatprep.mubr.msk.f32.mxu1 %vm2471_vm0, %v11294_v63  ;;  %vm2474_vm4 = vcmp.eq.s32.totalorder %v8371_v53, %v2286_v10  ;;  %v4662_v24 = vrot.slane %v2286_v10, %v8523_v22  ;;  %v6620_v10 = vpop.f32.mrf.mxu0 }
 0x1e5   :  { %6771 = vmatmul.mubr.msk.f32.gmra.mxu1 %vm2472_vm11, %v11294_v63  ;;  %v4648_v42 = vsel %vm4294_vm14, %v4647_v29, %v4643_v38  ;;  %v2006_v49 = vmul.f32 2.0, %v6620_v10 }
 0x1e6   :  { %v2284_v33 = vpop.xlane.xlu0 %2283  ;;  %v4653_v36 = vsel %vm4301_vm2, %v4652_v17, %v4648_v42 }
 0x1e7   :  { %v8898_v60 = vpop.xlane.xlu1 %2289  ;;  %vm2473_vm15 = vcmp.eq.s32.totalorder %v8371_v53, %v2284_v33  ;;  %v4657_v2 = vrot.slane %v2284_v33, %v8515_v0 }
 0x1e8   :  { %6773 = vmatprep.mubr.msk.f32.mxu1 %vm2473_vm15, %v11294_v63  ;;  %vm2476_vm0 = vcmp.eq.s32.totalorder %v8371_v53, %v8898_v60  ;;  %v4672_v4 = vrot.slane %v8898_v60, %v8538_v57  ;;  %v1687_v60 = vpop.f32.mrf.mxu0 }
 0x1e9   :  { %6774 = vmatmul.mubr.msk.f32.gmra.mxu1 %vm2474_vm4, %v11294_v63  ;;  %v4658_v37 = vsel %vm4308_vm3, %v4657_v2, %v4653_v36  ;;  %v2005_v38 = vmul.f32 2.0, %v1687_v60 }
 0x1ea   :  { %v2288_v56 = vpop.xlane.xlu0 %2287  ;;  %v4663_v30 = vsel %vm4315_vm6, %v4662_v24, %v4658_v37 }
 0x1eb   :  { %v608_v58 = vpop.xlane.xlu1 %607  ;;  %vm2475_vm5 = vcmp.eq.s32.totalorder %v8371_v53, %v2288_v56  ;;  %v4667_v41 = vrot.slane %v2288_v56, %v8507_v26 }
 0x1ec   :  { %v1872_v6 = vadd.f32 %v8800_v45, %v608_v58  ;;  %6776 = vmatprep.mubr.msk.f32.mxu1 %vm2475_vm5, %v11294_v63 }
 0x1ed   :  { %6777 = vmatmul.mubr.msk.f32.gmra.mxu1 %vm2476_vm0, %v11294_v63  ;;  %v4668_v51 = vsel %vm4322_vm7, %v4667_v41, %v4663_v30  ;;  %vm11312_vm0 = vcmask 589312  }
 0x1ee   :  { %v2128_v55 = vsub.f32 %v1872_v6, %v2000_v47  ;;  %v2292_v35 = vpop.xlane.xlu0 %2291  ;;  %v4673_v47 = vsel %vm4329_vm10, %v4672_v4, %v4668_v51 }
 0x1ef   :  { %v2294_v1 = vpop.xlane.xlu1 %2293  ;;  %vm2477_vm15 = vcmp.eq.s32.totalorder %v8371_v53, %v2292_v35  ;;  %v4677_v52 = vrot.slane %v2292_v35, %v8555_v9 }
 0x1f0   :  { %2365 = vmin.index.xlane.f32.xlu1 %v2128_v55  ;;  %vm2478_vm11 = vcmp.eq.s32.totalorder %v8371_v53, %v2294_v1  ;;  %6779 = vmatprep.mubr.msk.f32.mxu1 %vm2477_vm15, %v11294_v63  ;;  %v4682_v33 = vrot.slane %v2294_v1, %v8558_v18 }
 0x1f1   :  { %6780 = vmatmul.mubr.msk.f32.gmra.mxu1 %vm2478_vm11, %v11294_v63  ;;  %v4678_v6 = vsel %vm11312_vm0, %v4677_v52, %v4673_v47 }
 0x1f2   :  { %v611_v50 = vpop.xlane.xlu0 %610  ;;  %v4683_v1 = vsel %vm11220_vm1, %v4682_v33, %v4678_v6 }
 0x1f3   :  { %v614_v14 = vpop.xlane.xlu1 %613  ;;  %v1873_v21 = vadd.f32 %v8800_v45, %v611_v50  ;;  %v6623_v50 = vpop.f32.mrf.mxu0 }
 0x1f4   :  { %v1874_v5 = vadd.f32 %v8800_v45, %v614_v14  ;;  %v2008_v19 = vmul.f32 2.0, %v6623_v50  ;;  %v11322_v50 = vld [vmem:[#allocation12_spill] sm:$0xff] }
 0x1f5   :  { %v2129_v16 = vsub.f32 %v1873_v21, %v2001_v23 }
 0x1f6   :  { %v2130_v44 = vsub.f32 %v1874_v5, %v2002_v20  ;;  %v2296_v25 = vpop.xlane.xlu0 %2295 }
 0x1f7   :  { %v2298_v34 = vpop.xlane.xlu1 %2297  ;;  %2367 = vmin.index.xlane.f32.xlu0 %v2129_v16  ;;  %vm2479_vm5 = vcmp.eq.s32.totalorder %v8371_v53, %v2296_v25  ;;  %v4687_v56 = vrot.slane %v2296_v25, %v8599_v39 }
 0x1f8   :  { %2369 = vmin.index.xlane.f32.xlu1 %v2130_v44  ;;  %vm2480_vm4 = vcmp.eq.s32.totalorder %v8371_v53, %v2298_v34  ;;  %6782 = vmatprep.mubr.msk.f32.mxu1 %vm2479_vm5, %v11294_v63  ;;  %v4692_v29 = vrot.slane %v2298_v34, %v8602_v7  ;;  %vm11314_vm5 = vcmask 786112   ;;  %v1697_v34 = vpop.f32.mrf.mxu0 }
 0x1f9   :  { %6783 = vmatmul.mubr.msk.f32.gmra.mxu1 %vm2480_vm4, %v11294_v63  ;;  %vm11313_vm4 = vcmask 720512   ;;  %v2007_v52 = vmul.f32 2.0, %v1697_v34 }
 0x1fa   :  { %v617_v32 = vpop.xlane.xlu0 %616  ;;  %v4688_v35 = vsel %vm11313_vm4, %v4687_v56, %v4683_v1  ;;  %v6626_v4 = vpop.f32.mrf.mxu0  ;;  %v11316_v56 = vld [vmem:[#allocation8_spill] sm:$0xff]  ;;  %v11320_v1 = vld [vmem:[#allocation11_spill] sm:$0xff] }
 0x1fb   :  { %v620_v11 = vpop.xlane.xlu1 %619  ;;  %v1875_v15 = vadd.f32 %v8800_v45, %v617_v32  ;;  %v4693_v17 = vsel %vm11314_vm5, %v4692_v29, %v4688_v35  ;;  %v2010_v47 = vmul.f32 2.0, %v6626_v4  ;;  %v11319_v29 = vld [vmem:[#allocation10_spill] sm:$0xff] }
 0x1fc   :  { %v1876_v12 = vadd.f32 %v8800_v45, %v620_v11 }
 0x1fd   :  { %v2131_v62 = vsub.f32 %v1875_v15, %v2003_v3  ;;  %v1707_v15 = vpop.f32.mrf.mxu0 }
 0x1fe   :  { %v2132_v58 = vsub.f32 %v1876_v12, %v2004_v43  ;;  %v2300_v55 = vpop.xlane.xlu0 %2299 }
 0x1ff   :  { %v2302_v40 = vpop.xlane.xlu1 %2301  ;;  %2371 = vmin.index.xlane.f32.xlu0 %v2131_v62  ;;  %vm2481_vm15 = vcmp.eq.s32.totalorder %v8371_v53, %v2300_v55  ;;  %v4697_v54 = vrot.slane %v2300_v55, %v8607_v46  ;;  %v11317_v62 = vld [vmem:[#allocation9_spill] sm:$0xff]  ;;  %v2009_v55 = vmul.f32 2.0, %v1707_v15 }
 0x200   :  { %2373 = vmin.index.xlane.f32.xlu1 %v2132_v58  ;;  %vm2482_vm11 = vcmp.eq.s32.totalorder %v8371_v53, %v2302_v40  ;;  %6785 = vmatprep.mubr.msk.f32.mxu1 %vm2481_vm15, %v11294_v63  ;;  %v4702_v14 = vrot.slane %v2302_v40, %v8610_v27  ;;  %vm11315_vm15 = vcmask 1048512   ;;  %v11318_v40 = vsub.f32 %v11316_v56, %v11317_v62  ;;  %v11329_v15 = vld [vmem:[#allocation17_spill] sm:$0xff]  ;;  %v11332_v56 = vld [vmem:[#allocation19_spill] sm:$0xff] }
 0x201   :  { %6786 = vmatmul.mubr.msk.f32.gmra.mxu1 %vm2482_vm11, %v11294_v63  ;;  %v4698_v61 = vsel %vm4364_vm12, %v4697_v54, %v4693_v17  ;;  %v6629_v54 = vpop.f32.mrf.mxu0 }
 0x202   :  { %v623_v2 = vpop.xlane.xlu0 %622  ;;  %v4703_v16 = vsel %vm4371_vm8, %v4702_v14, %v4698_v61  ;;  %v2012_v14 = vmul.f32 2.0, %v6629_v54  ;;  %v11323_v61 = vld [vmem:[#allocation13_spill] sm:$0xff] }
 0x203   :  { %v626_v20 = vpop.xlane.xlu1 %625  ;;  %v1877_v23 = vadd.f32 %v8800_v45, %v623_v2  ;;  %v1717_v2 = vpop.f32.mrf.mxu0 }
 0x204   :  { %v1878_v42 = vadd.f32 %v8800_v45, %v626_v20 }
 0x205   :  { %v2133_v21 = vsub.f32 %v1877_v23, %v2005_v38 }
 0x206   :  { %v2134_v5 = vsub.f32 %v1878_v42, %v2006_v49  ;;  %v2304_v37 = vpop.xlane.xlu0 %2303  ;;  %v11321_v49 = vsub.f32 %v11319_v29, %v11320_v1 }
 0x207   :  { %v2306_v36 = vpop.xlane.xlu1 %2305  ;;  %v4707_v41 = vrot.slane %v2304_v37, %v8647_v28  ;;  %2375 = vmin.index.xlane.f32.xlu0 %v2133_v21  ;;  %vm2483_vm11 = vcmp.eq.s32.totalorder %v8371_v53, %v2304_v37  ;;  %v11324_v21 = vsub.f32 %v11322_v50, %v11323_v61 }
 0x208   :  { %v4712_v44 = vrot.slane %v2306_v36, %v8652_v13  ;;  %2377 = vmin.index.xlane.f32.xlu1 %v2134_v5  ;;  %vm2484_vm0 = vcmp.eq.s32.totalorder %v8371_v53, %v2306_v36  ;;  %6788 = vmatprep.mubr.msk.f32.mxu1 %vm2483_vm11, %v11294_v63  ;;  %v6632_v36 = vpop.f32.mrf.mxu0 }
 0x209   :  { %v4708_v24 = vsel %vm4378_vm9, %v4707_v41, %v4703_v16  ;;  %6789 = vmatmul.mubr.msk.f32.gmra.mxu1 %vm2484_vm0, %v11294_v63  ;;  %v11325_v41 = vld [vmem:[#allocation14_spill] sm:$0xff]  ;;  %v11326_v16 = vld [vmem:[#allocation15_spill] sm:$0xff] }
 0x20a   :  { %v4713_v30 = vsel %vm11315_vm15, %v4712_v44, %v4708_v24  ;;  %v629_v51 = vpop.xlane.xlu0 %628  ;;  %v2011_v44 = vmul.f32 2.0, %v1717_v2  ;;  %v11327_v34 = vsub.f32 %v11325_v41, %v11326_v16 }
 0x20b   :  { %v632_v25 = vpop.xlane.xlu1 %631  ;;  %4715 = vst [vmem:[#allocation2 + $0x4] ss:$8 sm:$0x1] %v4713_v30  ;;  %v1879_v3 = vadd.f32 %v8800_v45, %v629_v51  ;;  %v2014_v51 = vmul.f32 2.0, %v6632_v36 }
 0x20c   :  { %v1880_v43 = vadd.f32 %v8800_v45, %v632_v25 }
 0x20d   :  { %v2135_v12 = vsub.f32 %v1879_v3, %v2007_v52 }
 0x20e   :  { %v2136_v11 = vsub.f32 %v1880_v43, %v2008_v19  ;;  %v8969_v10 = vpop.xlane.xlu0 %2307  ;;  %v1727_v43 = vpop.f32.mrf.mxu0 }
 0x20f   :  { %v8967_v32 = vpop.xlane.xlu1 %2309  ;;  %2379 = vmin.index.xlane.f32.xlu0 %v2135_v12  ;;  %vm2485_vm5 = vcmp.eq.s32.totalorder %v8371_v53, %v8969_v10  ;;  %v2013_v52 = vmul.f32 2.0, %v1727_v43  ;;  %v11328_v12 = vld [vmem:[#allocation16_spill] sm:$0xff] }
 0x210   :  { %2381 = vmin.index.xlane.f32.xlu1 %v2136_v11  ;;  %vm2486_vm4 = vcmp.eq.s32.totalorder %v8371_v53, %v8967_v32  ;;  %6791 = vmatprep.mubr.msk.f32.mxu1 %vm2485_vm5, %v11294_v63 }
 0x211   :  { %6792 = vmatmul.mubr.msk.f32.gmra.mxu1 %vm2486_vm4, %v11294_v63 }
 0x212   :  { %v635_v6 = vpop.xlane.xlu0 %634 }
 0x213   :  { %v638_v33 = vpop.xlane.xlu1 %637  ;;  %v1881_v60 = vadd.f32 %v8800_v45, %v635_v6  ;;  %2147 = vmin.index.xlane.f32.xlu0 %v11321_v49  ;;  %v11331_v6 = vld [vmem:[#allocation18_spill] sm:$0xff] }
 0x214   :  { %v1882_v58 = vadd.f32 %v8800_v45, %v638_v33  ;;  %2149 = vmin.index.xlane.f32.xlu1 %v11318_v40  ;;  %v11330_v33 = vsub.f32 %v11328_v12, %v11329_v15  ;;  %v11333_v62 = vsub.f32 %v11331_v6, %v11332_v56  ;;  %v4724_v40 = vrot.slane %v8967_v32, %v8477_v31 }
 0x215   :  { %v2137_v38 = vsub.f32 %v1881_v60, %v2009_v55  ;;  %v4720_v55 = vrot.slane %v8969_v10, %v8474_v59 }
 0x216   :  { %v2138_v35 = vsub.f32 %v1882_v58, %v2010_v47  ;;  %v2312_v42 = vpop.xlane.xlu0 %2311  ;;  %v6635_v47 = vpop.f32.mrf.mxu0 }
 0x217   :  { %v8985_v20 = vpop.xlane.xlu1 %2313  ;;  %2383 = vmin.index.xlane.f32.xlu0 %v2137_v38  ;;  %vm2487_vm11 = vcmp.eq.s32.totalorder %v8371_v53, %v2312_v42  ;;  %v4729_v29 = vrot.slane %v2312_v42, %v8484_v48  ;;  %v4725_v38 = vsel %vm4287_vm13, %v4724_v40, %v4720_v55  ;;  %v2016_v2 = vmul.f32 2.0, %v6635_v47 }
 0x218   :  { %2385 = vmin.index.xlane.f32.xlu1 %v2138_v35  ;;  %vm2488_vm0 = vcmp.eq.s32.totalorder %v8371_v53, %v8985_v20  ;;  %6794 = vmatprep.mubr.msk.f32.mxu1 %vm2487_vm11, %v11294_v63  ;;  %v1737_v54 = vpop.f32.mrf.mxu0  ;;  %v4734_v32 = vrot.slane %v8985_v20, %v8497_v8  ;;  %vm11334_vm11 = vcmask 261120  }
 0x219   :  { %6795 = vmatmul.mubr.msk.f32.gmra.mxu1 %vm2488_vm0, %v11294_v63  ;;  %v4730_v42 = vsel %vm4294_vm14, %v4729_v29, %v4725_v38 }
 0x21a   :  { %v641_v5 = vpop.xlane.xlu0 %640  ;;  %v6638_v20 = vpop.f32.mrf.mxu0 }
 0x21b   :  { %v644_v23 = vpop.xlane.xlu1 %643  ;;  %v1883_v37 = vadd.f32 %v8800_v45, %v641_v5  ;;  %2151 = vmin.index.xlane.f32.xlu0 %v11327_v34 }
 0x21c   :  { %v1884_v17 = vadd.f32 %v8800_v45, %v644_v23  ;;  %2153 = vmin.index.xlane.f32.xlu1 %v11324_v21 }
 0x21d   :  { %v2139_v25 = vsub.f32 %v1883_v37, %v2011_v44  ;;  %v4735_v44 = vsel %vm4301_vm2, %v4734_v32, %v4730_v42 }
 0x21e   :  { %v2140_v24 = vsub.f32 %v1884_v17, %v2012_v14  ;;  %v2316_v30 = vpop.xlane.xlu0 %2315  ;;  %v2015_v14 = vmul.f32 2.0, %v1737_v54 }
 0x21f   :  { %v9000_v19 = vpop.xlane.xlu1 %2317  ;;  %2387 = vmin.index.xlane.f32.xlu0 %v2139_v25  ;;  %vm2489_vm4 = vcmp.eq.s32.totalorder %v8371_v53, %v2316_v30  ;;  %v4739_v23 = vrot.slane %v2316_v30, %v8515_v0  ;;  %v1747_v30 = vpop.f32.mrf.mxu0 }
 0x220   :  { %2389 = vmin.index.xlane.f32.xlu1 %v2140_v24  ;;  %vm2490_vm15 = vcmp.eq.s32.totalorder %v8371_v53, %v9000_v19  ;;  %6797 = vmatprep.mubr.msk.f32.mxu1 %vm2489_vm4, %v11294_v63  ;;  %v4744_v36 = vrot.slane %v9000_v19, %v8523_v22  ;;  %vm11336_vm4 = vmmov %vm11334_vm11  ;;  %v2017_v15 = vmul.f32 2.0, %v1747_v30 }
 0x221   :  { %6798 = vmatmul.mubr.msk.f32.gmra.mxu1 %vm2490_vm15, %v11294_v63  ;;  %vm11335_vm15 = vmmov %vm11334_vm11  ;;  %v4740_v16 = vsel %vm4308_vm3, %v4739_v23, %v4735_v44 }
 0x222   :  { %v647_v4 = vpop.xlane.xlu0 %646 }
 0x223   :  { %v650_v3 = vpop.xlane.xlu1 %649  ;;  %v1885_v58 = vadd.f32 %v8800_v45, %v647_v4  ;;  %2155 = vmin.index.xlane.f32.xlu0 %v11333_v62 }
 0x224   :  { %v1886_v11 = vadd.f32 %v8800_v45, %v650_v3  ;;  %2157 = vmin.index.xlane.f32.xlu1 %v11330_v33  ;;  %v2018_v3 = vmul.f32 2.0, %v6638_v20 }
 0x225   :  { %v2141_v1 = vsub.f32 %v1885_v58, %v2013_v52  ;;  %v4745_v52 = vsel %vm4315_vm6, %v4744_v36, %v4740_v16 }
 0x226   :  { %v2142_v60 = vsub.f32 %v1886_v11, %v2014_v51  ;;  %v2320_v35 = vpop.xlane.xlu0 %2319 }
 0x227   :  { %v2322_v49 = vpop.xlane.xlu1 %2321  ;;  %2391 = vmin.index.xlane.f32.xlu0 %v2141_v1  ;;  %vm2491_vm0 = vcmp.eq.s32.totalorder %v8371_v53, %v2320_v35  ;;  %v4749_v34 = vrot.slane %v2320_v35, %v8507_v26 }
 0x228   :  { %2393 = vmin.index.xlane.f32.xlu1 %v2142_v60  ;;  %vm2492_vm5 = vcmp.eq.s32.totalorder %v8371_v53, %v2322_v49  ;;  %6800 = vmatprep.mubr.msk.f32.mxu1 %vm2491_vm0, %v11294_v63  ;;  %vm11337_vm0 = vmmov %vm11336_vm4  ;;  %v4754_v51 = vrot.slane %v2322_v49, %v8538_v57 }
 0x229   :  { %6801 = vmatmul.mubr.msk.f32.gmra.mxu1 %vm2492_vm5, %v11294_v63  ;;  %v4750_v4 = vsel %vm4322_vm7, %v4749_v34, %v4745_v52 }
 0x22a   :  { %v9026_v10 = vpop.f32.mrf.mxu1  ;;  %v653_v50 = vpop.xlane.xlu0 %652  ;;  %v4755_v40 = vsel %vm4329_vm10, %v4754_v51, %v4750_v4 }
 0x22b   :  { %3517 = vst.msk [vmem:[%s11132_s4 + $0x38] sm:$0xff] %vm11334_vm11, %v9026_v10  ;;  %v656_v17 = vpop.xlane.xlu1 %655  ;;  %v1887_v21 = vadd.f32 %v8800_v45, %v653_v50 }
 0x22c   :  { %v1888_v5 = vadd.f32 %v8800_v45, %v656_v17  ;;  %v9037_v61 = vpop.f32.mrf.mxu1 }
 0x22d   :  { %3516 = vst.msk [vmem:[%s11132_s4 + $0x30] sm:$0xff] %vm11335_vm15, %v9037_v61  ;;  %v2143_v24 = vsub.f32 %v1887_v21, %v2015_v14  ;;  %vm11338_vm15 = vmmov %vm11337_vm0 }
 0x22e   :  { %v2144_v37 = vsub.f32 %v1888_v5, %v2016_v2  ;;  %v9048_v41 = vpop.f32.mrf.mxu1  ;;  %v2324_v43 = vpop.xlane.xlu0 %2323 }
 0x22f   :  { %3519 = vst.msk [vmem:[%s11132_s4 + $0x48] sm:$0xff] %vm11336_vm4, %v9048_v41  ;;  %v2326_v25 = vpop.xlane.xlu1 %2325  ;;  %2395 = vmin.index.xlane.f32.xlu0 %v2143_v24  ;;  %vm2493_vm11 = vcmp.eq.s32.totalorder %v8371_v53, %v2324_v43  ;;  %v4759_v12 = vrot.slane %v2324_v43, %v8555_v9  ;;  %vm11339_vm4 = vmmov %vm11337_vm0 }
 0x230   :  { %v9057_v19 = vpop.f32.mrf.mxu1  ;;  %2397 = vmin.index.xlane.f32.xlu1 %v2144_v37  ;;  %vm2494_vm5 = vcmp.eq.s32.totalorder %v8371_v53, %v2326_v25  ;;  %6803 = vmatprep.mubr.msk.f32.mxu1 %vm2493_vm11, %v11294_v63  ;;  %v4764_v62 = vrot.slane %v2326_v25, %v8558_v18 }
 0x231   :  { %3518 = vst.msk [vmem:[%s11132_s4 + $0x40] sm:$0xff] %vm11337_vm0, %v9057_v19  ;;  %6804 = vmatmul.mubr.msk.f32.gmra.mxu1 %vm2494_vm5, %v11294_v63  ;;  %vm11340_vm5 = vcmask 589312  }
 0x232   :  { %v9069_v11 = vpop.f32.mrf.mxu1  ;;  %v659_v58 = vpop.xlane.xlu0 %658  ;;  %v4760_v29 = vsel %vm11340_vm5, %v4759_v12, %v4755_v40  ;;  %vm11342_vm5 = vcmask 720512  }
 0x233   :  { %3521 = vst.msk [vmem:[%s11132_s4 + $0x58] sm:$0xff] %vm11338_vm15, %v9069_v11  ;;  %v662_v33 = vpop.xlane.xlu1 %661  ;;  %v1889_v56 = vadd.f32 %v8800_v45, %v659_v58  ;;  %vm11341_vm15 = vmmov %vm11337_vm0  ;;  %v4765_v32 = vsel %vm11220_vm1, %v4764_v62, %v4760_v29 }
 0x234   :  { %v1890_v47 = vadd.f32 %v8800_v45, %v662_v33  ;;  %v9080_v6 = vpop.f32.mrf.mxu1 }
 0x235   :  { %3520 = vst.msk [vmem:[%s11132_s4 + $0x50] sm:$0xff] %vm11339_vm4, %v9080_v6  ;;  %v2145_v1 = vsub.f32 %v1889_v56, %v2017_v15 }
 0x236   :  { %v2146_v55 = vsub.f32 %v1890_v47, %v2018_v3  ;;  %v9090_v60 = vpop.f32.mrf.mxu1  ;;  %v2328_v49 = vpop.xlane.xlu0 %2327 }
 0x237   :  { %3523 = vst.msk [vmem:[%s11132_s4 + $0x68] sm:$0xff] %vm11337_vm0, %v9090_v60  ;;  %v2330_v45 = vpop.xlane.xlu1 %2329  ;;  %v4769_v54 = vrot.slane %v2328_v49, %v8599_v39  ;;  %2399 = vmin.index.xlane.f32.xlu0 %v2145_v1  ;;  %vm2495_vm4 = vcmp.eq.s32.totalorder %v8371_v53, %v2328_v49 }
 0x238   :  { %v9098_v35 = vpop.f32.mrf.mxu1  ;;  %2401 = vmin.index.xlane.f32.xlu1 %v2146_v55  ;;  %vm2496_vm11 = vcmp.eq.s32.totalorder %v8371_v53, %v2330_v45  ;;  %v4774_v38 = vrot.slane %v2330_v45, %v8602_v7  ;;  %6806 = vmatprep.mubr.msk.f32.mxu1 %vm2495_vm4, %v11294_v63  ;;  %vm11343_vm4 = vmmov %vm11337_vm0 }
 0x239   :  { %3522 = vst.msk [vmem:[%s11132_s4 + $0x60] sm:$0xff] %vm11341_vm15, %v9098_v35  ;;  %v4770_v42 = vsel %vm11342_vm5, %v4769_v54, %v4765_v32  ;;  %6807 = vmatmul.mubr.msk.f32.gmra.mxu1 %vm2496_vm11, %v11294_v63  ;;  %vm11345_vm11 = vmmov %vm11343_vm4 }
 0x23a   :  { %v9111_v2 = vpop.f32.mrf.mxu1  ;;  %v2332_v14 = vpop.xlane.xlu0 %2331 }
 0x23b   :  { %3525 = vst.msk [vmem:[%s11132_s4 + $0x78] sm:$0xff] %vm11337_vm0, %v9111_v2  ;;  %v2334_v23 = vpop.xlane.xlu1 %2333  ;;  %v4779_v20 = vrot.slane %v2332_v14, %v8607_v46  ;;  %vm2497_vm5 = vcmp.eq.s32.totalorder %v8371_v53, %v2332_v14  ;;  %vm11344_vm0 = vcmask 786112  }
 0x23c   :  { %v9120_v17 = vpop.f32.mrf.mxu1  ;;  %vm2498_vm15 = vcmp.eq.s32.totalorder %v8371_v53, %v2334_v23  ;;  %v4784_v5 = vrot.slane %v2334_v23, %v8610_v27  ;;  %v4775_v50 = vsel %vm11344_vm0, %v4774_v38, %v4770_v42  ;;  %6809 = vmatprep.mubr.msk.f32.mxu1 %vm2497_vm5, %v11294_v63  ;;  %vm11346_vm5 = vmmov %vm11345_vm11 }
 0x23d   :  { %3524 = vst.msk [vmem:[%s11132_s4 + $0x70] sm:$0xff] %vm11343_vm4, %v9120_v17  ;;  %v4780_v36 = vsel %vm4364_vm12, %v4779_v20, %v4775_v50  ;;  %6810 = vmatmul.mubr.msk.f32.gmra.mxu1 %vm2498_vm15, %v11294_v63  ;;  %vm11347_vm15 = vmmov %vm11346_vm5 }
 0x23e   :  { %v9133_v21 = vpop.f32.mrf.mxu1  ;;  %v2336_v16 = vpop.xlane.xlu0 %2335  ;;  %v4785_v25 = vsel %vm4371_vm8, %v4784_v5, %v4780_v36 }
 0x23f   :  { %3527 = vst.msk [vmem:[%s11132_s4 + $0x88] sm:$0xff] %vm11345_vm11, %v9133_v21  ;;  %v2338_v44 = vpop.xlane.xlu1 %2337  ;;  %v4789_v24 = vrot.slane %v2336_v16, %v8647_v28  ;;  %vm2499_vm0 = vcmp.eq.s32.totalorder %v8371_v53, %v2336_v16  ;;  %vm11348_vm11 = vcmask 1048512  }
 0x240   :  { %v4794_v37 = vrot.slane %v2338_v44, %v8652_v13  ;;  %v9143_v34 = vpop.f32.mrf.mxu1  ;;  %vm2500_vm4 = vcmp.eq.s32.totalorder %v8371_v53, %v2338_v44  ;;  %6812 = vmatprep.mubr.msk.f32.mxu1 %vm2499_vm0, %v11294_v63  ;;  %vm11349_vm0 = vmmov %vm11347_vm15 }
 0x241   :  { %3526 = vst.msk [vmem:[%s11132_s4 + $0x80] sm:$0xff] %vm11346_vm5, %v9143_v34  ;;  %v4790_v43 = vsel %vm4378_vm9, %v4789_v24, %v4785_v25  ;;  %6813 = vmatmul.mubr.msk.f32.gmra.mxu1 %vm2500_vm4, %v11294_v63 }
 0x242   :  { %v9155_v30 = vpop.f32.mrf.mxu1  ;;  %v4795_v52 = vsel %vm11348_vm11, %v4794_v37, %v4790_v43  ;;  %v9167_v3 = vpop.xlane.xlu0 %2339 }
 0x243   :  { %3529 = vst.msk [vmem:[%s11132_s4 + $0x98] sm:$0xff] %vm11347_vm15, %v9155_v30  ;;  %v9164_v51 = vpop.xlane.xlu1 %2341  ;;  %4797 = vst [vmem:[#allocation2 + $0x5] ss:$8 sm:$0x1] %v4795_v52  ;;  %vm2501_vm4 = vcmp.eq.s32.totalorder %v8371_v53, %v9167_v3 }
 0x244   :  { %v9169_v4 = vpop.f32.mrf.mxu1  ;;  %vm2502_vm5 = vcmp.eq.s32.totalorder %v8371_v53, %v9164_v51  ;;  %6815 = vmatprep.mubr.msk.f32.mxu1 %vm2501_vm4, %v11294_v63  ;;  %vm11350_vm15 = vmmov %vm11349_vm0  ;;  %v4806_v52 = vrot.slane %v9164_v51, %v8477_v31 }
 0x245   :  { %3528 = vst.msk [vmem:[%s11132_s4 + $0x90] sm:$0xff] %vm11349_vm0, %v9169_v4  ;;  %6816 = vmatmul.mubr.msk.f32.gmra.mxu1 %vm2502_vm5, %v11294_v63  ;;  %vm11351_vm5 = vmmov %vm11349_vm0 }
 0x246   :  { %v9181_v12 = vpop.f32.mrf.mxu1  ;;  %v9191_v33 = vpop.xlane.xlu0 %2343 }
 0x247   :  { %3531 = vst.msk [vmem:[%s11132_s4 + $0xa8] sm:$0xff] %vm11350_vm15, %v9181_v12  ;;  %v9189_v15 = vpop.xlane.xlu1 %2345  ;;  %vm2503_vm4 = vcmp.eq.s32.totalorder %v8371_v53, %v9191_v33 }
 0x248   :  { %v9193_v47 = vpop.f32.mrf.mxu1  ;;  %vm2504_vm11 = vcmp.eq.s32.totalorder %v8371_v53, %v9189_v15  ;;  %6818 = vmatprep.mubr.msk.f32.mxu1 %vm2503_vm4, %v11294_v63 }
 0x249   :  { %3530 = vst.msk [vmem:[%s11132_s4 + $0xa0] sm:$0xff] %vm11349_vm0, %v9193_v47  ;;  %6819 = vmatmul.mubr.msk.f32.gmra.mxu1 %vm2504_vm11, %v11294_v63  ;;  %vm11352_vm11 = vmmov %vm11349_vm0 }
 0x24a   :  { %v9205_v58 = vpop.f32.mrf.mxu1  ;;  %v9215_v62 = vpop.xlane.xlu0 %2347 }
 0x24b   :  { %3533 = vst.msk [vmem:[%s11132_s4 + $0xb8] sm:$0xff] %vm11351_vm5, %v9205_v58  ;;  %v9213_v56 = vpop.xlane.xlu1 %2349  ;;  %vm2505_vm4 = vcmp.eq.s32.totalorder %v8371_v53, %v9215_v62 }
 0x24c   :  { %v9217_v40 = vpop.f32.mrf.mxu1  ;;  %vm2506_vm15 = vcmp.eq.s32.totalorder %v8371_v53, %v9213_v56  ;;  %6821 = vmatprep.mubr.msk.f32.mxu1 %vm2505_vm4, %v11294_v63 }
 0x24d   :  { %3532 = vst.msk [vmem:[%s11132_s4 + $0xb0] sm:$0xff] %vm11349_vm0, %v9217_v40  ;;  %6822 = vmatmul.mubr.msk.f32.gmra.mxu1 %vm2506_vm15, %v11294_v63  ;;  %vm11353_vm15 = vmmov %vm11349_vm0 }
 0x24e   :  { %v9229_v55 = vpop.f32.mrf.mxu1  ;;  %v9239_v1 = vpop.xlane.xlu0 %2351 }
 0x24f   :  { %3535 = vst.msk [vmem:[%s11132_s4 + $0xc8] sm:$0xff] %vm11352_vm11, %v9229_v55  ;;  %v9237_v29 = vpop.xlane.xlu1 %2353  ;;  %vm2507_vm4 = vcmp.eq.s32.totalorder %v8371_v53, %v9239_v1 }
 0x250   :  { %v9241_v45 = vpop.f32.mrf.mxu1  ;;  %vm2508_vm5 = vcmp.eq.s32.totalorder %v8371_v53, %v9237_v29  ;;  %6824 = vmatprep.mubr.msk.f32.mxu1 %vm2507_vm4, %v11294_v63 }
 0x251   :  { %3534 = vst.msk [vmem:[%s11132_s4 + $0xc0] sm:$0xff] %vm11349_vm0, %v9241_v45  ;;  %6825 = vmatmul.mubr.msk.f32.gmra.mxu1 %vm2508_vm5, %v11294_v63  ;;  %vm11354_vm5 = vmmov %vm11349_vm0 }
 0x252   :  { %v9253_v49 = vpop.f32.mrf.mxu1  ;;  %v9263_v38 = vpop.xlane.xlu0 %2355 }
 0x253   :  { %3537 = vst.msk [vmem:[%s11132_s4 + $0xd8] sm:$0xff] %vm11353_vm15, %v9253_v49  ;;  %v9261_v54 = vpop.xlane.xlu1 %2357  ;;  %vm2509_vm4 = vcmp.eq.s32.totalorder %v8371_v53, %v9263_v38 }
 0x254   :  { %v9265_v32 = vpop.f32.mrf.mxu1  ;;  %vm2510_vm11 = vcmp.eq.s32.totalorder %v8371_v53, %v9261_v54  ;;  %6827 = vmatprep.mubr.msk.f32.mxu1 %vm2509_vm4, %v11294_v63 }
 0x255   :  { %3536 = vst.msk [vmem:[%s11132_s4 + $0xd0] sm:$0xff] %vm11349_vm0, %v9265_v32  ;;  %6828 = vmatmul.mubr.msk.f32.gmra.mxu1 %vm2510_vm11, %v11294_v63  ;;  %vm11355_vm11 = vmmov %vm11349_vm0 }
 0x256   :  { %v9277_v42 = vpop.f32.mrf.mxu1  ;;  %v9287_v14 = vpop.xlane.xlu0 %2359 }
 0x257   :  { %3539 = vst.msk [vmem:[%s11132_s4 + $0xe8] sm:$0xff] %vm11354_vm5, %v9277_v42  ;;  %v9285_v23 = vpop.xlane.xlu1 %2361  ;;  %vm2511_vm4 = vcmp.eq.s32.totalorder %v8371_v53, %v9287_v14  ;;  %vm11356_vm5 = vmmov %vm11349_vm0 }
 0x258   :  { %v9289_v20 = vpop.f32.mrf.mxu1  ;;  %vm2512_vm15 = vcmp.eq.s32.totalorder %v8371_v53, %v9285_v23  ;;  %6830 = vmatprep.mubr.msk.f32.mxu1 %vm2511_vm4, %v11294_v63  ;;  %vm11358_vm4 = vmmov %vm11356_vm5 }
 0x259   :  { %3538 = vst.msk [vmem:[%s11132_s4 + $0xe0] sm:$0xff] %vm11349_vm0, %v9289_v20  ;;  %6831 = vmatmul.mubr.msk.f32.gmra.mxu1 %vm2512_vm15, %v11294_v63  ;;  %vm11360_vm15 = vmmov %vm11358_vm4 }
 0x25a   :  { %v9301_v5 = vpop.f32.mrf.mxu1  ;;  %v9309_v50 = vpop.xlane.xlu0 %2363 }
 0x25b   :  { %3541 = vst.msk [vmem:[%s11132_s4 + $0xf8] sm:$0xff] %vm11355_vm11, %v9301_v5  ;;  %vm2513_vm0 = vcmp.eq.s32.totalorder %v8371_v53, %v9309_v50  ;;  %vm11362_vm11 = vmmov %vm11358_vm4 }
 0x25c   :  { %v9311_v36 = vpop.f32.mrf.mxu1  ;;  %6833 = vmatprep.mubr.msk.f32.mxu1 %vm2513_vm0, %v11294_v63  ;;  %vm11366_vm0 = vmmov %vm11358_vm4 }
 0x25d   :  { %3540 = vst.msk [vmem:[%s11132_s4 + $0xf0] sm:$0xff] %vm11356_vm5, %v9311_v36  ;;  %vm11364_vm5 = vmmov %vm11358_vm4 }
 0x25e   :  { %v9321_v44 = vpop.f32.mrf.mxu1 }
 0x25f   :  { %11357 = vst [vmem:[#allocation23_spill] sm:$0xff] %v9321_v44  ;;  %3543 = vst.msk [vmem:[%s11132_s4 + $0x108] sm:$0xff] %vm11358_vm4, %v9321_v44 }
 0x260   :  { %v9328_v37 = vpop.f32.mrf.mxu1  ;;  %vm11368_vm4 = vmmov %vm11366_vm0 }
 0x261   :  { %11359 = vst [vmem:[#allocation24_spill] sm:$0xff] %v9328_v37  ;;  %3542 = vst.msk [vmem:[%s11132_s4 + $0x100] sm:$0xff] %vm11360_vm15, %v9328_v37  ;;  %v4811_v37 = vrot.slane %v9191_v33, %v8484_v48 }
 0x262   :  { %v9335_v16 = vpop.f32.mrf.mxu1  ;;  %vm11370_vm15 = vmmov %vm11366_vm0 }
 0x263   :  { %11361 = vst [vmem:[#allocation25_spill] sm:$0xff] %v9335_v16  ;;  %3545 = vst.msk [vmem:[%s11132_s4 + $0x118] sm:$0xff] %vm11362_vm11, %v9335_v16 }
 0x264   :  { %v9342_v24 = vpop.f32.mrf.mxu1  ;;  %vm11371_vm11 = vmmov %vm11366_vm0 }
 0x265   :  { %11363 = vst [vmem:[#allocation26_spill] sm:$0xff] %v9342_v24  ;;  %3544 = vst.msk [vmem:[%s11132_s4 + $0x110] sm:$0xff] %vm11364_vm5, %v9342_v24  ;;  %v4802_v24 = vrot.slane %v9167_v3, %v8474_v59  ;;  %v4816_v3 = vrot.slane %v9189_v15, %v8497_v8  ;;  %v4826_v15 = vrot.slane %v9213_v56, %v8523_v22 }
 0x266   :  { %v9349_v25 = vpop.f32.mrf.mxu1  ;;  %vm11372_vm5 = vmmov %vm11366_vm0  ;;  %v4836_v56 = vrot.slane %v9237_v29, %v8538_v57 }
 0x267   :  { %11365 = vst [vmem:[#allocation27_spill] sm:$0xff] %v9349_v25  ;;  %3547 = vst.msk [vmem:[%s11132_s4 + $0x128] sm:$0xff] %vm11366_vm0, %v9349_v25  ;;  %v4807_v51 = vsel %vm4287_vm13, %v4806_v52, %v4802_v24  ;;  %v4831_v52 = vrot.slane %v9239_v1, %v8507_v26 }
 0x268   :  { %v9356_v43 = vpop.f32.mrf.mxu1 }
 0x269   :  { %11367 = vst [vmem:[#allocation8_spill] sm:$0xff] %v9356_v43  ;;  %3546 = vst.msk [vmem:[%s11132_s4 + $0x120] sm:$0xff] %vm11368_vm4, %v9356_v43  ;;  %v4812_v43 = vsel %vm4294_vm14, %v4811_v37, %v4807_v51 }
 0x26a   :  { %v9367_v16 = vpop.f32.mrf.mxu1  ;;  %v4817_v37 = vsel %vm4301_vm2, %v4816_v3, %v4812_v43  ;;  %vm11375_vm4 = vmmov %vm11366_vm0  ;;  %v4841_v3 = vrot.slane %v9263_v38, %v8555_v9 }
 0x26b   :  { %11369 = vst [vmem:[#allocation9_spill] sm:$0xff] %v9367_v16  ;;  %3549 = vst.msk [vmem:[%s11132_s4 + $0x138] sm:$0xff] %vm11370_vm15, %v9367_v16  ;;  %v4821_v16 = vrot.slane %v9215_v62, %v8515_v0 }
 0x26c   :  { %v9376_v25 = vpop.f32.mrf.mxu1  ;;  %vm11377_vm15 = vmmov %vm11366_vm0 }
 0x26d   :  { %3548 = vst.msk [vmem:[%s11132_s4 + $0x130] sm:$0xff] %vm11371_vm11, %v9376_v25  ;;  %v4822_v24 = vsel %vm4308_vm3, %v4821_v16, %v4817_v37  ;;  %vm11379_vm11 = vmmov %vm11366_vm0 }
 0x26e   :  { %v9386_v33 = vpop.f32.mrf.mxu1  ;;  %v4827_v16 = vsel %vm4315_vm6, %v4826_v15, %v4822_v24  ;;  %v4846_v15 = vrot.slane %v9261_v54, %v8558_v18 }
 0x26f   :  { %3551 = vst.msk [vmem:[%s11132_s4 + $0x148] sm:$0xff] %vm11372_vm5, %v9386_v33  ;;  %v4832_v43 = vsel %vm4322_vm7, %v4831_v52, %v4827_v16  ;;  %vm11381_vm5 = vmmov %vm11366_vm0  ;;  %v4851_v16 = vrot.slane %v9287_v14, %v8599_v39 }
 0x270   :  { %v9396_v44 = vpop.f32.mrf.mxu1  ;;  %v4837_v38 = vsel %vm4329_vm10, %v4836_v56, %v4832_v43  ;;  %v4856_v56 = vrot.slane %v9285_v23, %v8602_v7 }
 0x271   :  { %11373 = vst [vmem:[#allocation10_spill] sm:$0xff] %v9396_v44  ;;  %3550 = vst.msk [vmem:[%s11132_s4 + $0x140] sm:$0xff] %vm11366_vm0, %v9396_v44 }
 0x272   :  { %v9406_v62 = vpop.f32.mrf.mxu1 }
 0x273   :  { %11374 = vst [vmem:[#allocation11_spill] sm:$0xff] %v9406_v62  ;;  %3553 = vst.msk [vmem:[%s11132_s4 + $0x158] sm:$0xff] %vm11375_vm4, %v9406_v62  ;;  %vm11383_vm4 = vcmask 589312  }
 0x274   :  { %v9416_v51 = vpop.f32.mrf.mxu1  ;;  %v4842_v52 = vsel %vm11383_vm4, %v4841_v3, %v4837_v38  ;;  %v4861_v38 = vrot.slane %v9309_v50, %v8607_v46 }
 0x275   :  { %11376 = vst [vmem:[#allocation12_spill] sm:$0xff] %v9416_v51  ;;  %3552 = vst.msk [vmem:[%s11132_s4 + $0x150] sm:$0xff] %vm11377_vm15, %v9416_v51  ;;  %v4847_v14 = vsel %vm11220_vm1, %v4846_v15, %v4842_v52 }
 0x276   :  { %v9426_v1 = vpop.f32.mrf.mxu1  ;;  %vm11384_vm15 = vmmov %vm11381_vm5 }
 0x277   :  { %11378 = vst [vmem:[#allocation13_spill] sm:$0xff] %v9426_v1  ;;  %3555 = vst.msk [vmem:[%s11132_s4 + $0x168] sm:$0xff] %vm11379_vm11, %v9426_v1 }
 0x278   :  { %v9436_v37 = vpop.f32.mrf.mxu1  ;;  %vm11386_vm11 = vmmov %vm11381_vm5 }
 0x279   :  { %11380 = vst [vmem:[#allocation14_spill] sm:$0xff] %v9436_v37  ;;  %3554 = vst.msk [vmem:[%s11132_s4 + $0x160] sm:$0xff] %vm11381_vm5, %v9436_v37  ;;  %v2366_v29 = vpop.xlane.xlu1 %2365  ;;  %vm11388_vm5 = vcmask 720512  }
 0x27a   :  { %v9446_v24 = vpop.f32.mrf.mxu1  ;;  %vm2514_vm0 = vcmp.eq.s32.totalorder %v8371_v53, %v2366_v29  ;;  %v4852_v3 = vsel %vm11388_vm5, %v4851_v16, %v4847_v14 }
 0x27b   :  { %11382 = vst [vmem:[#allocation15_spill] sm:$0xff] %v9446_v24  ;;  %3557 = vst.msk [vmem:[%s11132_s4 + $0x178] sm:$0xff] %vm11384_vm15, %v9446_v24  ;;  %6834 = vmatmul.mubr.msk.f32.gmra.mxu1 %vm2514_vm0, %v11294_v63  ;;  %vm11392_vm15 = vcmask 786112  }
 0x27c   :  { %v9458_v54 = vpop.f32.mrf.mxu1  ;;  %vm11389_vm0 = vmmov %vm11386_vm11  ;;  %v4857_v15 = vsel %vm11392_vm15, %v4856_v56, %v4852_v3  ;;  %vm11396_vm15 = vcmask 1048512  }
 0x27d   :  { %11385 = vst [vmem:[#allocation16_spill] sm:$0xff] %v9458_v54  ;;  %3556 = vst.msk [vmem:[%s11132_s4 + $0x170] sm:$0xff] %vm11386_vm11, %v9458_v54  ;;  %v4866_v54 = vrot.slane %v2366_v29, %v8610_v27  ;;  %v4862_v29 = vsel %vm4364_vm12, %v4861_v38, %v4857_v15 }
 0x27e   :  { %v9468_v43 = vpop.f32.mrf.mxu1  ;;  %vm11391_vm4 = vmmov %vm11389_vm0 }
 0x27f   :  { %11387 = vst [vmem:[#allocation17_spill] sm:$0xff] %v9468_v43  ;;  %3559 = vst.msk [vmem:[%s11132_s4 + $0x188] sm:$0xff] %vm11389_vm0, %v9468_v43  ;;  %v4867_v56 = vsel %vm4371_vm8, %v4866_v54, %v4862_v29 }
 0x280   :  { %v9479_v24 = vpop.f32.mrf.mxu1  ;;  %v2368_v50 = vpop.xlane.xlu0 %2367  ;;  %vm11394_vm5 = vmmov %vm11389_vm0 }
 0x281   :  { %11390 = vst [vmem:[#allocation18_spill] sm:$0xff] %v9479_v24  ;;  %3558 = vst.msk [vmem:[%s11132_s4 + $0x180] sm:$0xff] %vm11391_vm4, %v9479_v24  ;;  %v2370_v23 = vpop.xlane.xlu1 %2369  ;;  %v4871_v14 = vrot.slane %v2368_v50, %v8647_v28  ;;  %vm2515_vm0 = vcmp.eq.s32.totalorder %v8371_v53, %v2368_v50 }
 0x282   :  { %v4876_v52 = vrot.slane %v2370_v23, %v8652_v13  ;;  %v9488_v16 = vpop.f32.mrf.mxu1  ;;  %vm2516_vm11 = vcmp.eq.s32.totalorder %v8371_v53, %v2370_v23  ;;  %6836 = vmatprep.mubr.msk.f32.mxu1 %vm2515_vm0, %v11294_v63  ;;  %vm11400_vm0 = vmmov %vm11391_vm4 }
 0x283   :  { %11393 = vst [vmem:[#allocation19_spill] sm:$0xff] %v9488_v16  ;;  %3561 = vst.msk [vmem:[%s11132_s4 + $0x198] sm:$0xff] %vm11394_vm5, %v9488_v16  ;;  %v4872_v23 = vsel %vm4378_vm9, %v4871_v14, %v4867_v56  ;;  %6837 = vmatmul.mubr.msk.f32.gmra.mxu1 %vm2516_vm11, %v11294_v63 }
 0x284   :  { %v9501_v3 = vpop.f32.mrf.mxu1  ;;  %v4877_v38 = vsel %vm11396_vm15, %v4876_v52, %v4872_v23  ;;  %vm11398_vm5 = vmmov %vm11391_vm4 }
 0x285   :  { %11395 = vst [vmem:[#allocation45_spill] sm:$0xff] %v9501_v3  ;;  %3560 = vst.msk [vmem:[%s11132_s4 + $0x190] sm:$0xff] %vm11391_vm4, %v9501_v3 }
 0x286   :  { %v9511_v15 = vpop.f32.mrf.mxu1  ;;  %4879 = vst [vmem:[#allocation2 + $0x6] ss:$8 sm:$0x1] %v4877_v38  ;;  %vm11402_vm15 = vmmov %vm11400_vm0 }
 0x287   :  { %11397 = vst [vmem:[#allocation46_spill] sm:$0xff] %v9511_v15  ;;  %3563 = vst.msk [vmem:[%s11132_s4 + $0x1a8] sm:$0xff] %vm11398_vm5, %v9511_v15 }
 0x288   :  { %v9518_v54 = vpop.f32.mrf.mxu1  ;;  %v9527_v52 = vpop.xlane.xlu0 %2371  ;;  %vm11404_vm5 = vmmov %vm11400_vm0 }
 0x289   :  { %11399 = vst [vmem:[#allocation47_spill] sm:$0xff] %v9518_v54  ;;  %3562 = vst.msk [vmem:[%s11132_s4 + $0x1a0] sm:$0xff] %vm11400_vm0, %v9518_v54  ;;  %v9525_v50 = vpop.xlane.xlu1 %2373  ;;  %vm2517_vm4 = vcmp.eq.s32.totalorder %v8371_v53, %v9527_v52  ;;  %v4884_v51 = vrot.slane %v9527_v52, %v8474_v59 }
 0x28a   :  { %vm2518_vm11 = vcmp.eq.s32.totalorder %v8371_v53, %v9525_v50  ;;  %6839 = vmatprep.mubr.msk.f32.mxu1 %vm2517_vm4, %v11294_v63  ;;  %vm11406_vm4 = vmmov %vm11404_vm5 }
 0x28b   :  { %6840 = vmatmul.mubr.msk.f32.gmra.mxu1 %vm2518_vm11, %v11294_v63 }
 0x28d   :  { %v9535_v29 = vpop.f32.mrf.mxu1 }
 0x28e   :  { %11401 = vst [vmem:[#allocation48_spill] sm:$0xff] %v9535_v29  ;;  %3565 = vst.msk [vmem:[%s11132_s4 + $0x1b8] sm:$0xff] %vm11402_vm15, %v9535_v29 }
 0x28f   :  { %v9542_v14 = vpop.f32.mrf.mxu1  ;;  %vm11408_vm15 = vmmov %vm11406_vm4 }
 0x290   :  { %11403 = vst [vmem:[#allocation49_spill] sm:$0xff] %v9542_v14  ;;  %3564 = vst.msk [vmem:[%s11132_s4 + $0x1b0] sm:$0xff] %vm11404_vm5, %v9542_v14  ;;  %v9551_v23 = vpop.xlane.xlu0 %2375 }
 0x291   :  { %v9544_v56 = vpop.xlane.xlu1 %2377  ;;  %v9555_v38 = vpop.f32.mrf.mxu1  ;;  %vm2519_vm11 = vcmp.eq.s32.totalorder %v8371_v53, %v9551_v23  ;;  %vm11410_vm5 = vmmov %vm11406_vm4 }
 0x292   :  { %vm2520_vm0 = vcmp.eq.s32.totalorder %v8371_v53, %v9544_v56  ;;  %11405 = vst [vmem:[#allocation50_spill] sm:$0xff] %v9555_v38  ;;  %3567 = vst.msk [vmem:[%s11132_s4 + $0x1c8] sm:$0xff] %vm11406_vm4, %v9555_v38  ;;  %6842 = vmatprep.mubr.msk.f32.mxu1 %vm2519_vm11, %v11294_v63 }
 0x293   :  { %v9565_v29 = vpop.f32.mrf.mxu1  ;;  %6843 = vmatmul.mubr.msk.f32.gmra.mxu1 %vm2520_vm0, %v11294_v63  ;;  %vm11412_vm0 = vmmov %vm11406_vm4 }
 0x294   :  { %11407 = vst [vmem:[#allocation51_spill] sm:$0xff] %v9565_v29  ;;  %3566 = vst.msk [vmem:[%s11132_s4 + $0x1c0] sm:$0xff] %vm11408_vm15, %v9565_v29 }
 0x295   :  { %v9573_v14 = vpop.f32.mrf.mxu1  ;;  %vm11414_vm15 = vmmov %vm11412_vm0 }
 0x296   :  { %11409 = vst [vmem:[#allocation52_spill] sm:$0xff] %v9573_v14  ;;  %3569 = vst.msk [vmem:[%s11132_s4 + $0x1d8] sm:$0xff] %vm11410_vm5, %v9573_v14 }
 0x297   :  { %v9580_v38 = vpop.f32.mrf.mxu1  ;;  %vm11416_vm5 = vmmov %vm11412_vm0 }
 0x298   :  { %11411 = vst [vmem:[#allocation53_spill] sm:$0xff] %v9580_v38  ;;  %3568 = vst.msk [vmem:[%s11132_s4 + $0x1d0] sm:$0xff] %vm11412_vm0, %v9580_v38  ;;  %v9589_v15 = vpop.xlane.xlu0 %2379 }
 0x299   :  { %v9582_v54 = vpop.xlane.xlu1 %2381  ;;  %v9593_v29 = vpop.f32.mrf.mxu1  ;;  %vm2521_vm4 = vcmp.eq.s32.totalorder %v8371_v53, %v9589_v15 }
 0x29a   :  { %vm2522_vm11 = vcmp.eq.s32.totalorder %v8371_v53, %v9582_v54  ;;  %11413 = vst [vmem:[#allocation54_spill] sm:$0xff] %v9593_v29  ;;  %3571 = vst.msk [vmem:[%s11132_s4 + $0x1e8] sm:$0xff] %vm11414_vm15, %v9593_v29  ;;  %6845 = vmatprep.mubr.msk.f32.mxu1 %vm2521_vm4, %v11294_v63 }
 0x29b   :  { %v9603_v14 = vpop.f32.mrf.mxu1  ;;  %6846 = vmatmul.mubr.msk.f32.gmra.mxu1 %vm2522_vm11, %v11294_v63  ;;  %vm11418_vm4 = vmmov %vm11416_vm5 }
 0x29c   :  { %11415 = vst [vmem:[#allocation55_spill] sm:$0xff] %v9603_v14  ;;  %3570 = vst.msk [vmem:[%s11132_s4 + $0x1e0] sm:$0xff] %vm11416_vm5, %v9603_v14  ;;  %v2148_v3 = vpop.xlane.xlu0 %2147 }
 0x29d   :  { %v2150_v38 = vpop.xlane.xlu1 %2149  ;;  %v9612_v16 = vpop.f32.mrf.mxu1  ;;  %vm2405_vm15 = vcmp.eq.s32.totalorder %v8371_v53, %v2148_v3  ;;  %vm11420_vm11 = vmmov %vm11418_vm4  ;;  %v4281_v44 = vrot.slane %v2148_v3, %v8474_v59 }
 0x29e   :  { %vm2406_vm0 = vcmp.eq.s32.totalorder %v8371_v53, %v2150_v38  ;;  %11417 = vst [vmem:[#allocation56_spill] sm:$0xff] %v9612_v16  ;;  %3573 = vst.msk [vmem:[%s11132_s4 + $0x1f8] sm:$0xff] %vm11418_vm4, %v9612_v16  ;;  %6671 = vmatprep.mubr.msk.f32.mxu0 %vm2405_vm15, %v11294_v63  ;;  %v4286_v62 = vrot.slane %v2150_v38, %v8477_v31 }
 0x29f   :  { %6672 = vmatmul.mubr.msk.f32.vlgmr.msra.gmra.mxu0 %vm2406_vm0, %v11294_v63  ;;  %v9622_v29 = vpop.f32.mrf.mxu1  ;;  %vm11422_vm15 = vmmov %vm11418_vm4 }
 0x2a0   :  { %11419 = vst [vmem:[#allocation57_spill] sm:$0xff] %v9622_v29  ;;  %3572 = vst.msk [vmem:[%s11132_s4 + $0x1f0] sm:$0xff] %vm11420_vm11, %v9622_v29  ;;  %v9633_v24 = vpop.xlane.xlu0 %2383 }
 0x2a1   :  { %v9624_v14 = vpop.xlane.xlu1 %2385  ;;  %v9635_v16 = vpop.f32.mrf.mxu1  ;;  %vm2523_vm0 = vcmp.eq.s32.totalorder %v8371_v53, %v9633_v24 }
 0x2a2   :  { %vm2524_vm5 = vcmp.eq.s32.totalorder %v8371_v53, %v9624_v14  ;;  %11421 = vst [vmem:[#allocation58_spill] sm:$0xff] %v9635_v16  ;;  %3575 = vst.msk [vmem:[%s11132_s4 + $0x208] sm:$0xff] %vm11422_vm15, %v9635_v16  ;;  %6848 = vmatprep.mubr.msk.f32.mxu1 %vm2523_vm0, %v11294_v63  ;;  %v4888_v16 = vrot.slane %v9525_v50, %v8477_v31  ;;  %v4898_v31 = vrot.slane %v9544_v56, %v8497_v8 }
 0x2a3   :  { %v9645_v43 = vpop.f32.mrf.mxu1  ;;  %6849 = vmatmul.mubr.msk.f32.gmra.mxu1 %vm2524_vm5, %v11294_v63  ;;  %vm11424_vm5 = vmmov %vm11418_vm4 }
 0x2a4   :  { %11423 = vst [vmem:[#allocation59_spill] sm:$0xff] %v9645_v43  ;;  %3574 = vst.msk [vmem:[%s11132_s4 + $0x200] sm:$0xff] %vm11418_vm4, %v9645_v43  ;;  %v2152_v37 = vpop.xlane.xlu0 %2151  ;;  %v4893_v43 = vrot.slane %v9551_v23, %v8484_v48 }
 0x2a5   :  { %v2154_v29 = vpop.xlane.xlu1 %2153  ;;  %v9654_v1 = vpop.f32.mrf.mxu1  ;;  %vm2407_vm15 = vcmp.eq.s32.totalorder %v8371_v53, %v2152_v37  ;;  %v4293_v50 = vrot.slane %v2152_v37, %v8484_v48  ;;  %vm11426_vm0 = vmmov %vm11418_vm4  ;;  %v4889_v37 = vsel %vm4287_vm13, %v4888_v16, %v4884_v51  ;;  %v4288_v48 = vsel %vm4287_vm13, %v4286_v62, %v4281_v44 }
 0x2a6   :  { %vm2408_vm11 = vcmp.eq.s32.totalorder %v8371_v53, %v2154_v29  ;;  %3577 = vst.msk [vmem:[%s11132_s4 + $0x218] sm:$0xff] %vm11424_vm5, %v9654_v1  ;;  %6674 = vmatprep.mubr.msk.f32.mxu0 %vm2407_vm15, %v11294_v63  ;;  %v4300_v59 = vrot.slane %v2154_v29, %v8497_v8  ;;  %vm11427_vm15 = vmmov %vm11426_vm0  ;;  %v4903_v51 = vrot.slane %v9589_v15, %v8515_v0 }
 0x2a7   :  { %6675 = vmatmul.mubr.msk.f32.gmra.mxu0 %vm2408_vm11, %v11294_v63  ;;  %v9673_v52 = vpop.f32.mrf.mxu1  ;;  %v4295_v16 = vsel %vm4294_vm14, %v4293_v50, %v4288_v48  ;;  %vm11428_vm5 = vmmov %vm11426_vm0  ;;  %v4908_v50 = vrot.slane %v9582_v54, %v8523_v22 }
 0x2a8   :  { %11425 = vst [vmem:[#allocation60_spill] sm:$0xff] %v9673_v52  ;;  %3576 = vst.msk [vmem:[%s11132_s4 + $0x210] sm:$0xff] %vm11426_vm0, %v9673_v52  ;;  %v9684_v3 = vpop.xlane.xlu0 %2387  ;;  %v4894_v52 = vsel %vm4294_vm14, %v4893_v43, %v4889_v37  ;;  %v4302_v37 = vsel %vm4301_vm2, %v4300_v59, %v4295_v16  ;;  %v11431_v16 = vld [vmem:[#allocation29_spill] sm:$0xff] }
 0x2a9   :  { %v9675_v38 = vpop.xlane.xlu1 %2389  ;;  %v9686_v23 = vpop.f32.mrf.mxu1  ;;  %vm2525_vm11 = vcmp.eq.s32.totalorder %v8371_v53, %v9684_v3  ;;  %v4899_v48 = vsel %vm4301_vm2, %v4898_v31, %v4894_v52  ;;  %v4913_v31 = vrot.slane %v9633_v24, %v8507_v26  ;;  %v11433_v24 = vld [vmem:[#allocation30_spill] sm:$0xff] }
 0x2aa   :  { %vm2526_vm4 = vcmp.eq.s32.totalorder %v8371_v53, %v9675_v38  ;;  %3579 = vst.msk [vmem:[%s11132_s4 + $0x228] sm:$0xff] %vm11427_vm15, %v9686_v23  ;;  %6851 = vmatprep.mubr.msk.f32.mxu1 %vm2525_vm11, %v11294_v63 }
 0x2ab   :  { %v9705_v56 = vpop.f32.mrf.mxu1  ;;  %6852 = vmatmul.mubr.msk.f32.gmra.mxu1 %vm2526_vm4, %v11294_v63  ;;  %vm11429_vm4 = vmmov %vm11428_vm5 }
 0x2ac   :  { %3578 = vst.msk [vmem:[%s11132_s4 + $0x220] sm:$0xff] %vm11428_vm5, %v9705_v56  ;;  %v2156_v43 = vpop.xlane.xlu0 %2155  ;;  %vm11432_vm15 = vmmov %vm11429_vm4 }
 0x2ad   :  { %v2158_v44 = vpop.xlane.xlu1 %2157  ;;  %v4307_v15 = vrot.slane %v2156_v43, %v8515_v0  ;;  %v9716_v29 = vpop.f32.mrf.mxu1  ;;  %vm2409_vm11 = vcmp.eq.s32.totalorder %v8371_v53, %v2156_v43  ;;  %v4904_v43 = vsel %vm4308_vm3, %v4903_v51, %v4899_v48 }
 0x2ae   :  { %vm2410_vm0 = vcmp.eq.s32.totalorder %v8371_v53, %v2158_v44  ;;  %v4314_v62 = vrot.slane %v2158_v44, %v8523_v22  ;;  %3581 = vst.msk [vmem:[%s11132_s4 + $0x238] sm:$0xff] %vm11429_vm4, %v9716_v29  ;;  %6677 = vmatprep.mubr.msk.f32.mxu0 %vm2409_vm11, %v11294_v63  ;;  %v11430_v44 = vld [vmem:[#allocation28_spill] sm:$0xff]  ;;  %v4328_v22 = vrot.slane %v11431_v16, %v8538_v57  ;;  %vm11436_vm11 = vmmov %vm11429_vm4  ;;  %vm11438_vm4 = vcmask 589312  }
 0x2af   :  { %v4321_v0 = vrot.slane %v11430_v44, %v8507_v26  ;;  %v4309_v54 = vsel %vm4308_vm3, %v4307_v15, %v4302_v37  ;;  %6678 = vmatmul.mubr.msk.f32.gmra.mxu0 %vm2410_vm0, %v11294_v63  ;;  %v9736_v59 = vpop.f32.mrf.mxu1  ;;  %v4335_v15 = vrot.slane %v11433_v24, %v8555_v9  ;;  %v4909_v16 = vsel %vm4315_vm6, %v4908_v50, %v4904_v43 }
 0x2b0   :  { %v4316_v8 = vsel %vm4315_vm6, %v4314_v62, %v4309_v54  ;;  %3580 = vst.msk [vmem:[%s11132_s4 + $0x230] sm:$0xff] %vm11432_vm15, %v9736_v59  ;;  %v2392_v51 = vpop.xlane.xlu0 %2391  ;;  %v11435_v62 = vld [vmem:[#allocation31_spill] sm:$0xff]  ;;  %v4918_v54 = vrot.slane %v9624_v14, %v8538_v57  ;;  %v4914_v24 = vsel %vm4322_vm7, %v4913_v31, %v4909_v16  ;;  %v4923_v14 = vrot.slane %v9684_v3, %v8555_v9  ;;  %vm11441_vm15 = vmmov %vm11436_vm11  ;;  %v11442_v3 = vld [vmem:[#allocation34_spill] sm:$0xff] }
 0x2b1   :  { %v2394_v52 = vpop.xlane.xlu1 %2393  ;;  %v4323_v48 = vsel %vm4322_vm7, %v4321_v0, %v4316_v8  ;;  %v9750_v37 = vpop.f32.mrf.mxu1  ;;  %vm2527_vm0 = vcmp.eq.s32.totalorder %v8371_v53, %v2392_v51  ;;  %v4342_v44 = vrot.slane %v11435_v62, %v8558_v18  ;;  %v11437_v8 = vld [vmem:[#allocation32_spill] sm:$0xff] }
 0x2b2   :  { %vm2528_vm5 = vcmp.eq.s32.totalorder %v8371_v53, %v2394_v52  ;;  %11434 = vst [vmem:[#allocation28_spill] sm:$0xff] %v9750_v37  ;;  %v4330_v26 = vsel %vm4329_vm10, %v4328_v22, %v4323_v48  ;;  %3583 = vst.msk [vmem:[%s11132_s4 + $0x248] sm:$0xff] %vm11436_vm11, %v9750_v37  ;;  %6854 = vmatprep.mubr.msk.f32.mxu1 %vm2527_vm0, %v11294_v63  ;;  %v4349_v0 = vrot.slane %v11437_v8, %v8599_v39  ;;  %v11440_v22 = vld [vmem:[#allocation33_spill] sm:$0xff]  ;;  %vm11443_vm0 = vcmask 720512  }
 0x2b3   :  { %v4337_v50 = vsel %vm11438_vm4, %v4335_v15, %v4330_v26  ;;  %v9771_v43 = vpop.f32.mrf.mxu1  ;;  %6855 = vmatmul.mubr.msk.f32.gmra.mxu1 %vm2528_vm5, %v11294_v63  ;;  %v4356_v48 = vrot.slane %v11440_v22, %v8602_v7  ;;  %v4363_v26 = vrot.slane %v11442_v3, %v8607_v46  ;;  %v11444_v15 = vld [vmem:[#allocation21_spill] sm:$0xff]  ;;  %v4928_v8 = vrot.slane %v9675_v38, %v8558_v18  ;;  %vm11447_vm11 = vmmov %vm11438_vm4 }
 0x2b4   :  { %11439 = vst [vmem:[#allocation29_spill] sm:$0xff] %v9771_v43  ;;  %v4344_v62 = vsel %vm11220_vm1, %v4342_v44, %v4337_v50  ;;  %3582 = vst.msk [vmem:[%s11132_s4 + $0x240] sm:$0xff] %vm11441_vm15, %v9771_v43  ;;  %v4370_v16 = vrot.slane %v11444_v15, %v8610_v27  ;;  %v4919_v22 = vsel %vm4329_vm10, %v4918_v54, %v4914_v24  ;;  %vm11445_vm5 = vcmask 786112   ;;  %v11446_v50 = vld [vmem:[#allocation20_spill] sm:$0xff] }
 0x2b5   :  { %v4351_v31 = vsel %vm11443_vm0, %v4349_v0, %v4344_v62  ;;  %v4377_v9 = vrot.slane %v11446_v50, %v8647_v28  ;;  %v4924_v57 = vsel %vm11447_vm11, %v4923_v14, %v4919_v22  ;;  %v4933_v3 = vrot.slane %v2392_v51, %v8599_v39  ;;  %v11448_v62 = vld [vmem:[#allocation35_spill] sm:$0xff] }
 0x2b6   :  { %v4358_v44 = vsel %vm11445_vm5, %v4356_v48, %v4351_v31  ;;  %v4384_v15 = vrot.slane %v11448_v62, %v8652_v13  ;;  %v4929_v14 = vsel %vm11220_vm1, %v4928_v8, %v4924_v57  ;;  %v4938_v48 = vrot.slane %v2394_v52, %v8602_v7 }
 0x2b7   :  { %v4365_v43 = vsel %vm4364_vm12, %v4363_v26, %v4358_v44  ;;  %vm11449_vm0 = vcmask 261120   ;;  %vm11450_vm5 = vcmask 1048512   ;;  %vm11451_vm11 = vcmask 720512  }
 0x2b8   :  { %v2396_v37 = vpop.xlane.xlu0 %2395  ;;  %v4372_v38 = vsel %vm4371_vm8, %v4370_v16, %v4365_v43  ;;  %v4934_v43 = vsel %vm11451_vm11, %v4933_v3, %v4929_v14  ;;  %vm11452_vm1 = vmmov %vm11449_vm0 }
 0x2b9   :  { %v2398_v0 = vpop.xlane.xlu1 %2397  ;;  %v9802_v54 = vpop.f32.mrf.mxu1  ;;  %vm2529_vm15 = vcmp.eq.s32.totalorder %v8371_v53, %v2396_v37  ;;  %v4379_v24 = vsel %vm4378_vm9, %v4377_v9, %v4372_v38  ;;  %v4943_v26 = vrot.slane %v2396_v37, %v8607_v46  ;;  %vm11454_vm11 = vmmov %vm11452_vm1 }
 0x2ba   :  { %vm2530_vm4 = vcmp.eq.s32.totalorder %v8371_v53, %v2398_v0  ;;  %3585 = vst.msk [vmem:[%s11132_s4 + $0x258] sm:$0xff] %vm11449_vm0, %v9802_v54  ;;  %6857 = vmatprep.mubr.msk.f32.mxu1 %vm2529_vm15, %v11294_v63  ;;  %v4386_v51 = vsel %vm11450_vm5, %v4384_v15, %v4379_v24  ;;  %vm11453_vm0 = vcmask 786112   ;;  %v4948_v9 = vrot.slane %v2398_v0, %v8610_v27 }
 0x2bb   :  { %v9817_v31 = vpop.f32.mrf.mxu1  ;;  %6858 = vmatmul.mubr.msk.f32.gmra.mxu1 %vm2530_vm4, %v11294_v63  ;;  %4387 = vst [vmem:[#allocation2] ss:$8 sm:$0x1] %v4386_v51  ;;  %v4939_v57 = vsel %vm11453_vm0, %v4938_v48, %v4934_v43  ;;  %vm11455_vm0 = vmmov %vm11452_vm1 }
 0x2bc   :  { %3584 = vst.msk [vmem:[%s11132_s4 + $0x250] sm:$0xff] %vm11452_vm1, %v9817_v31  ;;  %v4944_v52 = vsel %vm4364_vm12, %v4943_v26, %v4939_v57 }
 0x2bd   :  { %v4949_v50 = vsel %vm4371_vm8, %v4948_v9, %v4944_v52 }
 0x2c0   :  { %v2400_v8 = vpop.xlane.xlu0 %2399 }
 0x2c1   :  { %v2402_v16 = vpop.xlane.xlu1 %2401  ;;  %v4953_v22 = vrot.slane %v2400_v8, %v8647_v28  ;;  %v9831_v44 = vpop.f32.mrf.mxu1  ;;  %vm2531_vm4 = vcmp.eq.s32.totalorder %v8371_v53, %v2400_v8 }
 0x2c2   :  { %vm2532_vm15 = vcmp.eq.s32.totalorder %v8371_v53, %v2402_v16  ;;  %v4958_v37 = vrot.slane %v2402_v16, %v8652_v13  ;;  %3587 = vst.msk [vmem:[%s11132_s4 + $0x268] sm:$0xff] %vm11452_vm1, %v9831_v44  ;;  %6860 = vmatprep.mubr.msk.f32.mxu1 %vm2531_vm4, %v11294_v63  ;;  %vm11457_vm4 = vmmov %vm11455_vm0 }
 0x2c3   :  { %v4954_v3 = vsel %vm4378_vm9, %v4953_v22, %v4949_v50  ;;  %v9842_v0 = vpop.f32.mrf.mxu1  ;;  %6861 = vmatmul.mubr.msk.f32.gmra.mxu1 %vm2532_vm15, %v11294_v63  ;;  %vm11456_vm15 = vmmov %vm11455_vm0 }
 0x2c4   :  { %v4959_v62 = vsel %vm11450_vm5, %v4958_v37, %v4954_v3  ;;  %3586 = vst.msk [vmem:[%s11132_s4 + $0x260] sm:$0xff] %vm11454_vm11, %v9842_v0  ;;  %vm11458_vm1 = vmmov %vm11455_vm0 }
 0x2c5   :  { %4961 = vst [vmem:[#allocation2 + $0x7] ss:$8 sm:$0x1] %v4959_v62  ;;  %vm11459_vm5 = vmmov %vm11455_vm0 }
 0x2c6   :  { %vm11460_vm11 = vmmov %vm11455_vm0 }
 0x2c9   :  { %v9851_v53 = vpop.f32.mrf.mxu1 }
 0x2ca   :  { %3589 = vst.msk [vmem:[%s11132_s4 + $0x278] sm:$0xff] %vm11455_vm0, %v9851_v53 }
 0x2cb   :  { %v9858_v15 = vpop.f32.mrf.mxu1 }
 0x2cc   :  { %3588 = vst.msk [vmem:[%s11132_s4 + $0x270] sm:$0xff] %vm11456_vm15, %v9858_v15  ;;  %vm11461_vm15 = vmmov %vm11455_vm0 }
 0x2d1   :  { %v9865_v63 = vpop.f32.mrf.mxu1 }
 0x2d2   :  { %3591 = vst.msk [vmem:[%s11132_s4 + $0x288] sm:$0xff] %vm11457_vm4, %v9865_v63  ;;  %vm11462_vm4 = vmmov %vm11455_vm0 }
 0x2d3   :  { %v9872_v38 = vpop.f32.mrf.mxu1 }
 0x2d4   :  { %3590 = vst.msk [vmem:[%s11132_s4 + $0x280] sm:$0xff] %vm11458_vm1, %v9872_v38  ;;  %vm11463_vm1 = vmmov %vm11455_vm0 }
 0x2d9   :  { %v9879_v24 = vpop.f32.mrf.mxu1 }
 0x2da   :  { %3593 = vst.msk [vmem:[%s11132_s4 + $0x298] sm:$0xff] %vm11459_vm5, %v9879_v24  ;;  %vm11464_vm5 = vmmov %vm11455_vm0 }
 0x2db   :  { %v9886_v14 = vpop.f32.mrf.mxu1 }
 0x2dc   :  { %3592 = vst.msk [vmem:[%s11132_s4 + $0x290] sm:$0xff] %vm11460_vm11, %v9886_v14  ;;  %vm11466_vm11 = vmmov %vm11455_vm0 }
 0x2e1   :  { %v9893_v48 = vpop.f32.mrf.mxu1 }
 0x2e2   :  { %3595 = vst.msk [vmem:[%s11132_s4 + $0x2a8] sm:$0xff] %vm11455_vm0, %v9893_v48 }
 0x2e3   :  { %v9900_v51 = vpop.f32.mrf.mxu1 }
 0x2e4   :  { %3594 = vst.msk [vmem:[%s11132_s4 + $0x2a0] sm:$0xff] %vm11461_vm15, %v9900_v51  ;;  %vm11469_vm15 = vmmov %vm11455_vm0 }
 0x2e9   :  { %v9907_v43 = vpop.f32.mrf.mxu1 }
 0x2ea   :  { %3597 = vst.msk [vmem:[%s11132_s4 + $0x2b8] sm:$0xff] %vm11462_vm4, %v9907_v43  ;;  %vm11471_vm4 = vmmov %vm11455_vm0 }
 0x2eb   :  { %v9914_v26 = vpop.f32.mrf.mxu1 }
 0x2ec   :  { %3596 = vst.msk [vmem:[%s11132_s4 + $0x2b0] sm:$0xff] %vm11463_vm1, %v9914_v26  ;;  %vm11473_vm1 = vmmov %vm11455_vm0 }
 0x2f1   :  { %v9921_v57 = vpop.f32.mrf.mxu1 }
 0x2f2   :  { %3599 = vst.msk [vmem:[%s11132_s4 + $0x2c8] sm:$0xff] %vm11464_vm5, %v9921_v57  ;;  %vm11475_vm5 = vmmov %vm11455_vm0 }
 0x2f3   :  { %v9928_v9 = vpop.f32.mrf.mxu1 }
 0x2f4   :  { %11465 = vst [vmem:[#allocation30_spill] sm:$0xff] %v9928_v9  ;;  %3598 = vst.msk [vmem:[%s11132_s4 + $0x2c0] sm:$0xff] %vm11466_vm11, %v9928_v9 }
 0x2f5   :  { %vm11477_vm11 = vmmov %vm11455_vm0 }
 0x2f9   :  { %v9935_v52 = vpop.f32.mrf.mxu1 }
 0x2fa   :  { %11467 = vst [vmem:[#allocation31_spill] sm:$0xff] %v9935_v52  ;;  %3601 = vst.msk [vmem:[%s11132_s4 + $0x2d8] sm:$0xff] %vm11455_vm0, %v9935_v52 }
 0x2fb   :  { %v9942_v16 = vpop.f32.mrf.mxu1 }
 0x2fc   :  { %11468 = vst [vmem:[#allocation32_spill] sm:$0xff] %v9942_v16  ;;  %3600 = vst.msk [vmem:[%s11132_s4 + $0x2d0] sm:$0xff] %vm11469_vm15, %v9942_v16 }
 0x2fd   :  { %v9949_v8 = vpop.f32.mrf.mxu1  ;;  %vm11480_vm15 = vmmov %vm11455_vm0 }
 0x2fe   :  { %11470 = vst [vmem:[#allocation33_spill] sm:$0xff] %v9949_v8  ;;  %3603 = vst.msk [vmem:[%s11132_s4 + $0x2e8] sm:$0xff] %vm11471_vm4, %v9949_v8 }
 0x2ff   :  { %v9956_v37 = vpop.f32.mrf.mxu1  ;;  %vm11482_vm4 = vmmov %vm11455_vm0 }
 0x300   :  { %11472 = vst [vmem:[#allocation34_spill] sm:$0xff] %v9956_v37  ;;  %3602 = vst.msk [vmem:[%s11132_s4 + $0x2e0] sm:$0xff] %vm11473_vm1, %v9956_v37 }
 0x301   :  { %v9963_v22 = vpop.f32.mrf.mxu1  ;;  %vm11484_vm1 = vmmov %vm11455_vm0 }
 0x302   :  { %11474 = vst [vmem:[#allocation21_spill] sm:$0xff] %v9963_v22  ;;  %3605 = vst.msk [vmem:[%s11132_s4 + $0x2f8] sm:$0xff] %vm11475_vm5, %v9963_v22 }
 0x303   :  { %v9970_v50 = vpop.f32.mrf.mxu1  ;;  %vm11486_vm5 = vmmov %vm11455_vm0 }
 0x304   :  { %11476 = vst [vmem:[#allocation20_spill] sm:$0xff] %v9970_v50  ;;  %3604 = vst.msk [vmem:[%s11132_s4 + $0x2f0] sm:$0xff] %vm11477_vm11, %v9970_v50 }
 0x305   :  { %v9977_v3 = vpop.f32.mrf.mxu1  ;;  %vm11488_vm11 = vmmov %vm11455_vm0 }
 0x306   :  { %11478 = vst [vmem:[#allocation35_spill] sm:$0xff] %v9977_v3  ;;  %3607 = vst.msk [vmem:[%s11132_s4 + $0x308] sm:$0xff] %vm11455_vm0, %v9977_v3 }
 0x307   :  { %v9984_v62 = vpop.f32.mrf.mxu1 }
 0x308   :  { %11479 = vst [vmem:[#allocation61_spill] sm:$0xff] %v9984_v62  ;;  %3606 = vst.msk [vmem:[%s11132_s4 + $0x300] sm:$0xff] %vm11480_vm15, %v9984_v62 }
 0x309   :  { %v9991_v22 = vpop.f32.mrf.mxu1  ;;  %vm11491_vm15 = vmmov %vm11455_vm0 }
 0x30a   :  { %11481 = vst [vmem:[#allocation62_spill] sm:$0xff] %v9991_v22  ;;  %3609 = vst.msk [vmem:[%s11132_s4 + $0x318] sm:$0xff] %vm11482_vm4, %v9991_v22 }
 0x30b   :  { %v9998_v50 = vpop.f32.mrf.mxu1  ;;  %vm11493_vm4 = vmmov %vm11455_vm0 }
 0x30c   :  { %11483 = vst [vmem:[#allocation63_spill] sm:$0xff] %v9998_v50  ;;  %3608 = vst.msk [vmem:[%s11132_s4 + $0x310] sm:$0xff] %vm11484_vm1, %v9998_v50 }
 0x30d   :  { %v10005_v3 = vpop.f32.mrf.mxu1  ;;  %vm11495_vm1 = vmmov %vm11455_vm0 }
 0x30e   :  { %11485 = vst [vmem:[#allocation64_spill] sm:$0xff] %v10005_v3  ;;  %3611 = vst.msk [vmem:[%s11132_s4 + $0x328] sm:$0xff] %vm11486_vm5, %v10005_v3 }
 0x30f   :  { %v10012_v62 = vpop.f32.mrf.mxu1  ;;  %vm11497_vm5 = vmmov %vm11455_vm0 }
 0x310   :  { %11487 = vst [vmem:[#allocation65_spill] sm:$0xff] %v10012_v62  ;;  %3610 = vst.msk [vmem:[%s11132_s4 + $0x320] sm:$0xff] %vm11488_vm11, %v10012_v62 }
 0x311   :  { %v10019_v22 = vpop.f32.mrf.mxu1  ;;  %vm11499_vm11 = vmmov %vm11455_vm0 }
 0x312   :  { %11489 = vst [vmem:[#allocation66_spill] sm:$0xff] %v10019_v22  ;;  %3613 = vst.msk [vmem:[%s11132_s4 + $0x338] sm:$0xff] %vm11455_vm0, %v10019_v22 }
 0x313   :  { %v10026_v50 = vpop.f32.mrf.mxu1 }
 0x314   :  { %11490 = vst [vmem:[#allocation67_spill] sm:$0xff] %v10026_v50  ;;  %3612 = vst.msk [vmem:[%s11132_s4 + $0x330] sm:$0xff] %vm11491_vm15, %v10026_v50 }
 0x315   :  { %v10033_v3 = vpop.f32.mrf.mxu1  ;;  %vm11502_vm15 = vmmov %vm11455_vm0 }
 0x316   :  { %11492 = vst [vmem:[#allocation68_spill] sm:$0xff] %v10033_v3  ;;  %3615 = vst.msk [vmem:[%s11132_s4 + $0x348] sm:$0xff] %vm11493_vm4, %v10033_v3 }
 0x317   :  { %v10040_v62 = vpop.f32.mrf.mxu1  ;;  %vm11504_vm4 = vmmov %vm11455_vm0 }
 0x318   :  { %11494 = vst [vmem:[#allocation69_spill] sm:$0xff] %v10040_v62  ;;  %3614 = vst.msk [vmem:[%s11132_s4 + $0x340] sm:$0xff] %vm11495_vm1, %v10040_v62 }
 0x319   :  { %v10047_v22 = vpop.f32.mrf.mxu1  ;;  %vm11506_vm1 = vmmov %vm11455_vm0 }
 0x31a   :  { %11496 = vst [vmem:[#allocation70_spill] sm:$0xff] %v10047_v22  ;;  %3617 = vst.msk [vmem:[%s11132_s4 + $0x358] sm:$0xff] %vm11497_vm5, %v10047_v22 }
 0x31b   :  { %v10054_v50 = vpop.f32.mrf.mxu1  ;;  %vm11508_vm5 = vmmov %vm11455_vm0 }
 0x31c   :  { %11498 = vst [vmem:[#allocation71_spill] sm:$0xff] %v10054_v50  ;;  %3616 = vst.msk [vmem:[%s11132_s4 + $0x350] sm:$0xff] %vm11499_vm11, %v10054_v50 }
 0x31d   :  { %vm11510_vm11 = vmmov %vm11455_vm0 }
 0x33b   :  { %v10061_v3 = vpop.f32.mrf.mxu1 }
 0x33c   :  { %11500 = vst [vmem:[#allocation72_spill] sm:$0xff] %v10061_v3  ;;  %3619 = vst.msk [vmem:[%s11132_s4 + $0x368] sm:$0xff] %vm11455_vm0, %v10061_v3 }
 0x33d   :  { %v10068_v62 = vpop.f32.mrf.mxu1 }
 0x33e   :  { %11501 = vst [vmem:[#allocation73_spill] sm:$0xff] %v10068_v62  ;;  %3618 = vst.msk [vmem:[%s11132_s4 + $0x360] sm:$0xff] %vm11502_vm15, %v10068_v62 }
 0x33f   :  { %vm11513_vm15 = vmmov %vm11455_vm0 }
 0x343   :  { %v10075_v22 = vpop.f32.mrf.mxu1 }
 0x344   :  { %11503 = vst [vmem:[#allocation74_spill] sm:$0xff] %v10075_v22  ;;  %3621 = vst.msk [vmem:[%s11132_s4 + $0x378] sm:$0xff] %vm11504_vm4, %v10075_v22 }
 0x345   :  { %v10082_v50 = vpop.f32.mrf.mxu1  ;;  %vm11515_vm4 = vmmov %vm11455_vm0 }
 0x346   :  { %11505 = vst [vmem:[#allocation75_spill] sm:$0xff] %v10082_v50  ;;  %3620 = vst.msk [vmem:[%s11132_s4 + $0x370] sm:$0xff] %vm11506_vm1, %v10082_v50 }
 0x347   :  { %vm11517_vm1 = vmmov %vm11455_vm0 }
 0x34b   :  { %v10089_v3 = vpop.f32.mrf.mxu1 }
 0x34c   :  { %11507 = vst [vmem:[#allocation76_spill] sm:$0xff] %v10089_v3  ;;  %3623 = vst.msk [vmem:[%s11132_s4 + $0x388] sm:$0xff] %vm11508_vm5, %v10089_v3 }
 0x34d   :  { %v10096_v62 = vpop.f32.mrf.mxu1  ;;  %vm11518_vm5 = vmmov %vm11455_vm0 }
 0x34e   :  { %11509 = vst [vmem:[#allocation77_spill] sm:$0xff] %v10096_v62  ;;  %3622 = vst.msk [vmem:[%s11132_s4 + $0x380] sm:$0xff] %vm11510_vm11, %v10096_v62 }
 0x34f   :  { %vm11519_vm11 = vmmov %vm11455_vm0 }
 0x353   :  { %v10103_v22 = vpop.f32.mrf.mxu1 }
 0x354   :  { %11511 = vst [vmem:[#allocation78_spill] sm:$0xff] %v10103_v22  ;;  %3625 = vst.msk [vmem:[%s11132_s4 + $0x398] sm:$0xff] %vm11455_vm0, %v10103_v22 }
 0x355   :  { %v10110_v50 = vpop.f32.mrf.mxu1 }
 0x356   :  { %11512 = vst [vmem:[#allocation79_spill] sm:$0xff] %v10110_v50  ;;  %3624 = vst.msk [vmem:[%s11132_s4 + $0x390] sm:$0xff] %vm11513_vm15, %v10110_v50  ;;  %v6910_v50 = vld [vmem:[%s11128_s0 + $0x8] sm:$0xff] }
 0x357   :  { %vm11521_vm15 = vmmov %vm11455_vm0 }
 0x35b   :  { %v10117_v3 = vpop.f32.mrf.mxu1 }
 0x35c   :  { %11514 = vst [vmem:[#allocation80_spill] sm:$0xff] %v10117_v3  ;;  %3627 = vst.msk [vmem:[%s11132_s4 + $0x3a8] sm:$0xff] %vm11515_vm4, %v10117_v3 }
 0x35d   :  { %v10124_v62 = vpop.f32.mrf.mxu1  ;;  %vm11523_vm4 = vmmov %vm11455_vm0 }
 0x35e   :  { %11516 = vst [vmem:[#allocation81_spill] sm:$0xff] %v10124_v62  ;;  %3626 = vst.msk [vmem:[%s11132_s4 + $0x3a0] sm:$0xff] %vm11517_vm1, %v10124_v62  ;;  %v6911_v62 = vld [vmem:[%s11128_s0] sm:$0xff] }
 0x35f   :  { %v6673_v22 = vpop.f32.mrf.mxu0  ;;  %vm11524_vm1 = vmmov %vm11455_vm0 }
 0x360   :  { %3511 = vst.msk [vmem:[%s11132_s4 + $0x8] sm:$0xff] %vm11518_vm5, %v6673_v22  ;;  %v3639_v37 = vsub.f32 %v6673_v22, %v6910_v50  ;;  %vm11525_vm5 = vmmov %vm11455_vm0 }
 0x361   :  { %v2871_v3 = vpop.f32.mrf.mxu0 }
 0x362   :  { %v3767_v8 = vand.u32 2147483647, %v3639_v37  ;;  %3510 = vst.msk [vmem:[%s11132_s4] sm:$0xff] %vm11519_vm11, %v2871_v3  ;;  %v3638_v16 = vsub.f32 %v2871_v3, %v6911_v62  ;;  %vm11526_vm11 = vmmov %vm11455_vm0 }
 0x363   :  { %v10145_v52 = vpop.f32.mrf.mxu1 }
 0x364   :  { %11520 = vst [vmem:[#allocation82_spill] sm:$0xff] %v10145_v52  ;;  %v3766_v13 = vand.u32 2147483647, %v3638_v16  ;;  %3629 = vst.msk [vmem:[%s11132_s4 + $0x3b8] sm:$0xff] %vm11455_vm0, %v10145_v52  ;;  %v3897_v37 = vsel %vm11521_vm15, %v3767_v8, 0.0  ;;  %v6912_v8 = vld [vmem:[%s11128_s0 + $0x18] sm:$0xff] }
 0x365   :  { %3898 = vadd.xlane.f32.xlu1 %v3897_v37  ;;  %v10153_v22 = vpop.f32.mrf.mxu1  ;;  %vm11528_vm15 = vmmov %vm11455_vm0 }
 0x366   :  { %11522 = vst [vmem:[#allocation83_spill] sm:$0xff] %v10153_v22  ;;  %3628 = vst.msk [vmem:[%s11132_s4 + $0x3b0] sm:$0xff] %vm11523_vm4, %v10153_v22  ;;  %v3894_v50 = vsel %vm11524_vm1, %v3766_v13, 0.0  ;;  %v6913_v13 = vld [vmem:[%s11128_s0 + $0x10] sm:$0xff] }
 0x367   :  { %3895 = vadd.xlane.f32.xlu0 %v3894_v50  ;;  %v6676_v16 = vpop.f32.mrf.mxu0  ;;  %vm11530_vm4 = vmmov %vm11455_vm0 }
 0x368   :  { %3513 = vst.msk [vmem:[%s11132_s4 + $0x18] sm:$0xff] %vm11525_vm5, %v6676_v16  ;;  %v3641_v3 = vsub.f32 %v6676_v16, %v6912_v8  ;;  %vm11531_vm1 = vmmov %vm11455_vm0 }
 0x369   :  { %v2881_v62 = vpop.f32.mrf.mxu0  ;;  %vm11532_vm5 = vmmov %vm11455_vm0 }
 0x36a   :  { %v3769_v37 = vand.u32 2147483647, %v3641_v3  ;;  %3512 = vst.msk [vmem:[%s11132_s4 + $0x10] sm:$0xff] %vm11526_vm11, %v2881_v62  ;;  %v3640_v50 = vsub.f32 %v2881_v62, %v6913_v13  ;;  %v6914_v13 = vld [vmem:[%s11128_s0 + $0x38] sm:$0xff]  ;;  %vm11533_vm11 = vmmov %vm11455_vm0 }
 0x36b   :  { %v10175_v52 = vpop.f32.mrf.mxu1 }
 0x36c   :  { %11527 = vst [vmem:[#allocation84_spill] sm:$0xff] %v10175_v52  ;;  %v3768_v22 = vand.u32 2147483647, %v3640_v50  ;;  %3631 = vst.msk [vmem:[%s11132_s4 + $0x3c8] sm:$0xff] %vm11455_vm0, %v10175_v52  ;;  %v3903_v16 = vsel %vm11528_vm15, %v3769_v37, 0.0  ;;  %v3645_v50 = vsub.f32 %v9026_v10, %v6914_v13  ;;  %v6915_v37 = vld [vmem:[%s11128_s0 + $0x28] sm:$0xff] }
 0x36d   :  { %3904 = vadd.xlane.f32.xlu1 %v3903_v16  ;;  %v10183_v8 = vpop.f32.mrf.mxu1  ;;  %v6917_v10 = vld [vmem:[%s11128_s0 + $0x20] sm:$0xff]  ;;  %vm11535_vm15 = vmmov %vm11455_vm0 }
 0x36e   :  { %11529 = vst [vmem:[#allocation85_spill] sm:$0xff] %v10183_v8  ;;  %3630 = vst.msk [vmem:[%s11132_s4 + $0x3c0] sm:$0xff] %vm11530_vm4, %v10183_v8  ;;  %v3900_v3 = vsel %vm11531_vm1, %v3768_v22, 0.0  ;;  %v6916_v22 = vld [vmem:[%s11128_s0 + $0x30] sm:$0xff] }
 0x36f   :  { %3901 = vadd.xlane.f32.xlu0 %v3900_v3  ;;  %v6679_v62 = vpop.f32.mrf.mxu0  ;;  %v3644_v3 = vsub.f32 %v9037_v61, %v6916_v22  ;;  %vm11536_vm4 = vmmov %vm11455_vm0 }
 0x370   :  { %3515 = vst.msk [vmem:[%s11132_s4 + $0x28] sm:$0xff] %vm11532_vm5, %v6679_v62  ;;  %v3643_v16 = vsub.f32 %v6679_v62, %v6915_v37  ;;  %v3773_v62 = vand.u32 2147483647, %v3645_v50  ;;  %v6918_v37 = vld [vmem:[%s11128_s0 + $0x48] sm:$0xff]  ;;  %v6919_v50 = vld [vmem:[%s11128_s0 + $0x40] sm:$0xff]  ;;  %vm11537_vm1 = vmmov %vm11455_vm0 }
 0x371   :  { %v2891_v52 = vpop.f32.mrf.mxu0  ;;  %v3647_v61 = vsub.f32 %v9048_v41, %v6918_v37  ;;  %v6920_v37 = vld [vmem:[%s11128_s0 + $0x58] sm:$0xff]  ;;  %vm11538_vm5 = vmmov %vm11455_vm0 }
 0x372   :  { %v3771_v8 = vand.u32 2147483647, %v3643_v16  ;;  %3514 = vst.msk [vmem:[%s11132_s4 + $0x20] sm:$0xff] %vm11533_vm11, %v2891_v52  ;;  %v3642_v13 = vsub.f32 %v2891_v52, %v6917_v10  ;;  %v3646_v10 = vsub.f32 %v9057_v19, %v6919_v50  ;;  %v6921_v19 = vld [vmem:[%s11128_s0 + $0x50] sm:$0xff]  ;;  %vm11539_vm11 = vmmov %vm11455_vm0 }
 0x373   :  { %v10213_v9 = vpop.f32.mrf.mxu1 }
 0x374   :  { %11534 = vst [vmem:[#allocation86_spill] sm:$0xff] %v10213_v9  ;;  %v3770_v16 = vand.u32 2147483647, %v3642_v13  ;;  %v3909_v22 = vsel %vm11455_vm0, %v3771_v8, 0.0  ;;  %3633 = vst.msk [vmem:[%s11132_s4 + $0x3d8] sm:$0xff] %vm11535_vm15, %v10213_v9  ;;  %v3915_v9 = vsel %vm11538_vm5, %v3773_v62, 0.0 }
 0x375   :  { %3910 = vadd.xlane.f32.xlu1 %v3909_v22  ;;  %v10225_v52 = vpop.f32.mrf.mxu1  ;;  %v3772_v13 = vand.u32 2147483647, %v3644_v3  ;;  %v3775_v8 = vand.u32 2147483647, %v3647_v61  ;;  %v3649_v22 = vsub.f32 %v9069_v11, %v6920_v37  ;;  %v3648_v3 = vsub.f32 %v9080_v6, %v6921_v19  ;;  %v6922_v11 = vld [vmem:[%s11128_s0 + $0x68] sm:$0xff]  ;;  %vm11540_vm15 = vmmov %vm11455_vm0 }
 0x376   :  { %v3906_v41 = vsel %vm11536_vm4, %v3770_v16, 0.0  ;;  %3632 = vst.msk [vmem:[%s11132_s4 + $0x3d0] sm:$0xff] %vm11537_vm1, %v10225_v52  ;;  %v3774_v50 = vand.u32 2147483647, %v3646_v10  ;;  %v3651_v62 = vsub.f32 %v9090_v60, %v6922_v11  ;;  %v6923_v10 = vld [vmem:[%s11128_s0 + $0x60] sm:$0xff]  ;;  %vm11541_vm4 = vmmov %vm11455_vm0 }
 0x377   :  { %3907 = vadd.xlane.f32.xlu0 %v3906_v41  ;;  %v3912_v16 = vsel %vm11539_vm11, %v3772_v13, 0.0  ;;  %v3777_v41 = vand.u32 2147483647, %v3649_v22  ;;  %v3650_v13 = vsub.f32 %v9098_v35, %v6923_v10  ;;  %v3776_v60 = vand.u32 2147483647, %v3648_v3  ;;  %vm11542_vm1 = vmmov %vm11455_vm0  ;;  %v6924_v22 = vld [vmem:[%s11128_s0 + $0x78] sm:$0xff] }
 0x378   :  { %v3918_v37 = vsel %vm11541_vm4, %v3774_v50, 0.0  ;;  %v3653_v19 = vsub.f32 %v9111_v2, %v6924_v22  ;;  %vm11543_vm5 = vmmov %vm11455_vm0  ;;  %v6925_v35 = vld [vmem:[%s11128_s0 + $0x70] sm:$0xff]  ;;  %v6926_v2 = vld [vmem:[%s11128_s0 + $0x88] sm:$0xff] }
 0x379   :  { %3916 = vadd.xlane.f32.xlu1 %v3915_v9  ;;  %v3921_v9 = vsel %vm11455_vm0, %v3775_v8, 0.0  ;;  %v3779_v8 = vand.u32 2147483647, %v3651_v62  ;;  %v3652_v3 = vsub.f32 %v9120_v17, %v6925_v35  ;;  %vm11544_vm11 = vmmov %vm11455_vm0  ;;  %v3778_v11 = vand.u32 2147483647, %v3650_v13  ;;  %v6927_v13 = vld [vmem:[%s11128_s0 + $0x80] sm:$0xff] }
 0x37a   :  { %v3924_v50 = vsel %vm11544_vm11, %v3776_v60, 0.0  ;;  %vm11546_vm4 = vmmov %vm11455_vm0  ;;  %v6928_v22 = vld [vmem:[%s11128_s0 + $0x98] sm:$0xff]  ;;  %v6929_v35 = vld [vmem:[%s11128_s0 + $0x90] sm:$0xff] }
 0x37b   :  { %3913 = vadd.xlane.f32.xlu0 %v3912_v16  ;;  %v10247_v61 = vpop.f32.mrf.mxu1  ;;  %v3927_v16 = vsel %vm11543_vm5, %v3777_v41, 0.0  ;;  %v3655_v41 = vsub.f32 %v9133_v21, %v6926_v2  ;;  %v3933_v10 = vsel %vm11455_vm0, %v3779_v8, 0.0  ;;  %v3930_v60 = vsel %vm11546_vm4, %v3778_v11, 0.0  ;;  %vm11548_vm5 = vmmov %vm11455_vm0  ;;  %v6930_v2 = vld [vmem:[%s11128_s0 + $0xa8] sm:$0xff] }
 0x37c   :  { %3635 = vst.msk [vmem:[%s11132_s4 + $0x3e8] sm:$0xff] %vm11540_vm15, %v10247_v61  ;;  %vm11545_vm15 = vmmov %vm11455_vm0  ;;  %v3780_v21 = vand.u32 2147483647, %v3652_v3  ;;  %v3656_v3 = vsub.f32 %v9169_v4, %v6929_v35 }
 0x37d   :  { %3922 = vadd.xlane.f32.xlu1 %v3921_v9  ;;  %v10259_v6 = vpop.f32.mrf.mxu1  ;;  %v3781_v9 = vand.u32 2147483647, %v3653_v19  ;;  %v3783_v8 = vand.u32 2147483647, %v3655_v41  ;;  %v3657_v19 = vsub.f32 %v9155_v30, %v6928_v22  ;;  %vm11549_vm11 = vmmov %vm11455_vm0  ;;  %v3659_v30 = vsub.f32 %v9181_v12, %v6930_v2  ;;  %v6933_v22 = vld [vmem:[%s11128_s0 + $0xb0] sm:$0xff] }
 0x37e   :  { %3634 = vst.msk [vmem:[%s11132_s4 + $0x3e0] sm:$0xff] %vm11542_vm1, %v10259_v6  ;;  %vm11547_vm1 = vmmov %vm11455_vm0  ;;  %v3784_v41 = vand.u32 2147483647, %v3656_v3 }
 0x37f   :  { %3919 = vadd.xlane.f32.xlu0 %v3918_v37  ;;  %v3654_v37 = vsub.f32 %v9143_v34, %v6927_v13  ;;  %v3785_v11 = vand.u32 2147483647, %v3657_v19  ;;  %vm11551_vm4 = vmmov %vm11455_vm0 }
 0x381   :  { %3928 = vadd.xlane.f32.xlu1 %v3927_v16  ;;  %v3939_v16 = vsel %vm11548_vm5, %v3781_v9, 0.0  ;;  %v3782_v34 = vand.u32 2147483647, %v3654_v37  ;;  %v3945_v9 = vsel %vm11455_vm0, %v3783_v8, 0.0  ;;  %v3787_v37 = vand.u32 2147483647, %v3659_v30  ;;  %vm11553_vm5 = vmmov %vm11455_vm0 }
 0x382   :  { %v6936_v30 = vld [vmem:[%s11128_s0 + $0xd8] sm:$0xff] }
 0x383   :  { %3925 = vadd.xlane.f32.xlu0 %v3924_v50  ;;  %v10281_v62 = vpop.f32.mrf.mxu1  ;;  %v3936_v50 = vsel %vm11549_vm11, %v3780_v21, 0.0  ;;  %v3951_v21 = vsel %vm11551_vm4, %v3785_v11, 0.0  ;;  %v3957_v35 = vsel %vm11553_vm5, %v3787_v37, 0.0  ;;  %vm11554_vm11 = vmmov %vm11455_vm0  ;;  %v6938_v37 = vld [vmem:[%s11128_s0 + $0xe8] sm:$0xff] }
 0x384   :  { %3637 = vst.msk [vmem:[%s11132_s4 + $0x3f8] sm:$0xff] %vm11545_vm15, %v10281_v62  ;;  %vm11550_vm15 = vmmov %vm11455_vm0 }
 0x385   :  { %3934 = vadd.xlane.f32.xlu1 %v3933_v10  ;;  %v10293_v17 = vpop.f32.mrf.mxu1  ;;  %v6931_v10 = vld [vmem:[%s11128_s0 + $0xa0] sm:$0xff]  ;;  %v3942_v13 = vsel %vm11550_vm15, %v3782_v34, 0.0  ;;  %v6934_v34 = vld [vmem:[%s11128_s0 + $0xc8] sm:$0xff]  ;;  %vm11555_vm15 = vmmov %vm11455_vm0 }
 0x386   :  { %3636 = vst.msk [vmem:[%s11132_s4 + $0x3f0] sm:$0xff] %vm11547_vm1, %v10293_v17  ;;  %v3658_v4 = vsub.f32 %v9193_v47, %v6931_v10  ;;  %v3660_v47 = vsub.f32 %v9217_v40, %v6933_v22  ;;  %vm11552_vm1 = vmmov %vm11455_vm0  ;;  %v6937_v10 = vld [vmem:[%s11128_s0 + $0xd0] sm:$0xff] }
 0x387   :  { %3931 = vadd.xlane.f32.xlu0 %v3930_v60  ;;  %v6932_v60 = vld [vmem:[%s11128_s0 + $0xb8] sm:$0xff]  ;;  %v3948_v19 = vsel %vm11552_vm1, %v3784_v41, 0.0  ;;  %vm11556_vm4 = vmmov %vm11455_vm0 }
 0x388   :  { %v3661_v12 = vsub.f32 %v9205_v58, %v6932_v60  ;;  %v3786_v8 = vand.u32 2147483647, %v3658_v4  ;;  %v3663_v58 = vsub.f32 %v9229_v55, %v6934_v34  ;;  %v3788_v3 = vand.u32 2147483647, %v3660_v47  ;;  %vm11557_vm1 = vmmov %vm11455_vm0  ;;  %v6940_v47 = vld [vmem:[%s11128_s0 + $0xf8] sm:$0xff]  ;;  %v6941_v34 = vld [vmem:[%s11128_s0 + $0xf0] sm:$0xff] }
 0x389   :  { %3940 = vadd.xlane.f32.xlu1 %v3939_v16  ;;  %v3665_v55 = vsub.f32 %v9253_v49, %v6936_v30  ;;  %v3667_v49 = vsub.f32 %v9277_v42, %v6938_v37  ;;  %v3669_v42 = vsub.f32 %v9301_v5, %v6940_v47  ;;  %vm11558_vm5 = vmmov %vm11455_vm0  ;;  %v11561_v30 = vld [vmem:[#allocation24_spill] sm:$0xff] }
 0x38a   :  { %v3789_v16 = vand.u32 2147483647, %v3661_v12  ;;  %v3954_v11 = vsel %vm11554_vm11, %v3786_v8, 0.0  ;;  %v3791_v2 = vand.u32 2147483647, %v3663_v58  ;;  %v3960_v4 = vsel %vm11555_vm15, %v3788_v3, 0.0  ;;  %vm11559_vm11 = vmmov %vm11455_vm0 }
 0x38b   :  { %3937 = vadd.xlane.f32.xlu0 %v3936_v50  ;;  %v6935_v50 = vld [vmem:[%s11128_s0 + $0xc0] sm:$0xff]  ;;  %v3795_v22 = vand.u32 2147483647, %v3667_v49  ;;  %v6942_v3 = vld [vmem:[%s11128_s0 + $0x108] sm:$0xff]  ;;  %vm11562_vm15 = vmmov %vm11455_vm0 }
 0x38c   :  { %v3662_v40 = vsub.f32 %v9241_v45, %v6935_v50  ;;  %v3664_v45 = vsub.f32 %v9265_v32, %v6937_v10  ;;  %v3969_v60 = vsel %vm11556_vm4, %v3791_v2, 0.0  ;;  %v11560_v50 = vld [vmem:[#allocation23_spill] sm:$0xff]  ;;  %v6943_v2 = vld [vmem:[%s11128_s0 + $0x100] sm:$0xff]  ;;  %v11563_v10 = vld [vmem:[#allocation25_spill] sm:$0xff] }
 0x38d   :  { %3946 = vadd.xlane.f32.xlu1 %v3945_v9  ;;  %v3963_v9 = vsel %vm11455_vm0, %v3789_v16, 0.0  ;;  %v3671_v5 = vsub.f32 %v11560_v50, %v6942_v3  ;;  %vm11564_vm4 = vmmov %vm11455_vm0  ;;  %v6945_v37 = vld [vmem:[%s11128_s0 + $0x110] sm:$0xff]  ;;  %v11565_v49 = vld [vmem:[#allocation26_spill] sm:$0xff] }
 0x38e   :  { %v3790_v41 = vand.u32 2147483647, %v3662_v40  ;;  %v3792_v12 = vand.u32 2147483647, %v3664_v45  ;;  %v3981_v40 = vsel %vm11455_vm0, %v3795_v22, 0.0  ;;  %v11571_v3 = vld [vmem:[#allocation9_spill] sm:$0xff] }
 0x38f   :  { %3943 = vadd.xlane.f32.xlu0 %v3942_v13  ;;  %v3793_v13 = vand.u32 2147483647, %v3665_v55 }
 0x390   :  { %v3966_v8 = vsel %vm11557_vm1, %v3790_v41, 0.0  ;;  %v3972_v58 = vsel %vm11559_vm11, %v3792_v12, 0.0  ;;  %v6944_v41 = vld [vmem:[%s11128_s0 + $0x118] sm:$0xff]  ;;  %vm11566_vm1 = vmmov %vm11455_vm0 }
 0x391   :  { %3952 = vadd.xlane.f32.xlu1 %v3951_v21  ;;  %v6939_v21 = vld [vmem:[%s11128_s0 + $0xe0] sm:$0xff]  ;;  %v3673_v45 = vsub.f32 %v11563_v10, %v6944_v41  ;;  %vm11570_vm11 = vmmov %vm11455_vm0 }
 0x392   :  { %v3666_v32 = vsub.f32 %v9289_v20, %v6939_v21  ;;  %v3668_v20 = vsub.f32 %v9311_v36, %v6941_v34  ;;  %v3670_v36 = vsub.f32 %v11561_v30, %v6943_v2 }
 0x393   :  { %3949 = vadd.xlane.f32.xlu0 %v3948_v19  ;;  %v3975_v19 = vsel %vm11558_vm5, %v3793_v13, 0.0  ;;  %v3801_v21 = vand.u32 2147483647, %v3673_v45  ;;  %vm11568_vm5 = vmmov %vm11455_vm0  ;;  %v6951_v45 = vld [vmem:[%s11128_s0 + $0x140] sm:$0xff] }
 0x394   :  { %v3794_v16 = vand.u32 2147483647, %v3666_v32  ;;  %v3798_v13 = vand.u32 2147483647, %v3670_v36  ;;  %v6946_v32 = vld [vmem:[%s11128_s0 + $0x128] sm:$0xff] }
 0x395   :  { %3958 = vadd.xlane.f32.xlu1 %v3957_v35  ;;  %v3797_v35 = vand.u32 2147483647, %v3669_v42 }
 0x396   :  { %v3978_v55 = vsel %vm11562_vm15, %v3794_v16, 0.0  ;;  %v11569_v16 = vld [vmem:[#allocation8_spill] sm:$0xff]  ;;  %vm11572_vm15 = vmmov %vm11455_vm0 }
 0x397   :  { %3955 = vadd.xlane.f32.xlu0 %v3954_v11  ;;  %v3796_v11 = vand.u32 2147483647, %v3668_v20  ;;  %v3990_v20 = vsel %vm11570_vm11, %v3798_v13, 0.0  ;;  %vm11579_vm11 = vmmov %vm11455_vm0 }
 0x399   :  { %3964 = vadd.xlane.f32.xlu1 %v3963_v9  ;;  %v3799_v9 = vand.u32 2147483647, %v3671_v5  ;;  %v3984_v12 = vsel %vm11566_vm1, %v3796_v11, 0.0  ;;  %v3999_v5 = vsel %vm11455_vm0, %v3801_v21, 0.0  ;;  %v6949_v11 = vld [vmem:[%s11128_s0 + $0x130] sm:$0xff]  ;;  %vm11575_vm1 = vmmov %vm11455_vm0 }
 0x39a   :  { %v3676_v2 = vsub.f32 %v9376_v25, %v6949_v11  ;;  %v6956_v11 = vld [vmem:[%s11128_s0 + $0x178] sm:$0xff] }
 0x39b   :  { %3961 = vadd.xlane.f32.xlu0 %v3960_v4  ;;  %v3987_v4 = vsel %vm11564_vm4, %v3797_v35, 0.0  ;;  %v3993_v47 = vsel %vm11568_vm5, %v3799_v9, 0.0  ;;  %v6948_v35 = vld [vmem:[%s11128_s0 + $0x138] sm:$0xff]  ;;  %vm11573_vm4 = vmmov %vm11455_vm0 }
 0x39c   :  { %v3677_v50 = vsub.f32 %v11571_v3, %v6948_v35  ;;  %v3804_v10 = vand.u32 2147483647, %v3676_v2  ;;  %vm11577_vm5 = vmmov %vm11455_vm0  ;;  %v6955_v35 = vld [vmem:[%s11128_s0 + $0x160] sm:$0xff]  ;;  %v11583_v2 = vld [vmem:[#allocation15_spill] sm:$0xff] }
 0x39d   :  { %3970 = vadd.xlane.f32.xlu1 %v3969_v60  ;;  %v3672_v60 = vsub.f32 %v11565_v49, %v6945_v37  ;;  %v6952_v49 = vld [vmem:[%s11128_s0 + $0x158] sm:$0xff]  ;;  %v11581_v3 = vld [vmem:[#allocation14_spill] sm:$0xff] }
 0x39e   :  { %v3805_v36 = vand.u32 2147483647, %v3677_v50  ;;  %v3682_v50 = vsub.f32 %v11581_v3, %v6955_v35 }
 0x39f   :  { %3967 = vadd.xlane.f32.xlu0 %v3966_v8  ;;  %v11567_v8 = vld [vmem:[#allocation27_spill] sm:$0xff]  ;;  %v3800_v42 = vand.u32 2147483647, %v3672_v60 }
 0x3a0   :  { %v3675_v22 = vsub.f32 %v11567_v8, %v6946_v32  ;;  %v11576_v60 = vld [vmem:[#allocation11_spill] sm:$0xff]  ;;  %v6953_v32 = vld [vmem:[%s11128_s0 + $0x150] sm:$0xff] }
 0x3a1   :  { %3976 = vadd.xlane.f32.xlu1 %v3975_v19  ;;  %v6947_v19 = vld [vmem:[%s11128_s0 + $0x120] sm:$0xff]  ;;  %v3996_v30 = vsel %vm11572_vm15, %v3800_v42, 0.0  ;;  %v11578_v8 = vld [vmem:[#allocation12_spill] sm:$0xff]  ;;  %vm11582_vm15 = vmmov %vm11455_vm0 }
 0x3a2   :  { %v3674_v34 = vsub.f32 %v11569_v16, %v6947_v19  ;;  %v6954_v19 = vld [vmem:[%s11128_s0 + $0x168] sm:$0xff]  ;;  %v11580_v16 = vld [vmem:[#allocation13_spill] sm:$0xff] }
 0x3a3   :  { %3973 = vadd.xlane.f32.xlu0 %v3972_v58  ;;  %v3803_v58 = vand.u32 2147483647, %v3675_v22  ;;  %v3680_v22 = vsub.f32 %v11578_v8, %v6953_v32 }
 0x3a5   :  { %3982 = vadd.xlane.f32.xlu1 %v3981_v40  ;;  %v3802_v40 = vand.u32 2147483647, %v3674_v34  ;;  %v4005_v41 = vsel %vm11573_vm4, %v3803_v58, 0.0  ;;  %v3683_v34 = vsub.f32 %v11580_v16, %v6954_v19  ;;  %v3808_v58 = vand.u32 2147483647, %v3680_v22  ;;  %vm11584_vm4 = vmmov %vm11455_vm0  ;;  %v6960_v22 = vld [vmem:[%s11128_s0 + $0x198] sm:$0xff] }
 0x3a7   :  { %3979 = vadd.xlane.f32.xlu0 %v3978_v55  ;;  %v6950_v55 = vld [vmem:[%s11128_s0 + $0x148] sm:$0xff]  ;;  %v4002_v13 = vsel %vm11575_vm1, %v3802_v40, 0.0  ;;  %v3811_v40 = vand.u32 2147483647, %v3683_v34  ;;  %vm11586_vm1 = vmmov %vm11455_vm0  ;;  %v6961_v34 = vld [vmem:[%s11128_s0 + $0x190] sm:$0xff] }
 0x3a8   :  { %v3679_v9 = vsub.f32 %v9386_v33, %v6950_v55  ;;  %v3681_v33 = vsub.f32 %v11576_v60, %v6952_v49  ;;  %v3810_v55 = vand.u32 2147483647, %v3682_v50  ;;  %v6962_v50 = vld [vmem:[%s11128_s0 + $0x1a8] sm:$0xff] }
 0x3a9   :  { %3988 = vadd.xlane.f32.xlu1 %v3987_v4  ;;  %v11574_v4 = vld [vmem:[#allocation10_spill] sm:$0xff] }
 0x3aa   :  { %v3678_v25 = vsub.f32 %v11574_v4, %v6951_v45  ;;  %v3807_v37 = vand.u32 2147483647, %v3679_v9  ;;  %v3809_v42 = vand.u32 2147483647, %v3681_v33  ;;  %v6957_v9 = vld [vmem:[%s11128_s0 + $0x170] sm:$0xff]  ;;  %v4020_v45 = vsel %vm11586_vm1, %v3808_v58, 0.0  ;;  %vm11597_vm1 = vmmov %vm11455_vm0 }
 0x3ab   :  { %3985 = vadd.xlane.f32.xlu0 %v3984_v12  ;;  %v4011_v12 = vsel %vm11577_vm5, %v3805_v36, 0.0  ;;  %vm11588_vm5 = vmmov %vm11455_vm0  ;;  %v6959_v33 = vld [vmem:[%s11128_s0 + $0x180] sm:$0xff] }
 0x3ac   :  { %v3806_v21 = vand.u32 2147483647, %v3678_v25  ;;  %v4023_v36 = vsel %vm11584_vm4, %v3809_v42, 0.0  ;;  %v6958_v25 = vld [vmem:[%s11128_s0 + $0x188] sm:$0xff]  ;;  %v4029_v49 = vsel %vm11588_vm5, %v3811_v40, 0.0  ;;  %vm11595_vm4 = vmmov %vm11455_vm0 }
 0x3ad   :  { %3994 = vadd.xlane.f32.xlu1 %v3993_v47  ;;  %v4008_v47 = vsel %vm11579_vm11, %v3804_v10, 0.0  ;;  %vm11590_vm11 = vmmov %vm11455_vm0 }
 0x3ae   :  { %v4026_v32 = vsel %vm11590_vm11, %v3810_v55, 0.0  ;;  %vm11599_vm5 = vmmov %vm11455_vm0 }
 0x3af   :  { %3991 = vadd.xlane.f32.xlu0 %v3990_v20  ;;  %v4017_v20 = vsel %vm11455_vm0, %v3807_v37, 0.0  ;;  %vm11601_vm11 = vmmov %vm11455_vm0 }
 0x3b1   :  { %4000 = vadd.xlane.f32.xlu1 %v3999_v5  ;;  %v4014_v5 = vsel %vm11582_vm15, %v3806_v21, 0.0  ;;  %vm11593_vm15 = vmmov %vm11455_vm0 }
 0x3b3   :  { %3997 = vadd.xlane.f32.xlu0 %v3996_v30  ;;  %v3685_v30 = vsub.f32 %v11583_v2, %v6956_v11 }
 0x3b5   :  { %4006 = vadd.xlane.f32.xlu1 %v4005_v41  ;;  %v11585_v41 = vld [vmem:[#allocation16_spill] sm:$0xff]  ;;  %v3813_v4 = vand.u32 2147483647, %v3685_v30  ;;  %v6963_v30 = vld [vmem:[%s11128_s0 + $0x1a0] sm:$0xff] }
 0x3b6   :  { %v3684_v10 = vsub.f32 %v11585_v41, %v6957_v9 }
 0x3b7   :  { %4003 = vadd.xlane.f32.xlu0 %v4002_v13  ;;  %v11587_v13 = vld [vmem:[#allocation17_spill] sm:$0xff]  ;;  %v4035_v19 = vsel %vm11455_vm0, %v3813_v4, 0.0 }
 0x3b8   :  { %v3687_v37 = vsub.f32 %v11587_v13, %v6958_v25  ;;  %v3812_v60 = vand.u32 2147483647, %v3684_v10  ;;  %v6964_v10 = vld [vmem:[%s11128_s0 + $0x1b8] sm:$0xff] }
 0x3b9   :  { %4012 = vadd.xlane.f32.xlu1 %v4011_v12  ;;  %v11589_v12 = vld [vmem:[#allocation18_spill] sm:$0xff] }
 0x3ba   :  { %v3686_v21 = vsub.f32 %v11589_v12, %v6959_v33  ;;  %v3815_v8 = vand.u32 2147483647, %v3687_v37  ;;  %v4032_v35 = vsel %vm11593_vm15, %v3812_v60, 0.0  ;;  %v6965_v37 = vld [vmem:[%s11128_s0 + $0x1b0] sm:$0xff]  ;;  %vm11604_vm15 = vmmov %vm11455_vm0 }
 0x3bb   :  { %4009 = vadd.xlane.f32.xlu0 %v4008_v47  ;;  %v11591_v47 = vld [vmem:[#allocation19_spill] sm:$0xff] }
 0x3bc   :  { %v3689_v42 = vsub.f32 %v11591_v47, %v6960_v22  ;;  %v3814_v16 = vand.u32 2147483647, %v3686_v21  ;;  %v4041_v11 = vsel %vm11595_vm4, %v3815_v8, 0.0  ;;  %v6966_v21 = vld [vmem:[%s11128_s0 + $0x1c8] sm:$0xff]  ;;  %vm11606_vm4 = vmmov %vm11455_vm0 }
 0x3bd   :  { %4018 = vadd.xlane.f32.xlu1 %v4017_v20  ;;  %v11592_v20 = vld [vmem:[#allocation45_spill] sm:$0xff] }
 0x3be   :  { %v3688_v58 = vsub.f32 %v11592_v20, %v6961_v34  ;;  %v3817_v3 = vand.u32 2147483647, %v3689_v42  ;;  %v4038_v9 = vsel %vm11597_vm1, %v3814_v16, 0.0  ;;  %v6967_v42 = vld [vmem:[%s11128_s0 + $0x1c0] sm:$0xff]  ;;  %vm11608_vm1 = vmmov %vm11455_vm0 }
 0x3bf   :  { %4015 = vadd.xlane.f32.xlu0 %v4014_v5  ;;  %v11594_v5 = vld [vmem:[#allocation46_spill] sm:$0xff] }
 0x3c0   :  { %v3691_v40 = vsub.f32 %v11594_v5, %v6962_v50  ;;  %v3816_v2 = vand.u32 2147483647, %v3688_v58  ;;  %v4047_v25 = vsel %vm11599_vm5, %v3817_v3, 0.0  ;;  %v6968_v58 = vld [vmem:[%s11128_s0 + $0x1d8] sm:$0xff]  ;;  %vm11610_vm5 = vmmov %vm11455_vm0 }
 0x3c1   :  { %4024 = vadd.xlane.f32.xlu1 %v4023_v36  ;;  %v11596_v36 = vld [vmem:[#allocation47_spill] sm:$0xff] }
 0x3c2   :  { %v3690_v55 = vsub.f32 %v11596_v36, %v6963_v30  ;;  %v3819_v41 = vand.u32 2147483647, %v3691_v40  ;;  %v4044_v33 = vsel %vm11601_vm11, %v3816_v2, 0.0  ;;  %v6969_v40 = vld [vmem:[%s11128_s0 + $0x1d0] sm:$0xff]  ;;  %vm11612_vm11 = vmmov %vm11455_vm0 }
 0x3c3   :  { %4021 = vadd.xlane.f32.xlu0 %v4020_v45  ;;  %v11598_v45 = vld [vmem:[#allocation48_spill] sm:$0xff] }
 0x3c4   :  { %v3693_v4 = vsub.f32 %v11598_v45, %v6964_v10  ;;  %v3818_v13 = vand.u32 2147483647, %v3690_v55  ;;  %v4053_v22 = vsel %vm11455_vm0, %v3819_v41, 0.0  ;;  %v6970_v55 = vld [vmem:[%s11128_s0 + $0x1e8] sm:$0xff] }
 0x3c5   :  { %4030 = vadd.xlane.f32.xlu1 %v4029_v49  ;;  %v11600_v49 = vld [vmem:[#allocation49_spill] sm:$0xff] }
 0x3c6   :  { %v3692_v60 = vsub.f32 %v11600_v49, %v6965_v37  ;;  %v3821_v12 = vand.u32 2147483647, %v3693_v4  ;;  %v4050_v34 = vsel %vm11604_vm15, %v3818_v13, 0.0  ;;  %v6971_v4 = vld [vmem:[%s11128_s0 + $0x1e0] sm:$0xff]  ;;  %vm11615_vm15 = vmmov %vm11455_vm0 }
 0x3c7   :  { %4027 = vadd.xlane.f32.xlu0 %v4026_v32  ;;  %v11602_v32 = vld [vmem:[#allocation50_spill] sm:$0xff] }
 0x3c8   :  { %v3695_v8 = vsub.f32 %v11602_v32, %v6966_v21  ;;  %v3820_v47 = vand.u32 2147483647, %v3692_v60  ;;  %v4059_v50 = vsel %vm11606_vm4, %v3821_v12, 0.0  ;;  %v6972_v60 = vld [vmem:[%s11128_s0 + $0x1f8] sm:$0xff]  ;;  %vm11617_vm4 = vmmov %vm11455_vm0 }
 0x3c9   :  { %4036 = vadd.xlane.f32.xlu1 %v4035_v19  ;;  %v11603_v19 = vld [vmem:[#allocation51_spill] sm:$0xff] }
 0x3ca   :  { %v3694_v16 = vsub.f32 %v11603_v19, %v6967_v42  ;;  %v3823_v20 = vand.u32 2147483647, %v3695_v8  ;;  %v4056_v30 = vsel %vm11608_vm1, %v3820_v47, 0.0  ;;  %v6973_v8 = vld [vmem:[%s11128_s0 + $0x1f0] sm:$0xff]  ;;  %vm11619_vm1 = vmmov %vm11455_vm0 }
 0x3cb   :  { %4033 = vadd.xlane.f32.xlu0 %v4032_v35  ;;  %v11605_v35 = vld [vmem:[#allocation52_spill] sm:$0xff] }
 0x3cc   :  { %v3697_v3 = vsub.f32 %v11605_v35, %v6968_v58  ;;  %v3822_v5 = vand.u32 2147483647, %v3694_v16  ;;  %v4065_v10 = vsel %vm11610_vm5, %v3823_v20, 0.0  ;;  %v6974_v16 = vld [vmem:[%s11128_s0 + $0x208] sm:$0xff]  ;;  %vm11620_vm5 = vmmov %vm11455_vm0 }
 0x3cd   :  { %4042 = vadd.xlane.f32.xlu1 %v4041_v11  ;;  %v11607_v11 = vld [vmem:[#allocation53_spill] sm:$0xff] }
 0x3ce   :  { %v3696_v2 = vsub.f32 %v11607_v11, %v6969_v40  ;;  %v3825_v36 = vand.u32 2147483647, %v3697_v3  ;;  %v4062_v37 = vsel %vm11612_vm11, %v3822_v5, 0.0  ;;  %v6975_v3 = vld [vmem:[%s11128_s0 + $0x200] sm:$0xff]  ;;  %vm11622_vm11 = vmmov %vm11455_vm0 }
 0x3cf   :  { %4039 = vadd.xlane.f32.xlu0 %v4038_v9  ;;  %v11609_v9 = vld [vmem:[#allocation54_spill] sm:$0xff] }
 0x3d0   :  { %v3699_v41 = vsub.f32 %v11609_v9, %v6970_v55  ;;  %v3824_v45 = vand.u32 2147483647, %v3696_v2  ;;  %v4071_v21 = vsel %vm11455_vm0, %v3825_v36, 0.0  ;;  %v6976_v2 = vld [vmem:[%s11128_s0 + $0x218] sm:$0xff]  ;;  %v6977_v9 = vld [vmem:[%s11128_s0 + $0x210] sm:$0xff] }
 0x3d1   :  { %4048 = vadd.xlane.f32.xlu1 %v4047_v25  ;;  %v11611_v25 = vld [vmem:[#allocation55_spill] sm:$0xff] }
 0x3d2   :  { %v3698_v13 = vsub.f32 %v11611_v25, %v6971_v4  ;;  %v3827_v49 = vand.u32 2147483647, %v3699_v41  ;;  %v4068_v42 = vsel %vm11615_vm15, %v3824_v45, 0.0  ;;  %v11621_v41 = vld [vmem:[#allocation60_spill] sm:$0xff]  ;;  %v6978_v25 = vld [vmem:[%s11128_s0 + $0x228] sm:$0xff]  ;;  %vm11623_vm15 = vmmov %vm11455_vm0 }
 0x3d3   :  { %4045 = vadd.xlane.f32.xlu0 %v4044_v33  ;;  %v11613_v33 = vld [vmem:[#allocation56_spill] sm:$0xff] }
 0x3d4   :  { %v3701_v12 = vsub.f32 %v11613_v33, %v6972_v60  ;;  %v3826_v32 = vand.u32 2147483647, %v3698_v13  ;;  %v4077_v58 = vsel %vm11617_vm4, %v3827_v49, 0.0  ;;  %v6979_v49 = vld [vmem:[%s11128_s0 + $0x220] sm:$0xff]  ;;  %vm11624_vm4 = vmmov %vm11455_vm0 }
 0x3d5   :  { %4054 = vadd.xlane.f32.xlu1 %v4053_v22  ;;  %v11614_v22 = vld [vmem:[#allocation57_spill] sm:$0xff]  ;;  %v3706_v60 = vsub.f32 %v9705_v56, %v6979_v49 }
 0x3d6   :  { %v3700_v47 = vsub.f32 %v11614_v22, %v6973_v8  ;;  %v3829_v19 = vand.u32 2147483647, %v3701_v12  ;;  %v4074_v40 = vsel %vm11619_vm1, %v3826_v32, 0.0  ;;  %v6981_v22 = vld [vmem:[%s11128_s0 + $0x230] sm:$0xff]  ;;  %vm11625_vm1 = vmmov %vm11455_vm0 }
 0x3d7   :  { %4051 = vadd.xlane.f32.xlu0 %v4050_v34  ;;  %v11616_v34 = vld [vmem:[#allocation58_spill] sm:$0xff]  ;;  %v3834_v8 = vand.u32 2147483647, %v3706_v60  ;;  %v3708_v56 = vsub.f32 %v9736_v59, %v6981_v22  ;;  %v11628_v59 = vld [vmem:[#allocation29_spill] sm:$0xff] }
 0x3d8   :  { %v3703_v20 = vsub.f32 %v11616_v34, %v6974_v16  ;;  %v3828_v35 = vand.u32 2147483647, %v3700_v47  ;;  %v4083_v36 = vsel %vm11620_vm5, %v3829_v19, 0.0  ;;  %v6982_v19 = vld [vmem:[%s11128_s0 + $0x248] sm:$0xff]  ;;  %v11626_v16 = vld [vmem:[#allocation28_spill] sm:$0xff]  ;;  %vm11627_vm5 = vmmov %vm11455_vm0 }
 0x3d9   :  { %4060 = vadd.xlane.f32.xlu1 %v4059_v50  ;;  %v11618_v50 = vld [vmem:[#allocation59_spill] sm:$0xff]  ;;  %v11633_v60 = vld [vmem:[#allocation37_spill] sm:$0xff] }
 0x3da   :  { %v3702_v5 = vsub.f32 %v11618_v50, %v6975_v3  ;;  %v3831_v11 = vand.u32 2147483647, %v3703_v20  ;;  %v4080_v45 = vsel %vm11622_vm11, %v3828_v35, 0.0  ;;  %v6983_v35 = vld [vmem:[%s11128_s0 + $0x240] sm:$0xff]  ;;  %vm11629_vm11 = vmmov %vm11455_vm0 }
 0x3db   :  { %4057 = vadd.xlane.f32.xlu0 %v4056_v30  ;;  %v3705_v30 = vsub.f32 %v9654_v1, %v6976_v2  ;;  %v3707_v1 = vsub.f32 %v9686_v23, %v6978_v25  ;;  %v3710_v3 = vsub.f32 %v11628_v59, %v6983_v35  ;;  %v6989_v35 = vld [vmem:[%s11128_s0 + $0x270] sm:$0xff] }
 0x3dc   :  { %v3830_v55 = vand.u32 2147483647, %v3702_v5  ;;  %v4089_v13 = vsel %vm11455_vm0, %v3831_v11, 0.0  ;;  %v4098_v5 = vsel %vm11629_vm11, %v3834_v8, 0.0  ;;  %v6984_v11 = vld [vmem:[%s11128_s0 + $0x258] sm:$0xff]  ;;  %v3716_v59 = vsub.f32 %v9858_v15, %v6989_v35  ;;  %vm11639_vm11 = vmmov %vm11455_vm0 }
 0x3dd   :  { %4066 = vadd.xlane.f32.xlu1 %v4065_v10  ;;  %v3704_v10 = vsub.f32 %v11621_v41, %v6977_v9  ;;  %v3833_v4 = vand.u32 2147483647, %v3705_v30  ;;  %v3835_v12 = vand.u32 2147483647, %v3707_v1  ;;  %v3713_v2 = vsub.f32 %v9802_v54, %v6984_v11  ;;  %v6985_v9 = vld [vmem:[%s11128_s0 + $0x250] sm:$0xff]  ;;  %v11632_v1 = vld [vmem:[#allocation38_spill] sm:$0xff] }
 0x3de   :  { %v4086_v33 = vsel %vm11623_vm15, %v3830_v55, 0.0  ;;  %v3838_v55 = vand.u32 2147483647, %v3710_v3  ;;  %v3712_v41 = vsub.f32 %v9817_v31, %v6985_v9  ;;  %vm11631_vm15 = vmmov %vm11455_vm0  ;;  %v6990_v11 = vld [vmem:[%s11128_s0 + $0x288] sm:$0xff] }
 0x3df   :  { %4063 = vadd.xlane.f32.xlu0 %v4062_v37  ;;  %v3832_v37 = vand.u32 2147483647, %v3704_v10  ;;  %v4095_v32 = vsel %vm11624_vm4, %v3833_v4, 0.0  ;;  %v4101_v20 = vsel %vm11627_vm5, %v3835_v12, 0.0  ;;  %v11630_v10 = vld [vmem:[#allocation36_spill] sm:$0xff]  ;;  %vm11634_vm4 = vmmov %vm11455_vm0  ;;  %v11641_v9 = vld [vmem:[#allocation39_spill] sm:$0xff] }
 0x3e0   :  { %v3841_v54 = vand.u32 2147483647, %v3713_v2  ;;  %v3840_v31 = vand.u32 2147483647, %v3712_v41  ;;  %vm11637_vm5 = vmmov %vm11455_vm0  ;;  %v3719_v2 = vsub.f32 %v9865_v63, %v6990_v11 }
 0x3e1   :  { %4072 = vadd.xlane.f32.xlu1 %v4071_v21  ;;  %v6980_v21 = vld [vmem:[%s11128_s0 + $0x238] sm:$0xff]  ;;  %v4092_v47 = vsel %vm11625_vm1, %v3832_v37, 0.0  ;;  %v6986_v37 = vld [vmem:[%s11128_s0 + $0x268] sm:$0xff]  ;;  %vm11635_vm1 = vmmov %vm11455_vm0 }
 0x3e2   :  { %v3709_v23 = vsub.f32 %v9716_v29, %v6980_v21  ;;  %v3711_v29 = vsub.f32 %v11626_v16, %v6982_v19  ;;  %v3715_v49 = vsub.f32 %v9831_v44, %v6986_v37  ;;  %v6987_v21 = vld [vmem:[%s11128_s0 + $0x260] sm:$0xff]  ;;  %v4110_v22 = vsel %vm11635_vm1, %v3838_v55, 0.0  ;;  %vm11646_vm1 = vmmov %vm11455_vm0 }
 0x3e3   :  { %4069 = vadd.xlane.f32.xlu0 %v4068_v42  ;;  %v11636_v19 = vld [vmem:[#allocation22_spill] sm:$0xff] }
 0x3e4   :  { %v3837_v42 = vand.u32 2147483647, %v3709_v23  ;;  %v3714_v23 = vsub.f32 %v9842_v0, %v6987_v21  ;;  %v3843_v44 = vand.u32 2147483647, %v3715_v49  ;;  %v4119_v0 = vsel %vm11637_vm5, %v3841_v54, 0.0 }
 0x3e5   :  { %4078 = vadd.xlane.f32.xlu1 %v4077_v58  ;;  %v3836_v58 = vand.u32 2147483647, %v3708_v56  ;;  %v3847_v49 = vand.u32 2147483647, %v3719_v2  ;;  %vm11647_vm5 = vcmask 589312  }
 0x3e6   :  { %v4125_v15 = vsel %vm11455_vm0, %v3843_v44, 0.0 }
 0x3e7   :  { %4075 = vadd.xlane.f32.xlu0 %v4074_v40  ;;  %v3839_v40 = vand.u32 2147483647, %v3711_v29  ;;  %v4104_v25 = vsel %vm11631_vm15, %v3836_v58, 0.0  ;;  %v3842_v58 = vand.u32 2147483647, %v3714_v23  ;;  %vm11642_vm15 = vmmov %vm11455_vm0 }
 0x3e9   :  { %4084 = vadd.xlane.f32.xlu1 %v4083_v36  ;;  %v4107_v36 = vsel %vm11455_vm0, %v3837_v42, 0.0  ;;  %v4113_v12 = vsel %vm11634_vm4, %v3839_v40, 0.0  ;;  %v4122_v63 = vsel %vm11642_vm15, %v3842_v58, 0.0  ;;  %vm11644_vm4 = vmmov %vm11455_vm0 }
 0x3ea   :  { %vm11650_vm15 = vmmov %vm11646_vm1 }
 0x3eb   :  { %4081 = vadd.xlane.f32.xlu0 %v4080_v45 }
 0x3ed   :  { %4090 = vadd.xlane.f32.xlu1 %v4089_v13 }
 0x3ee   :  { %v3899_v50 = vpop.xlane.xlu1 %3898 }
 0x3ef   :  { %4087 = vadd.xlane.f32.xlu0 %v4086_v33  ;;  %v4986_v33 = vrot.slane %v3899_v50, %v11633_v60 }
 0x3f0   :  { %v3896_v34 = vpop.xlane.xlu0 %3895 }
 0x3f1   :  { %4096 = vadd.xlane.f32.xlu1 %v4095_v32  ;;  %v4982_v45 = vrot.slane %v3896_v34, %v11630_v10  ;;  %v11638_v34 = vld [vmem:[#allocation40_spill] sm:$0xff] }
 0x3f3   :  { %4093 = vadd.xlane.f32.xlu0 %v4092_v47  ;;  %v4987_v32 = vsel %vm4287_vm13, %v4986_v33, %v4982_v45  ;;  %v6988_v47 = vld [vmem:[%s11128_s0 + $0x278] sm:$0xff]  ;;  %v3844_v45 = vand.u32 2147483647, %v3716_v59  ;;  %v6995_v59 = vld [vmem:[%s11128_s0 + $0x2a0] sm:$0xff] }
 0x3f4   :  { %v3717_v42 = vsub.f32 %v9851_v53, %v6988_v47  ;;  %v4116_v53 = vsel %vm11639_vm11, %v3840_v31, 0.0  ;;  %v6992_v33 = vld [vmem:[%s11128_s0 + $0x298] sm:$0xff]  ;;  %v11643_v31 = vld [vmem:[#allocation42_spill] sm:$0xff]  ;;  %vm11648_vm11 = vmmov %vm11455_vm0  ;;  %vm11649_vm0 = vcmask 654912  }
 0x3f5   :  { %4102 = vadd.xlane.f32.xlu1 %v4101_v20 }
 0x3f6   :  { %v3905_v4 = vpop.xlane.xlu1 %3904  ;;  %v3845_v40 = vand.u32 2147483647, %v3717_v42 }
 0x3f7   :  { %4099 = vadd.xlane.f32.xlu0 %v4098_v5  ;;  %v4996_v16 = vrot.slane %v3905_v4, %v11636_v19  ;;  %v6991_v4 = vld [vmem:[%s11128_s0 + $0x280] sm:$0xff] }
 0x3f8   :  { %v3902_v30 = vpop.xlane.xlu0 %3901 }
 0x3f9   :  { %4108 = vadd.xlane.f32.xlu1 %v4107_v36  ;;  %v4991_v13 = vrot.slane %v3902_v30, %v11632_v1  ;;  %v11640_v30 = vld [vmem:[#allocation41_spill] sm:$0xff] }
 0x3fb   :  { %4105 = vadd.xlane.f32.xlu0 %v4104_v25  ;;  %v4992_v56 = vsel %vm4294_vm14, %v4991_v13, %v4987_v32  ;;  %v3718_v25 = vsub.f32 %v9872_v38, %v6991_v4  ;;  %v4131_v38 = vsel %vm11644_vm4, %v3845_v40, 0.0  ;;  %v11645_v32 = vld [vmem:[#allocation43_spill] sm:$0xff]  ;;  %vm11651_vm4 = vcmask 720512  }
 0x3fc   :  { %v4997_v3 = vsel %vm4301_vm2, %v4996_v16, %v4992_v56  ;;  %v6993_v56 = vld [vmem:[%s11128_s0 + $0x290] sm:$0xff] }
 0x3fd   :  { %4114 = vadd.xlane.f32.xlu1 %v4113_v12  ;;  %v3721_v12 = vsub.f32 %v9879_v24, %v6992_v33  ;;  %v3720_v44 = vsub.f32 %v9886_v14, %v6993_v56  ;;  %v4128_v24 = vsel %vm11646_vm1, %v3844_v45, 0.0  ;;  %v4137_v14 = vsel %vm11648_vm11, %v3847_v49, 0.0  ;;  %vm11653_vm11 = vmmov %vm11646_vm1  ;;  %v6998_v33 = vld [vmem:[%s11128_s0 + $0x2c8] sm:$0xff]  ;;  %v6999_v56 = vld [vmem:[%s11128_s0 + $0x2c0] sm:$0xff] }
 0x3fe   :  { %v3911_v8 = vpop.xlane.xlu1 %3910 }
 0x3ff   :  { %4111 = vadd.xlane.f32.xlu0 %v4110_v22  ;;  %v5006_v36 = vrot.slane %v3911_v8, %v11640_v30  ;;  %v3846_v22 = vand.u32 2147483647, %v3718_v25  ;;  %v6997_v25 = vld [vmem:[%s11128_s0 + $0x2b0] sm:$0xff] }
 0x400   :  { %v3908_v29 = vpop.xlane.xlu0 %3907 }
 0x401   :  { %v5001_v20 = vrot.slane %v3908_v29, %v11638_v34  ;;  %4120 = vadd.xlane.f32.xlu1 %v4119_v0  ;;  %v3849_v29 = vand.u32 2147483647, %v3721_v12  ;;  %v6994_v0 = vld [vmem:[%s11128_s0 + $0x2a8] sm:$0xff]  ;;  %v3727_v12 = vsub.f32 %v9921_v57, %v6998_v33 }
 0x402   :  { %v3917_v50 = vpop.xlane.xlu1 %3916 }
 0x403   :  { %v5002_v5 = vsel %vm4308_vm3, %v5001_v20, %v4997_v3  ;;  %4117 = vadd.xlane.f32.xlu0 %v4116_v53  ;;  %v5016_v21 = vrot.slane %v3917_v50, %v11643_v31  ;;  %v3723_v20 = vsub.f32 %v9893_v48, %v6994_v0  ;;  %v3722_v3 = vsub.f32 %v9900_v51, %v6995_v59 }
 0x404   :  { %v3914_v55 = vpop.xlane.xlu0 %3913  ;;  %v5007_v13 = vsel %vm4315_vm6, %v5006_v36, %v5002_v5  ;;  %v3848_v53 = vand.u32 2147483647, %v3720_v44  ;;  %v4134_v48 = vsel %vm11650_vm15, %v3846_v22, 0.0  ;;  %v6996_v36 = vld [vmem:[%s11128_s0 + $0x2b8] sm:$0xff]  ;;  %v11656_v44 = vld [vmem:[#allocation30_spill] sm:$0xff] }
 0x405   :  { %v5011_v41 = vrot.slane %v3914_v55, %v11641_v9  ;;  %4126 = vadd.xlane.f32.xlu1 %v4125_v15  ;;  %v3851_v2 = vand.u32 2147483647, %v3723_v20  ;;  %v3725_v55 = vsub.f32 %v9907_v43, %v6996_v36  ;;  %v3850_v45 = vand.u32 2147483647, %v3722_v3  ;;  %v7000_v20 = vld [vmem:[%s11128_s0 + $0x2d8] sm:$0xff] }
 0x406   :  { %v3923_v54 = vpop.xlane.xlu1 %3922  ;;  %v4140_v43 = vsel %vm11653_vm11, %v3848_v53, 0.0  ;;  %v3855_v0 = vand.u32 2147483647, %v3727_v12  ;;  %v7001_v53 = vld [vmem:[%s11128_s0 + $0x2d0] sm:$0xff] }
 0x407   :  { %v5012_v37 = vsel %vm4322_vm7, %v5011_v41, %v5007_v13  ;;  %4123 = vadd.xlane.f32.xlu0 %v4122_v63  ;;  %v5026_v58 = vrot.slane %v3923_v54, %v8558_v18  ;;  %v4143_v41 = vsel %vm11646_vm1, %v3849_v29, 0.0  ;;  %v3724_v13 = vsub.f32 %v9914_v26, %v6997_v25 }
 0x408   :  { %v3920_v23 = vpop.xlane.xlu0 %3919  ;;  %v5017_v47 = vsel %vm4329_vm10, %v5016_v21, %v5012_v37  ;;  %v3853_v49 = vand.u32 2147483647, %v3725_v55  ;;  %v7002_v55 = vld [vmem:[%s11128_s0 + $0x2e8] sm:$0xff] }
 0x409   :  { %v5021_v8 = vrot.slane %v3920_v23, %v11645_v32  ;;  %4132 = vadd.xlane.f32.xlu1 %v4131_v38  ;;  %v3852_v22 = vand.u32 2147483647, %v3724_v13 }
 0x40a   :  { %v3929_v42 = vpop.xlane.xlu1 %3928 }
 0x40b   :  { %v5022_v16 = vsel %vm11647_vm5, %v5021_v8, %v5017_v47  ;;  %4129 = vadd.xlane.f32.xlu0 %v4128_v24  ;;  %v5036_v51 = vrot.slane %v3929_v42, %v8602_v7  ;;  %vm11652_vm5 = vcmask 786112   ;;  %v3726_v47 = vsub.f32 %v11656_v44, %v6999_v56  ;;  %v11657_v42 = vld [vmem:[#allocation44_spill] sm:$0xff] }
 0x40c   :  { %v3926_v35 = vpop.xlane.xlu0 %3925  ;;  %v5027_v5 = vsel %vm11649_vm0, %v5026_v58, %v5022_v16  ;;  %vm11654_vm0 = vmmov %vm11646_vm1  ;;  %v11658_v58 = vld [vmem:[#allocation31_spill] sm:$0xff] }
 0x40d   :  { %v5031_v50 = vrot.slane %v3926_v35, %v8599_v39  ;;  %4138 = vadd.xlane.f32.xlu1 %v4137_v14  ;;  %v4149_v26 = vsel %vm11654_vm0, %v3851_v2, 0.0  ;;  %vm11655_vm15 = vmmov %vm11654_vm0  ;;  %v3729_v35 = vsub.f32 %v11658_v58, %v7000_v20 }
 0x40e   :  { %v3935_v40 = vpop.xlane.xlu1 %3934  ;;  %v4146_v8 = vsel %vm11655_vm15, %v3850_v45, 0.0  ;;  %vm11660_vm1 = vmmov %vm11654_vm0 }
 0x40f   :  { %v5032_v11 = vsel %vm11651_vm4, %v5031_v50, %v5027_v5  ;;  %4135 = vadd.xlane.f32.xlu0 %v4134_v48  ;;  %v5046_v21 = vrot.slane %v3935_v40, %v8610_v27  ;;  %vm11659_vm4 = vcmask 1048512   ;;  %v4155_v3 = vsel %vm11660_vm1, %v3853_v49, 0.0  ;;  %v11661_v5 = vld [vmem:[#allocation32_spill] sm:$0xff]  ;;  %vm11664_vm11 = vmmov %vm11654_vm0 }
 0x410   :  { %v3932_v15 = vpop.xlane.xlu0 %3931  ;;  %v5037_v54 = vsel %vm11652_vm5, %v5036_v51, %v5032_v11  ;;  %v3854_v50 = vand.u32 2147483647, %v3726_v47  ;;  %v3728_v40 = vsub.f32 %v11661_v5, %v7001_v53  ;;  %vm11662_vm5 = vmmov %vm11654_vm0  ;;  %v3857_v36 = vand.u32 2147483647, %v3729_v35  ;;  %v11663_v51 = vld [vmem:[#allocation33_spill] sm:$0xff] }
 0x411   :  { %v5041_v4 = vrot.slane %v3932_v15, %v8607_v46  ;;  %4144 = vadd.xlane.f32.xlu1 %v4143_v41  ;;  %v4152_v2 = vsel %vm11662_vm5, %v3852_v22, 0.0  ;;  %v3731_v15 = vsub.f32 %v11663_v51, %v7002_v55  ;;  %vm11667_vm15 = vmmov %vm11654_vm0 }
 0x412   :  { %v3941_v63 = vpop.xlane.xlu1 %3940  ;;  %v3856_v13 = vand.u32 2147483647, %v3728_v40  ;;  %v4158_v33 = vsel %vm11654_vm0, %v3854_v50, 0.0  ;;  %v4167_v56 = vsel %vm11667_vm15, %v3857_v36, 0.0  ;;  %vm11671_vm1 = vmmov %vm11654_vm0  ;;  %vm11677_vm15 = vcmask 589312  }
 0x413   :  { %v5042_v37 = vsel %vm4364_vm12, %v5041_v4, %v5037_v54  ;;  %4141 = vadd.xlane.f32.xlu0 %v4140_v43  ;;  %v5056_v24 = vrot.slane %v3941_v63, %v11657_v42  ;;  %v4161_v4 = vsel %vm11664_vm11, %v3855_v0, 0.0  ;;  %v7003_v54 = vld [vmem:[%s11128_s0 + $0x2e0] sm:$0xff]  ;;  %vm11673_vm5 = vmmov %vm11654_vm0 }
 0x414   :  { %v3938_v23 = vpop.xlane.xlu0 %3937  ;;  %v5047_v57 = vsel %vm4371_vm8, %v5046_v21, %v5042_v37  ;;  %v11665_v63 = vld [vmem:[#allocation34_spill] sm:$0xff]  ;;  %v3859_v21 = vand.u32 2147483647, %v3731_v15  ;;  %vm11675_vm11 = vmmov %vm11654_vm0 }
 0x415   :  { %v5051_v38 = vrot.slane %v3938_v23, %v8647_v28  ;;  %4150 = vadd.xlane.f32.xlu1 %v4149_v26  ;;  %v3730_v43 = vsub.f32 %v11665_v63, %v7003_v54  ;;  %v7004_v23 = vld [vmem:[%s11128_s0 + $0x2f8] sm:$0xff] }
 0x416   :  { %v3947_v16 = vpop.xlane.xlu1 %3946  ;;  %v11666_v26 = vld [vmem:[#allocation21_spill] sm:$0xff]  ;;  %v4173_v5 = vsel %vm11671_vm1, %v3859_v21, 0.0  ;;  %vm11681_vm1 = vcmask 654912  }
 0x417   :  { %v5052_v29 = vsel %vm4378_vm9, %v5051_v38, %v5047_v57  ;;  %4147 = vadd.xlane.f32.xlu0 %v4146_v8  ;;  %v5083_v41 = vrot.slane %v3947_v16, %v11633_v60  ;;  %v3733_v38 = vsub.f32 %v11666_v26, %v7004_v23  ;;  %v3858_v47 = vand.u32 2147483647, %v3730_v43  ;;  %v11668_v57 = vld [vmem:[#allocation20_spill] sm:$0xff] }
 0x418   :  { %v5057_v14 = vsel %vm11659_vm4, %v5056_v24, %v5052_v29  ;;  %v3944_v59 = vpop.xlane.xlu0 %3943  ;;  %v7005_v24 = vld [vmem:[%s11128_s0 + $0x2f0] sm:$0xff]  ;;  %vm11669_vm4 = vmmov %vm11654_vm0 }
 0x419   :  { %5058 = vst [vmem:[#allocation4] ss:$8 sm:$0x1] %v5057_v14  ;;  %4156 = vadd.xlane.f32.xlu1 %v4155_v3  ;;  %v5079_v48 = vrot.slane %v3944_v59, %v11630_v10  ;;  %v3732_v16 = vsub.f32 %v11668_v57, %v7005_v24  ;;  %v4164_v20 = vsel %vm11669_vm4, %v3856_v13, 0.0  ;;  %v3861_v35 = vand.u32 2147483647, %v3733_v38  ;;  %vm11679_vm4 = vmmov %vm11654_vm0 }
 0x41a   :  { %v3953_v11 = vpop.xlane.xlu1 %3952  ;;  %v7006_v14 = vld [vmem:[%s11128_s0 + $0x308] sm:$0xff]  ;;  %v4170_v15 = vsel %vm11673_vm5, %v3858_v47, 0.0  ;;  %vm11682_vm5 = vmmov %vm11654_vm0 }
 0x41b   :  { %4153 = vadd.xlane.f32.xlu0 %v4152_v2  ;;  %v5084_v37 = vsel %vm4287_vm13, %v5083_v41, %v5079_v48  ;;  %v5093_v8 = vrot.slane %v3953_v11, %v11636_v19  ;;  %v11670_v59 = vld [vmem:[#allocation35_spill] sm:$0xff]  ;;  %v3860_v48 = vand.u32 2147483647, %v3732_v16  ;;  %v7007_v11 = vld [vmem:[%s11128_s0 + $0x300] sm:$0xff]  ;;  %v11672_v2 = vld [vmem:[#allocation61_spill] sm:$0xff]  ;;  %v4179_v43 = vsel %vm11675_vm11, %v3861_v35, 0.0 }
 0x41c   :  { %v3950_v45 = vpop.xlane.xlu0 %3949  ;;  %v3735_v3 = vsub.f32 %v11670_v59, %v7006_v14  ;;  %v3734_v36 = vsub.f32 %v11672_v2, %v7007_v11  ;;  %vm11683_vm11 = vcmask 720512  }
 0x41d   :  { %v5088_v25 = vrot.slane %v3950_v45, %v11632_v1  ;;  %4162 = vadd.xlane.f32.xlu1 %v4161_v4  ;;  %v7008_v4 = vld [vmem:[%s11128_s0 + $0x320] sm:$0xff]  ;;  %v4176_v38 = vsel %vm11654_vm0, %v3860_v48, 0.0 }
 0x41e   :  { %v3959_v49 = vpop.xlane.xlu1 %3958  ;;  %v3863_v45 = vand.u32 2147483647, %v3735_v3 }
 0x41f   :  { %v5089_v12 = vsel %vm4294_vm14, %v5088_v25, %v5084_v37  ;;  %4159 = vadd.xlane.f32.xlu0 %v4158_v33  ;;  %v5103_v50 = vrot.slane %v3959_v49, %v11640_v30  ;;  %v11674_v25 = vld [vmem:[#allocation65_spill] sm:$0xff]  ;;  %v3862_v49 = vand.u32 2147483647, %v3734_v36 }
 0x420   :  { %v3956_v22 = vpop.xlane.xlu0 %3955  ;;  %v5094_v29 = vsel %vm4301_vm2, %v5093_v8, %v5089_v12  ;;  %v3738_v13 = vsub.f32 %v11674_v25, %v7008_v4  ;;  %v7009_v33 = vld [vmem:[%s11128_s0 + $0x318] sm:$0xff]  ;;  %v11676_v12 = vld [vmem:[#allocation62_spill] sm:$0xff]  ;;  %v4185_v16 = vsel %vm11679_vm4, %v3863_v45, 0.0  ;;  %vm11687_vm4 = vmmov %vm11654_vm0 }
 0x421   :  { %v5098_v44 = vrot.slane %v3956_v22, %v11638_v34  ;;  %4168 = vadd.xlane.f32.xlu1 %v4167_v56  ;;  %v3737_v21 = vsub.f32 %v11676_v12, %v7009_v33  ;;  %v7010_v56 = vld [vmem:[%s11128_s0 + $0x330] sm:$0xff]  ;;  %v4182_v3 = vsel %vm11682_vm5, %v3862_v49, 0.0  ;;  %vm11691_vm5 = vmmov %vm11654_vm0 }
 0x422   :  { %v3965_v0 = vpop.xlane.xlu1 %3964  ;;  %v3866_v22 = vand.u32 2147483647, %v3738_v13 }
 0x423   :  { %v5099_v58 = vsel %vm4308_vm3, %v5098_v44, %v5094_v29  ;;  %4165 = vadd.xlane.f32.xlu0 %v4164_v20  ;;  %v5113_v54 = vrot.slane %v3965_v0, %v11643_v31  ;;  %v11678_v44 = vld [vmem:[#allocation67_spill] sm:$0xff]  ;;  %v3865_v0 = vand.u32 2147483647, %v3737_v21  ;;  %v7011_v20 = vld [vmem:[%s11128_s0 + $0x310] sm:$0xff] }
 0x424   :  { %v3962_v53 = vpop.xlane.xlu0 %3961  ;;  %v5104_v55 = vsel %vm4315_vm6, %v5103_v50, %v5099_v58  ;;  %v3740_v47 = vsub.f32 %v11678_v44, %v7010_v56  ;;  %v11680_v58 = vld [vmem:[#allocation63_spill] sm:$0xff]  ;;  %v4194_v36 = vsel %vm11654_vm0, %v3866_v22, 0.0 }
 0x425   :  { %v5108_v40 = vrot.slane %v3962_v53, %v11641_v9  ;;  %4174 = vadd.xlane.f32.xlu1 %v4173_v5  ;;  %v3736_v35 = vsub.f32 %v11680_v58, %v7011_v20  ;;  %v7012_v5 = vld [vmem:[%s11128_s0 + $0x340] sm:$0xff]  ;;  %v4191_v13 = vsel %vm11687_vm4, %v3865_v0, 0.0  ;;  %v11692_v0 = vld [vmem:[#allocation73_spill] sm:$0xff]  ;;  %vm11697_vm4 = vmmov %vm11654_vm0 }
 0x426   :  { %v3971_v51 = vpop.xlane.xlu1 %3970  ;;  %v3868_v53 = vand.u32 2147483647, %v3740_v47 }
 0x427   :  { %v5109_v41 = vsel %vm4322_vm7, %v5108_v40, %v5104_v55  ;;  %4171 = vadd.xlane.f32.xlu0 %v4170_v15  ;;  %v5123_v24 = vrot.slane %v3971_v51, %v8558_v18  ;;  %v11684_v40 = vld [vmem:[#allocation69_spill] sm:$0xff]  ;;  %v7013_v55 = vld [vmem:[%s11128_s0 + $0x328] sm:$0xff]  ;;  %v11685_v51 = vld [vmem:[#allocation64_spill] sm:$0xff]  ;;  %v3864_v45 = vand.u32 2147483647, %v3736_v35 }
 0x428   :  { %v3968_v63 = vpop.xlane.xlu0 %3967  ;;  %v5114_v23 = vsel %vm4329_vm10, %v5113_v54, %v5109_v41  ;;  %v3742_v48 = vsub.f32 %v11684_v40, %v7012_v5  ;;  %v3739_v15 = vsub.f32 %v11685_v51, %v7013_v55 }
 0x429   :  { %v5118_v37 = vrot.slane %v3968_v63, %v11645_v32  ;;  %4180 = vadd.xlane.f32.xlu1 %v4179_v43  ;;  %v7014_v43 = vld [vmem:[%s11128_s0 + $0x350] sm:$0xff] }
 0x42a   :  { %v3977_v26 = vpop.xlane.xlu1 %3976  ;;  %v3870_v63 = vand.u32 2147483647, %v3742_v48 }
 0x42b   :  { %v5119_v8 = vsel %vm11677_vm15, %v5118_v37, %v5114_v23  ;;  %4177 = vadd.xlane.f32.xlu0 %v4176_v38  ;;  %v5133_v11 = vrot.slane %v3977_v26, %v8602_v7  ;;  %vm11686_vm15 = vcmask 786112   ;;  %v11688_v37 = vld [vmem:[#allocation71_spill] sm:$0xff]  ;;  %v3867_v23 = vand.u32 2147483647, %v3739_v15  ;;  %v7015_v38 = vld [vmem:[%s11128_s0 + $0x338] sm:$0xff] }
 0x42c   :  { %v3974_v57 = vpop.xlane.xlu0 %3973  ;;  %v5124_v14 = vsel %vm11681_vm1, %v5123_v24, %v5119_v8  ;;  %v3744_v49 = vsub.f32 %v11688_v37, %v7014_v43  ;;  %vm11689_vm1 = vmmov %vm11654_vm0  ;;  %v11690_v8 = vld [vmem:[#allocation66_spill] sm:$0xff]  ;;  %v4188_v24 = vsel %vm11691_vm5, %v3864_v45, 0.0 }
 0x42d   :  { %v5128_v29 = vrot.slane %v3974_v57, %v8599_v39  ;;  %4186 = vadd.xlane.f32.xlu1 %v4185_v16  ;;  %v4200_v21 = vsel %vm11689_vm1, %v3868_v53, 0.0  ;;  %v3741_v22 = vsub.f32 %v11690_v8, %v7015_v38  ;;  %vm11699_vm1 = vmmov %vm11654_vm0 }
 0x42e   :  { %v3983_v59 = vpop.xlane.xlu1 %3982  ;;  %v3872_v16 = vand.u32 2147483647, %v3744_v49  ;;  %vm11701_vm5 = vmmov %vm11654_vm0 }
 0x42f   :  { %v5129_v50 = vsel %vm11683_vm11, %v5128_v29, %v5124_v14  ;;  %4183 = vadd.xlane.f32.xlu0 %v4182_v3  ;;  %v5143_v33 = vrot.slane %v3983_v59, %v8610_v27  ;;  %v7016_v29 = vld [vmem:[%s11128_s0 + $0x360] sm:$0xff]  ;;  %vm11693_vm11 = vcmask 1048512   ;;  %v4206_v14 = vsel %vm11654_vm0, %v3870_v63, 0.0  ;;  %v7017_v3 = vld [vmem:[%s11128_s0 + $0x348] sm:$0xff] }
 0x430   :  { %v3980_v2 = vpop.xlane.xlu0 %3979  ;;  %v5134_v4 = vsel %vm11686_vm15, %v5133_v11, %v5129_v50  ;;  %v3746_v20 = vsub.f32 %v11692_v0, %v7016_v29  ;;  %v3869_v59 = vand.u32 2147483647, %v3741_v22  ;;  %v11694_v50 = vld [vmem:[#allocation68_spill] sm:$0xff]  ;;  %vm11695_vm15 = vmmov %vm11654_vm0 }
 0x431   :  { %v5138_v41 = vrot.slane %v3980_v2, %v8607_v46  ;;  %4195 = vadd.xlane.f32.xlu1 %v4194_v36  ;;  %v3743_v53 = vsub.f32 %v11694_v50, %v7017_v3  ;;  %v4197_v48 = vsel %vm11695_vm15, %v3867_v23, 0.0  ;;  %v7018_v2 = vld [vmem:[%s11128_s0 + $0x370] sm:$0xff]  ;;  %v11696_v36 = vld [vmem:[#allocation75_spill] sm:$0xff]  ;;  %vm11706_vm15 = vmmov %vm11654_vm0 }
 0x432   :  { %v3989_v25 = vpop.xlane.xlu1 %3988  ;;  %v3874_v11 = vand.u32 2147483647, %v3746_v20  ;;  %v3748_v55 = vsub.f32 %v11696_v36, %v7018_v2  ;;  %v4203_v37 = vsel %vm11699_vm1, %v3869_v59, 0.0  ;;  %vm11710_vm1 = vmmov %vm11654_vm0 }
 0x433   :  { %v5139_v54 = vsel %vm4364_vm12, %v5138_v41, %v5134_v4  ;;  %4192 = vadd.xlane.f32.xlu0 %v4191_v13  ;;  %v5153_v56 = vrot.slane %v3989_v25, %v11657_v42  ;;  %v4212_v41 = vsel %vm11697_vm4, %v3872_v16, 0.0  ;;  %v3871_v4 = vand.u32 2147483647, %v3743_v53  ;;  %v7019_v25 = vld [vmem:[%s11128_s0 + $0x358] sm:$0xff]  ;;  %v11698_v13 = vld [vmem:[#allocation70_spill] sm:$0xff]  ;;  %vm11708_vm4 = vmmov %vm11654_vm0 }
 0x434   :  { %v3986_v12 = vpop.xlane.xlu0 %3985  ;;  %v5144_v44 = vsel %vm4371_vm8, %v5143_v33, %v5139_v54  ;;  %v3745_v54 = vsub.f32 %v11698_v13, %v7019_v25  ;;  %v3876_v33 = vand.u32 2147483647, %v3748_v55  ;;  %v4218_v8 = vsel %vm11701_vm5, %v3874_v11, 0.0 }
 0x435   :  { %v5148_v26 = vrot.slane %v3986_v12, %v8647_v28  ;;  %4201 = vadd.xlane.f32.xlu1 %v4200_v21  ;;  %v7020_v12 = vld [vmem:[%s11128_s0 + $0x388] sm:$0xff]  ;;  %v11700_v21 = vld [vmem:[#allocation76_spill] sm:$0xff]  ;;  %vm11711_vm5 = vcmask 589312  }
 0x436   :  { %v3995_v47 = vpop.xlane.xlu1 %3994  ;;  %v3751_v23 = vsub.f32 %v11700_v21, %v7020_v12  ;;  %v4224_v50 = vsel %vm11654_vm0, %v3876_v33, 0.0 }
 0x437   :  { %v5149_v57 = vsel %vm4378_vm9, %v5148_v26, %v5144_v44  ;;  %4189 = vadd.xlane.f32.xlu0 %v4188_v24  ;;  %v5181_v51 = vrot.slane %v3995_v47, %v11633_v60  ;;  %v7021_v44 = vld [vmem:[%s11128_s0 + $0x368] sm:$0xff]  ;;  %v11702_v47 = vld [vmem:[#allocation72_spill] sm:$0xff] }
 0x438   :  { %v5154_v58 = vsel %vm11693_vm11, %v5153_v56, %v5149_v57  ;;  %v3992_v35 = vpop.xlane.xlu0 %3991  ;;  %v3873_v56 = vand.u32 2147483647, %v3745_v54  ;;  %v3747_v24 = vsub.f32 %v11702_v47, %v7021_v44  ;;  %vm11703_vm11 = vmmov %vm11654_vm0  ;;  %v3879_v20 = vand.u32 2147483647, %v3751_v23 }
 0x439   :  { %5156 = vst [vmem:[#allocation4 + $0x1] ss:$8 sm:$0x1] %v5154_v58  ;;  %4207 = vadd.xlane.f32.xlu1 %v4206_v14  ;;  %v5177_v5 = vrot.slane %v3992_v35, %v11630_v10  ;;  %v4209_v29 = vsel %vm11703_vm11, %v3871_v4, 0.0  ;;  %v7022_v58 = vld [vmem:[%s11128_s0 + $0x398] sm:$0xff]  ;;  %v11704_v35 = vld [vmem:[#allocation78_spill] sm:$0xff]  ;;  %vm11713_vm11 = vmmov %vm11654_vm0 }
 0x43a   :  { %v4001_v40 = vpop.xlane.xlu1 %4000  ;;  %v3753_v14 = vsub.f32 %v11704_v35, %v7022_v58  ;;  %v4215_v55 = vsel %vm11706_vm15, %v3873_v56, 0.0  ;;  %v4233_v54 = vsel %vm11708_vm4, %v3879_v20, 0.0  ;;  %vm11715_vm0 = vcmask 654912   ;;  %vm11716_vm15 = vmmov %vm11710_vm1 }
 0x43b   :  { %4198 = vadd.xlane.f32.xlu0 %v4197_v48  ;;  %v5182_v63 = vsel %vm4287_vm13, %v5181_v51, %v5177_v5  ;;  %v5191_v26 = vrot.slane %v4001_v40, %v11636_v19  ;;  %v3875_v5 = vand.u32 2147483647, %v3747_v24  ;;  %v7023_v40 = vld [vmem:[%s11128_s0 + $0x380] sm:$0xff]  ;;  %v11705_v48 = vld [vmem:[#allocation77_spill] sm:$0xff]  ;;  %vm11717_vm4 = vcmask 720512  }
 0x43c   :  { %v3998_v15 = vpop.xlane.xlu0 %3997  ;;  %v3750_v11 = vsub.f32 %v11705_v48, %v7023_v40 }
 0x43d   :  { %v5186_v45 = vrot.slane %v3998_v15, %v11632_v1  ;;  %4213 = vadd.xlane.f32.xlu1 %v4212_v41  ;;  %v3881_v15 = vand.u32 2147483647, %v3753_v14  ;;  %v7024_v41 = vld [vmem:[%s11128_s0 + $0x390] sm:$0xff]  ;;  %v4221_v23 = vsel %vm11710_vm1, %v3875_v5, 0.0 }
 0x43e   :  { %v4007_v43 = vpop.xlane.xlu1 %4006 }
 0x43f   :  { %v5187_v49 = vsel %vm4294_vm14, %v5186_v45, %v5182_v63  ;;  %4204 = vadd.xlane.f32.xlu0 %v4203_v37  ;;  %v5201_v59 = vrot.slane %v4007_v43, %v11640_v30  ;;  %v11707_v45 = vld [vmem:[#allocation79_spill] sm:$0xff]  ;;  %v3878_v43 = vand.u32 2147483647, %v3750_v11  ;;  %v7025_v37 = vld [vmem:[%s11128_s0 + $0x3a0] sm:$0xff]  ;;  %v4239_v24 = vsel %vm11713_vm11, %v3881_v15, 0.0  ;;  %vm11721_vm11 = vmmov %vm11710_vm1 }
 0x440   :  { %v4004_v38 = vpop.xlane.xlu0 %4003  ;;  %v5192_v57 = vsel %vm4301_vm2, %v5191_v26, %v5187_v49  ;;  %v3752_v4 = vsub.f32 %v11707_v45, %v7024_v41  ;;  %v11709_v49 = vld [vmem:[#allocation81_spill] sm:$0xff] }
 0x441   :  { %v5196_v22 = vrot.slane %v4004_v38, %v11638_v34  ;;  %4219 = vadd.xlane.f32.xlu1 %v4218_v8  ;;  %v3754_v33 = vsub.f32 %v11709_v49, %v7025_v37  ;;  %v7026_v8 = vld [vmem:[%s11128_s0 + $0x3a8] sm:$0xff]  ;;  %v4230_v14 = vsel %vm11716_vm15, %v3878_v43, 0.0 }
 0x442   :  { %v4013_v16 = vpop.xlane.xlu1 %4012  ;;  %v3880_v38 = vand.u32 2147483647, %v3752_v4 }
 0x443   :  { %v5197_v0 = vsel %vm4308_vm3, %v5196_v22, %v5192_v57  ;;  %4210 = vadd.xlane.f32.xlu0 %v4209_v29  ;;  %v5211_v25 = vrot.slane %v4013_v16, %v11643_v31  ;;  %v11712_v22 = vld [vmem:[#allocation80_spill] sm:$0xff]  ;;  %v11714_v16 = vld [vmem:[#allocation83_spill] sm:$0xff]  ;;  %v3882_v20 = vand.u32 2147483647, %v3754_v33 }
 0x444   :  { %v4010_v3 = vpop.xlane.xlu0 %4009  ;;  %v5202_v2 = vsel %vm4315_vm6, %v5201_v59, %v5197_v0  ;;  %v3755_v56 = vsub.f32 %v11712_v22, %v7026_v8  ;;  %v7027_v57 = vld [vmem:[%s11128_s0 + $0x3b0] sm:$0xff]  ;;  %v4236_v11 = vsel %vm11710_vm1, %v3880_v38, 0.0 }
 0x445   :  { %v5206_v53 = vrot.slane %v4010_v3, %v11641_v9  ;;  %4225 = vadd.xlane.f32.xlu1 %v4224_v50  ;;  %v3756_v29 = vsub.f32 %v11714_v16, %v7027_v57  ;;  %v7028_v50 = vld [vmem:[%s11128_s0 + $0x3b8] sm:$0xff]  ;;  %v4242_v4 = vsel %vm11721_vm11, %v3882_v20, 0.0  ;;  %v11725_v57 = vld [vmem:[#allocation86_spill] sm:$0xff] }
 0x446   :  { %v4019_v36 = vpop.xlane.xlu1 %4018  ;;  %v3883_v3 = vand.u32 2147483647, %v3755_v56 }
 0x447   :  { %v5207_v51 = vsel %vm4322_vm7, %v5206_v53, %v5202_v2  ;;  %4216 = vadd.xlane.f32.xlu0 %v4215_v55  ;;  %v5221_v44 = vrot.slane %v4019_v36, %v8558_v18  ;;  %v11718_v53 = vld [vmem:[#allocation82_spill] sm:$0xff]  ;;  %v3884_v2 = vand.u32 2147483647, %v3756_v29 }
 0x448   :  { %v4016_v13 = vpop.xlane.xlu0 %4015  ;;  %v5212_v12 = vsel %vm4329_vm10, %v5211_v25, %v5207_v51  ;;  %v3757_v5 = vsub.f32 %v11718_v53, %v7028_v50  ;;  %v7029_v55 = vld [vmem:[%s11128_s0 + $0x3c0] sm:$0xff]  ;;  %v11719_v51 = vld [vmem:[#allocation85_spill] sm:$0xff]  ;;  %v7034_v53 = vld [vmem:[%s11128_s0 + $0x3e8] sm:$0xff] }
 0x449   :  { %v5216_v63 = vrot.slane %v4016_v13, %v11645_v32  ;;  %4234 = vadd.xlane.f32.xlu1 %v4233_v54  ;;  %v3758_v15 = vsub.f32 %v11719_v51, %v7029_v55  ;;  %v7030_v54 = vld [vmem:[%s11128_s0 + $0x3c8] sm:$0xff] }
 0x44a   :  { %v4025_v21 = vpop.xlane.xlu1 %4024  ;;  %v3885_v13 = vand.u32 2147483647, %v3757_v5  ;;  %v3763_v5 = vsub.f32 %v10247_v61, %v7034_v53 }
 0x44b   :  { %v5217_v26 = vsel %vm11711_vm5, %v5216_v63, %v5212_v12  ;;  %4222 = vadd.xlane.f32.xlu0 %v4221_v23  ;;  %v5231_v40 = vrot.slane %v4025_v21, %v8602_v7  ;;  %vm11720_vm5 = vcmask 786112   ;;  %v11722_v63 = vld [vmem:[#allocation84_spill] sm:$0xff]  ;;  %v3886_v23 = vand.u32 2147483647, %v3758_v15 }
 0x44c   :  { %v4022_v47 = vpop.xlane.xlu0 %4021  ;;  %v5222_v58 = vsel %vm11715_vm0, %v5221_v44, %v5217_v26  ;;  %v3759_v43 = vsub.f32 %v11722_v63, %v7030_v54  ;;  %vm11723_vm0 = vmmov %vm11710_vm1  ;;  %v7031_v26 = vld [vmem:[%s11128_s0 + $0x3d0] sm:$0xff] }
 0x44d   :  { %v5226_v0 = vrot.slane %v4022_v47, %v8599_v39  ;;  %4240 = vadd.xlane.f32.xlu1 %v4239_v24  ;;  %v4245_v33 = vsel %vm11723_vm0, %v3883_v3, 0.0  ;;  %vm11724_vm15 = vmmov %vm11723_vm0  ;;  %v3760_v38 = vsub.f32 %v10225_v52, %v7031_v26  ;;  %v7032_v24 = vld [vmem:[%s11128_s0 + $0x3d8] sm:$0xff] }
 0x44e   :  { %v4031_v35 = vpop.xlane.xlu1 %4030  ;;  %v4248_v21 = vsel %vm11724_vm15, %v3884_v2, 0.0  ;;  %v3887_v47 = vand.u32 2147483647, %v3759_v43  ;;  %v3761_v16 = vsub.f32 %v11725_v57, %v7032_v24  ;;  %vm11727_vm1 = vmmov %vm11723_vm0  ;;  %v7037_v43 = vld [vmem:[%s11128_s0 + $0x378] sm:$0xff] }
 0x44f   :  { %v5227_v59 = vsel %vm11717_vm4, %v5226_v0, %v5222_v58  ;;  %4231 = vadd.xlane.f32.xlu0 %v4230_v14  ;;  %v5241_v37 = vrot.slane %v4031_v35, %v8610_v27  ;;  %vm11726_vm4 = vcmask 1048512   ;;  %v4251_v52 = vsel %vm11727_vm1, %v3885_v13, 0.0  ;;  %v7033_v58 = vld [vmem:[%s11128_s0 + $0x3e0] sm:$0xff]  ;;  %vm11729_vm11 = vmmov %vm11723_vm0 }
 0x450   :  { %v4028_v48 = vpop.xlane.xlu0 %4027  ;;  %v5232_v41 = vsel %vm11720_vm5, %v5231_v40, %v5227_v59  ;;  %v3888_v20 = vand.u32 2147483647, %v3760_v38  ;;  %v3762_v35 = vsub.f32 %v10259_v6, %v7033_v58  ;;  %vm11728_vm5 = vmmov %vm11723_vm0  ;;  %v3889_v50 = vand.u32 2147483647, %v3761_v16 }
 0x451   :  { %v5236_v36 = vrot.slane %v4028_v48, %v8607_v46  ;;  %4237 = vadd.xlane.f32.xlu1 %v4236_v11  ;;  %v4254_v3 = vsel %vm11728_vm5, %v3886_v23, 0.0  ;;  %v4257_v11 = vsel %vm11729_vm11, %v3887_v47, 0.0  ;;  %vm11730_vm15 = vmmov %vm11723_vm0 }
 0x452   :  { %v4037_v45 = vpop.xlane.xlu1 %4036  ;;  %v3890_v2 = vand.u32 2147483647, %v3762_v35  ;;  %v4260_v61 = vsel %vm11723_vm0, %v3888_v20, 0.0  ;;  %vm11733_vm1 = vmmov %vm11723_vm0 }
 0x453   :  { %v5237_v25 = vsel %vm4364_vm12, %v5236_v36, %v5232_v41  ;;  %4243 = vadd.xlane.f32.xlu0 %v4242_v4  ;;  %v5251_v8 = vrot.slane %v4037_v45, %v11657_v42  ;;  %v7035_v36 = vld [vmem:[%s11128_s0 + $0x3f0] sm:$0xff]  ;;  %v3891_v45 = vand.u32 2147483647, %v3763_v5  ;;  %v7036_v4 = vld [vmem:[%s11128_s0 + $0x3f8] sm:$0xff]  ;;  %vm11734_vm5 = vmmov %vm11723_vm0  ;;  %s7083_s0 = smov [#allocation2]  }
 0x454   :  { %v4034_v49 = vpop.xlane.xlu0 %4033  ;;  %v5242_v22 = vsel %vm4371_vm8, %v5241_v37, %v5237_v25  ;;  %v3764_v55 = vsub.f32 %v10293_v17, %v7035_v36  ;;  %v3765_v25 = vsub.f32 %v10281_v62, %v7036_v4  ;;  %v4263_v17 = vsel %vm11730_vm15, %v3889_v50, 0.0  ;;  %v11731_v37 = vld [vmem:[#allocation74_spill] sm:$0xff]  ;;  %vm11735_vm11 = vmmov %vm11723_vm0  ;;  %s5754_s8 = sshll.u32 %s7083_s0, 4  ;;  %s5755_s8 = int_to_ptr.vmem [resolvable:$true] %s5754_s8 }
 0x455   :  { %v5246_v12 = vrot.slane %v4034_v49, %v8647_v28  ;;  %4246 = vadd.xlane.f32.xlu1 %v4245_v33  ;;  %v3749_v49 = vsub.f32 %v11731_v37, %v7037_v43  ;;  %vm11736_vm15 = vcmask 589312   ;;  %s7038_s9 = scalar_lea.vmem %s5755_s8, 128  ;;  %p7043_p1 = scmp.lt.s32.totalorder %s5755_s8, %s5755_s8 }
 0x456   :  { %v4043_v56 = vpop.xlane.xlu1 %4042  ;;  %v3892_v33 = vand.u32 2147483647, %v3764_v55  ;;  %v3893_v26 = vand.u32 2147483647, %v3765_v25  ;;  %p7039_p0 = scmp.ne.s32.totalorder %s5755_s8, %s7038_s9  ;;  %p7044_p2 = scmp.lt.s32.totalorder %s7038_s9, %s7038_s9 }
 0x457   :  { %v5247_v44 = vsel %vm4378_vm9, %v5246_v12, %v5242_v22  ;;  %4249 = vadd.xlane.f32.xlu0 %v4248_v21  ;;  %v5279_v40 = vrot.slane %v4043_v56, %v11633_v60  ;;  %v4269_v22 = vsel %vm11733_vm1, %v3891_v45, 0.0  ;;  %vm11738_vm1 = vcmask 720512  }
 0x458   :  { %v5252_v29 = vsel %vm11726_vm4, %v5251_v8, %v5247_v44  ;;  %v4040_v0 = vpop.xlane.xlu0 %4039  ;;  %vm11732_vm4 = vmmov %vm11723_vm0  ;;  %v3877_v44 = vand.u32 2147483647, %v3749_v49  ;;  %v4272_v57 = vsel %vm11734_vm5, %v3892_v33, 0.0  ;;  %vm11739_vm5 = vcmask 786112   ;;  %p7045_p3 = por %p7044_p2, %p7043_p1 }
 0x459   :  { %5254 = vst [vmem:[#allocation4 + $0x2] ss:$8 sm:$0x1] %v5252_v29  ;;  %4252 = vadd.xlane.f32.xlu1 %v4251_v52  ;;  %v5275_v14 = vrot.slane %v4040_v0, %v11630_v10  ;;  %v4266_v62 = vsel %vm11732_vm4, %v3890_v2, 0.0  ;;  %v4275_v52 = vsel %vm11735_vm11, %v3893_v26, 0.0  ;;  %vm11737_vm4 = vcmask 654912  }
 0x45a   :  { %v4049_v59 = vpop.xlane.xlu1 %4048  ;;  %vm11740_vm11 = vcmask 1048512   ;;  %p7046_p4 = pnand %p7045_p3, %p7039_p0 }
 0x45b   :  { %4255 = vadd.xlane.f32.xlu0 %v4254_v3  ;;  %v5280_v51 = vsel %vm4287_vm13, %v5279_v40, %v5275_v14  ;;  %v5289_v13 = vrot.slane %v4049_v59, %v11636_v19  ;;  %v4227_v14 = vsel %vm11723_vm0, %v3877_v44, 0.0 }
 0x45c   :  { %v4046_v48 = vpop.xlane.xlu0 %4045 }
 0x45d   :  { %v5284_v6 = vrot.slane %v4046_v48, %v11632_v1  ;;  %4258 = vadd.xlane.f32.xlu1 %v4257_v11 }
 0x45e   :  { %v4055_v15 = vpop.xlane.xlu1 %4054 }
 0x45f   :  { %v5285_v41 = vsel %vm4294_vm14, %v5284_v6, %v5280_v51  ;;  %4261 = vadd.xlane.f32.xlu0 %v4260_v61  ;;  %v5299_v38 = vrot.slane %v4055_v15, %v11640_v30 }
 0x460   :  { %v4052_v54 = vpop.xlane.xlu0 %4051  ;;  %v5290_v12 = vsel %vm4301_vm2, %v5289_v13, %v5285_v41 }
 0x461   :  { %v5294_v63 = vrot.slane %v4052_v54, %v11638_v34  ;;  %4264 = vadd.xlane.f32.xlu1 %v4263_v17 }
 0x462   :  { %v4061_v21 = vpop.xlane.xlu1 %4060 }
 0x463   :  { %v5295_v23 = vsel %vm4308_vm3, %v5294_v63, %v5290_v12  ;;  %4267 = vadd.xlane.f32.xlu0 %v4266_v62  ;;  %v5309_v29 = vrot.slane %v4061_v21, %v11643_v31 }
 0x464   :  { %v4058_v8 = vpop.xlane.xlu0 %4057  ;;  %v5300_v47 = vsel %vm4315_vm6, %v5299_v38, %v5295_v23 }
 0x465   :  { %v5304_v56 = vrot.slane %v4058_v8, %v11641_v9  ;;  %4270 = vadd.xlane.f32.xlu1 %v4269_v22 }
 0x466   :  { %v4067_v24 = vpop.xlane.xlu1 %4066 }
 0x467   :  { %v5305_v16 = vsel %vm4322_vm7, %v5304_v56, %v5300_v47  ;;  %4273 = vadd.xlane.f32.xlu0 %v4272_v57  ;;  %v5319_v3 = vrot.slane %v4067_v24, %v8558_v18 }
 0x468   :  { %v4064_v0 = vpop.xlane.xlu0 %4063  ;;  %v5310_v58 = vsel %vm4329_vm10, %v5309_v29, %v5305_v16 }
 0x469   :  { %v5314_v20 = vrot.slane %v4064_v0, %v11645_v32  ;;  %4276 = vadd.xlane.f32.xlu1 %v4275_v52 }
 0x46a   :  { %v4073_v35 = vpop.xlane.xlu1 %4072 }
 0x46b   :  { %v5315_v59 = vsel %vm11736_vm15, %v5314_v20, %v5310_v58  ;;  %4228 = vadd.xlane.f32.xlu0 %v4227_v14  ;;  %v5329_v11 = vrot.slane %v4073_v35, %v8602_v7 }
 0x46c   :  { %v4070_v50 = vpop.xlane.xlu0 %4069  ;;  %v5320_v5 = vsel %vm11737_vm4, %v5319_v3, %v5315_v59 }
 0x46d   :  { %v5324_v53 = vrot.slane %v4070_v50, %v8599_v39 }
 0x46e   :  { %v4079_v40 = vpop.xlane.xlu1 %4078 }
 0x46f   :  { %v5325_v48 = vsel %vm11738_vm1, %v5324_v53, %v5320_v5  ;;  %v5339_v15 = vrot.slane %v4079_v40, %v8610_v27 }
 0x470   :  { %v4076_v6 = vpop.xlane.xlu0 %4075  ;;  %v5330_v36 = vsel %vm11739_vm5, %v5329_v11, %v5325_v48 }
 0x471   :  { %v5334_v2 = vrot.slane %v4076_v6, %v8607_v46 }
 0x472   :  { %v4085_v55 = vpop.xlane.xlu1 %4084 }
 0x473   :  { %v5335_v51 = vsel %vm4364_vm12, %v5334_v2, %v5330_v36  ;;  %v5349_v45 = vrot.slane %v4085_v55, %v11657_v42 }
 0x474   :  { %v4082_v61 = vpop.xlane.xlu0 %4081  ;;  %v5340_v4 = vsel %vm4371_vm8, %v5339_v15, %v5335_v51 }
 0x475   :  { %v5344_v41 = vrot.slane %v4082_v61, %v8647_v28 }
 0x476   :  { %v4091_v25 = vpop.xlane.xlu1 %4090 }
 0x477   :  { %v5345_v13 = vsel %vm4378_vm9, %v5344_v41, %v5340_v4 }
 0x478   :  { %v5350_v54 = vsel %vm11740_vm11, %v5349_v45, %v5345_v13  ;;  %v4088_v17 = vpop.xlane.xlu0 %4087 }
 0x479   :  { %5352 = vst [vmem:[#allocation4 + $0x3] ss:$8 sm:$0x1] %v5350_v54  ;;  %v5373_v63 = vrot.slane %v4088_v17, %v11630_v10 }
 0x47a   :  { %v4097_v43 = vpop.xlane.xlu1 %4096 }
 0x47b   :  { %7049 = shalt.err (!%p7046_p4)
}
 0x47c   :  { %5757 = dma.vmem_to_hbm [thread:$0]  %s5755_s8, 128, %s11133_s5, [#allocation3]   ;;  %v5377_v37 = vrot.slane %v4091_v25, %v11633_v60  ;;  %v4094_v49 = vpop.xlane.xlu0 %4093  ;;  %v5387_v23 = vrot.slane %v4097_v43, %v11636_v19  ;;  %vm11741_vm0 = vmmov %vm11736_vm15 }
 0x47d   :  { %v5382_v33 = vrot.slane %v4094_v49, %v11632_v1  ;;  %vm11742_vm15 = vmmov %vm11737_vm4  ;;  %s7084_s5 = smov [#allocation4]  }
 0x47e   :  { %v5378_v12 = vsel %vm4287_vm13, %v5377_v37, %v5373_v63  ;;  %v4103_v21 = vpop.xlane.xlu1 %4102  ;;  %vm11743_vm4 = vmmov %vm11738_vm1  ;;  %s5764_s12 = sshll.u32 %s7084_s5, 4  ;;  %s5765_s12 = int_to_ptr.vmem [resolvable:$true] %s5764_s12 }
 0x47f   :  { %v5383_v62 = vsel %vm4294_vm14, %v5382_v33, %v5378_v12  ;;  %v5397_v44 = vrot.slane %v4103_v21, %v11640_v30  ;;  %vm11744_vm1 = vmmov %vm11739_vm5  ;;  %s7058_s13 = scalar_lea.vmem %s5765_s12, 128  ;;  %p7063_p6 = scmp.lt.s32.totalorder %s5765_s12, %s5765_s12 }
 0x480   :  { %v4100_v26 = vpop.xlane.xlu0 %4099  ;;  %v5388_v8 = vsel %vm4301_vm2, %v5387_v23, %v5383_v62  ;;  %vm11745_vm5 = vmmov %vm11740_vm11  ;;  %p7059_p5 = scmp.ne.s32.totalorder %s5765_s12, %s7058_s13  ;;  %p7064_p7 = scmp.lt.s32.totalorder %s7058_s13, %s7058_s13 }
 0x481   :  { %v5392_v38 = vrot.slane %v4100_v26, %v11638_v34  ;;  %vm11746_vm11 = vmmov %vm11741_vm0 }
 0x482   :  { %v4109_v22 = vpop.xlane.xlu1 %4108  ;;  %p7065_p8 = por %p7064_p7, %p7063_p6 }
 0x483   :  { %v5393_v56 = vsel %vm4308_vm3, %v5392_v38, %v5388_v8  ;;  %v5407_v0 = vrot.slane %v4109_v22, %v11643_v31 }
 0x484   :  { %v4106_v47 = vpop.xlane.xlu0 %4105  ;;  %v5398_v57 = vsel %vm4315_vm6, %v5397_v44, %v5393_v56  ;;  %p7066_p9 = pnand %p7065_p8, %p7059_p5 }
 0x485   :  { %v5402_v24 = vrot.slane %v4106_v47, %v11641_v9 }
 0x486   :  { %v4115_v16 = vpop.xlane.xlu1 %4114 }
 0x487   :  { %v5403_v29 = vsel %vm4322_vm7, %v5402_v24, %v5398_v57  ;;  %v5417_v59 = vrot.slane %v4115_v16, %v8558_v18 }
 0x488   :  { %v4112_v52 = vpop.xlane.xlu0 %4111  ;;  %v5408_v58 = vsel %vm4329_vm10, %v5407_v0, %v5403_v29 }
 0x489   :  { %v5412_v20 = vrot.slane %v4112_v52, %v11645_v32 }
 0x48a   :  { %v4121_v35 = vpop.xlane.xlu1 %4120 }
 0x48b   :  { %v5413_v14 = vsel %vm11741_vm0, %v5412_v20, %v5408_v58  ;;  %v5427_v48 = vrot.slane %v4121_v35, %v8602_v7  ;;  %vm11747_vm0 = vmmov %vm11742_vm15 }
 0x48c   :  { %v4118_v3 = vpop.xlane.xlu0 %4117  ;;  %v5418_v53 = vsel %vm11742_vm15, %v5417_v59, %v5413_v14  ;;  %vm11748_vm15 = vmmov %vm11743_vm4 }
 0x48d   :  { %v5422_v50 = vrot.slane %v4118_v3, %v8599_v39 }
 0x48e   :  { %v4127_v5 = vpop.xlane.xlu1 %4126 }
 0x48f   :  { %v5423_v40 = vsel %vm11743_vm4, %v5422_v50, %v5418_v53  ;;  %v5437_v51 = vrot.slane %v4127_v5, %v8610_v27  ;;  %vm11749_vm4 = vmmov %vm11744_vm1 }
 0x490   :  { %v4124_v11 = vpop.xlane.xlu0 %4123  ;;  %v5428_v2 = vsel %vm11744_vm1, %v5427_v48, %v5423_v40  ;;  %vm11750_vm1 = vmmov %vm11745_vm5 }
 0x491   :  { %v5432_v6 = vrot.slane %v4124_v11, %v8607_v46 }
 0x492   :  { %v4133_v36 = vpop.xlane.xlu1 %4132 }
 0x493   :  { %v5433_v55 = vsel %vm4364_vm12, %v5432_v6, %v5428_v2  ;;  %v5447_v41 = vrot.slane %v4133_v36, %v11657_v42 }
 0x494   :  { %v4130_v15 = vpop.xlane.xlu0 %4129  ;;  %v5438_v45 = vsel %vm4371_vm8, %v5437_v51, %v5433_v55 }
 0x495   :  { %v5442_v61 = vrot.slane %v4130_v15, %v8647_v28 }
 0x496   :  { %v4139_v4 = vpop.xlane.xlu1 %4138 }
 0x497   :  { %v5443_v25 = vsel %vm4378_vm9, %v5442_v61, %v5438_v45  ;;  %v5475_v43 = vrot.slane %v4139_v4, %v11633_v60 }
 0x498   :  { %v5448_v13 = vsel %vm11745_vm5, %v5447_v41, %v5443_v25  ;;  %v4136_v54 = vpop.xlane.xlu0 %4135  ;;  %vm11758_vm5 = vmmov %vm11749_vm4 }
 0x499   :  { %5450 = vst [vmem:[#allocation4 + $0x4] ss:$8 sm:$0x1] %v5448_v13  ;;  %v5471_v17 = vrot.slane %v4136_v54, %v11630_v10 }
 0x49a   :  { %v4145_v63 = vpop.xlane.xlu1 %4144 }
 0x49b   :  { %v5476_v33 = vsel %vm4287_vm13, %v5475_v43, %v5471_v17  ;;  %v5485_v62 = vrot.slane %v4145_v63, %v11636_v19 }
 0x49c   :  { %v4142_v37 = vpop.xlane.xlu0 %4141 }
 0x49d   :  { %v5480_v49 = vrot.slane %v4142_v37, %v11632_v1 }
 0x49e   :  { %v4151_v12 = vpop.xlane.xlu1 %4150 }
 0x49f   :  { %v5481_v21 = vsel %vm4294_vm14, %v5480_v49, %v5476_v33  ;;  %v5495_v56 = vrot.slane %v4151_v12, %v11640_v30 }
 0x4a0   :  { %v4148_v23 = vpop.xlane.xlu0 %4147  ;;  %v5486_v38 = vsel %vm4301_vm2, %v5485_v62, %v5481_v21 }
 0x4a1   :  { %v5490_v26 = vrot.slane %v4148_v23, %v11638_v34 }
 0x4a2   :  { %v4157_v8 = vpop.xlane.xlu1 %4156 }
 0x4a3   :  { %v5491_v22 = vsel %vm4308_vm3, %v5490_v26, %v5486_v38  ;;  %v5505_v29 = vrot.slane %v4157_v8, %v11643_v31 }
 0x4a4   :  { %v4154_v44 = vpop.xlane.xlu0 %4153  ;;  %v5496_v24 = vsel %vm4315_vm6, %v5495_v56, %v5491_v22 }
 0x4a5   :  { %v5500_v47 = vrot.slane %v4154_v44, %v11641_v9 }
 0x4a6   :  { %v4163_v57 = vpop.xlane.xlu1 %4162 }
 0x4a7   :  { %v5501_v16 = vsel %vm4322_vm7, %v5500_v47, %v5496_v24  ;;  %v5515_v14 = vrot.slane %v4163_v57, %v8558_v18 }
 0x4a8   :  { %v4160_v0 = vpop.xlane.xlu0 %4159  ;;  %v5506_v20 = vsel %vm4329_vm10, %v5505_v29, %v5501_v16 }
 0x4a9   :  { %v5510_v52 = vrot.slane %v4160_v0, %v11645_v32 }
 0x4aa   :  { %v4169_v58 = vpop.xlane.xlu1 %4168 }
 0x4ab   :  { %v5511_v35 = vsel %vm11746_vm11, %v5510_v52, %v5506_v20  ;;  %v5525_v40 = vrot.slane %v4169_v58, %v8602_v7 }
 0x4ac   :  { %v4166_v59 = vpop.xlane.xlu0 %4165  ;;  %v5516_v50 = vsel %vm11747_vm0, %v5515_v14, %v5511_v35 }
 0x4ad   :  { %v5520_v3 = vrot.slane %v4166_v59, %v8599_v39 }
 0x4ae   :  { %v4175_v53 = vpop.xlane.xlu1 %4174 }
 0x4af   :  { %v5521_v5 = vsel %vm11748_vm15, %v5520_v3, %v5516_v50  ;;  %v5535_v55 = vrot.slane %v4175_v53, %v8610_v27 }
 0x4b0   :  { %v4172_v48 = vpop.xlane.xlu0 %4171  ;;  %v5526_v6 = vsel %vm11749_vm4, %v5525_v40, %v5521_v5 }
 0x4b1   :  { %v5530_v11 = vrot.slane %v4172_v48, %v8607_v46 }
 0x4b2   :  { %v4181_v2 = vpop.xlane.xlu1 %4180 }
 0x4b3   :  { %v5531_v36 = vsel %vm4364_vm12, %v5530_v11, %v5526_v6  ;;  %v5545_v61 = vrot.slane %v4181_v2, %v11657_v42 }
 0x4b4   :  { %v4178_v51 = vpop.xlane.xlu0 %4177  ;;  %v5536_v41 = vsel %vm4371_vm8, %v5535_v55, %v5531_v36 }
 0x4b5   :  { %v5540_v15 = vrot.slane %v4178_v51, %v8647_v28 }
 0x4b6   :  { %v4187_v45 = vpop.xlane.xlu1 %4186 }
 0x4b7   :  { %v5541_v4 = vsel %vm4378_vm9, %v5540_v15, %v5536_v41  ;;  %v5573_v47 = vrot.slane %v4187_v45, %v11633_v60 }
 0x4b8   :  { %v5546_v25 = vsel %vm11750_vm1, %v5545_v61, %v5541_v4  ;;  %v4184_v13 = vpop.xlane.xlu0 %4183 }
 0x4b9   :  { %5548 = vst [vmem:[#allocation4 + $0x5] ss:$8 sm:$0x1] %v5546_v25  ;;  %v5569_v22 = vrot.slane %v4184_v13, %v11630_v10 }
 0x4ba   :  { %v4196_v54 = vpop.xlane.xlu1 %4195 }
 0x4bb   :  { %v5574_v57 = vsel %vm4287_vm13, %v5573_v47, %v5569_v22 }
 0x4bc   :  { %v4193_v17 = vpop.xlane.xlu0 %4192 }
 0x4bd   :  { %v5583_v20 = vrot.slane %v4193_v17, %v11636_v19 }
 0x4be   :  { %v4202_v63 = vpop.xlane.xlu1 %4201 }
 0x4bf   :  { %v5598_v61 = vrot.slane %v4202_v63, %v11641_v9 }
 0x4c0   :  { %v4190_v43 = vpop.xlane.xlu0 %4189 }
 0x4c1   :  { %v5578_v56 = vrot.slane %v4190_v43, %v11632_v1 }
 0x4c2   :  { %v4208_v37 = vpop.xlane.xlu1 %4207 }
 0x4c3   :  { %v5579_v0 = vsel %vm4294_vm14, %v5578_v56, %v5574_v57 }
 0x4c4   :  { %v4199_v49 = vpop.xlane.xlu0 %4198  ;;  %v5584_v3 = vsel %vm4301_vm2, %v5583_v20, %v5579_v0 }
 0x4c5   :  { %v5593_v40 = vrot.slane %v4199_v49, %v11640_v30 }
 0x4c6   :  { %v11048_v33 = vpop.xlane.xlu1 %4213 }
 0x4c8   :  { %v4205_v12 = vpop.xlane.xlu0 %4204 }
 0x4ca   :  { %v11050_v21 = vpop.xlane.xlu1 %4219 }
 0x4cc   :  { %v4211_v62 = vpop.xlane.xlu0 %4210 }
 0x4ce   :  { %v11052_v23 = vpop.xlane.xlu1 %4225 }
 0x4d0   :  { %v11054_v26 = vpop.xlane.xlu0 %4216 }
 0x4d1   :  { %v5623_v56 = vrot.slane %v11054_v26, %v8602_v7 }
 0x4d2   :  { %v4235_v38 = vpop.xlane.xlu1 %4234 }
 0x4d3   :  { %v5671_v16 = vrot.slane %v4235_v38, %v11633_v60 }
 0x4d4   :  { %v11056_v8 = vpop.xlane.xlu0 %4222 }
 0x4d5   :  { %v5633_v26 = vrot.slane %v11056_v8, %v8610_v27 }
 0x4d6   :  { %v4241_v44 = vpop.xlane.xlu1 %4240 }
 0x4d7   :  { %v5681_v14 = vrot.slane %v4241_v44, %v11636_v19 }
 0x4d8   :  { %v4232_v24 = vpop.xlane.xlu0 %4231 }
 0x4d9   :  { %v5667_v29 = vrot.slane %v4232_v24, %v11630_v10  ;;  %v5588_v10 = vrot.slane %v4196_v54, %v11638_v34  ;;  %v5613_v54 = vrot.slane %v4211_v62, %v8558_v18 }
 0x4da   :  { %v4238_v52 = vpop.xlane.xlu1 %4237 }
 0x4db   :  { %v5672_v58 = vsel %vm4287_vm13, %v5671_v16, %v5667_v29  ;;  %v5676_v35 = vrot.slane %v4238_v52, %v11632_v1  ;;  %v5589_v19 = vsel %vm4308_vm3, %v5588_v10, %v5584_v3  ;;  %vm11751_vm13 = vmmov %vm11746_vm11 }
 0x4dc   :  { %v4244_v59 = vpop.xlane.xlu0 %4243  ;;  %v5594_v55 = vsel %vm4315_vm6, %v5593_v40, %v5589_v19 }
 0x4dd   :  { %v5677_v50 = vsel %vm4294_vm14, %v5676_v35, %v5672_v58  ;;  %v5686_v60 = vrot.slane %v4244_v59, %v11638_v34  ;;  %v5603_v34 = vrot.slane %v4205_v12, %v11643_v31  ;;  %v5599_v4 = vsel %vm4322_vm7, %v5598_v61, %v5594_v55  ;;  %vm11752_vm14 = vmmov %vm11747_vm0 }
 0x4de   :  { %v5682_v53 = vsel %vm4301_vm2, %v5681_v14, %v5677_v50  ;;  %v4247_v5 = vpop.xlane.xlu1 %4246  ;;  %vm11753_vm2 = vmmov %vm11746_vm11 }
 0x4df   :  { %v5687_v48 = vsel %vm4308_vm3, %v5686_v60, %v5682_v53  ;;  %v5691_v1 = vrot.slane %v4247_v5, %v11640_v30  ;;  %v5604_v13 = vsel %vm4329_vm10, %v5603_v34, %v5599_v4  ;;  %vm11754_vm3 = vmmov %vm11747_vm0 }
 0x4e0   :  { %v4250_v11 = vpop.xlane.xlu0 %4249  ;;  %vm11759_vm11 = vmmov %vm11750_vm1 }
 0x4e1   :  { %v5692_v6 = vsel %vm4315_vm6, %v5691_v1, %v5687_v48  ;;  %v5696_v2 = vrot.slane %v4250_v11, %v11641_v9  ;;  %vm11755_vm6 = vmmov %vm11748_vm15 }
 0x4e2   :  { %v4253_v36 = vpop.xlane.xlu1 %4252 }
 0x4e3   :  { %v5697_v51 = vsel %vm4322_vm7, %v5696_v2, %v5692_v6  ;;  %v5701_v15 = vrot.slane %v4253_v36, %v11643_v31  ;;  %v5608_v31 = vrot.slane %v4208_v37, %v11645_v32  ;;  %vm11756_vm7 = vmmov %vm11749_vm4 }
 0x4e4   :  { %v4256_v41 = vpop.xlane.xlu0 %4255 }
 0x4e5   :  { %v5702_v30 = vsel %vm4329_vm10, %v5701_v15, %v5697_v51  ;;  %v5706_v45 = vrot.slane %v4256_v41, %v11645_v32  ;;  %v5609_v12 = vsel %vm11753_vm2, %v5608_v31, %v5604_v13  ;;  %vm11757_vm10 = vmmov %vm11755_vm6 }
 0x4e6   :  { %v4259_v25 = vpop.xlane.xlu1 %4258  ;;  %v5614_v22 = vsel %vm11754_vm3, %v5613_v54, %v5609_v12 }
 0x4e7   :  { %v5707_v17 = vsel %vm11751_vm13, %v5706_v45, %v5702_v30  ;;  %v5711_v43 = vrot.slane %v4259_v25, %v8558_v18  ;;  %v5618_v18 = vrot.slane %v11048_v33, %v8599_v39 }
 0x4e8   :  { %v4262_v49 = vpop.xlane.xlu0 %4261 }
 0x4e9   :  { %v5712_v9 = vsel %vm11752_vm14, %v5711_v43, %v5707_v17  ;;  %v5716_v63 = vrot.slane %v4262_v49, %v8599_v39  ;;  %v5619_v24 = vsel %vm11757_vm10, %v5618_v18, %v5614_v22  ;;  %v5628_v39 = vrot.slane %v11050_v21, %v8607_v46 }
 0x4ea   :  { %v4265_v38 = vpop.xlane.xlu1 %4264  ;;  %v5624_v16 = vsel %vm11758_vm5, %v5623_v56, %v5619_v24 }
 0x4eb   :  { %v5717_v62 = vsel %vm11755_vm6, %v5716_v63, %v5712_v9  ;;  %v5721_v44 = vrot.slane %v4265_v38, %v8602_v7  ;;  %v5629_v20 = vsel %vm4364_vm12, %v5628_v39, %v5624_v16 }
 0x4ec   :  { %v4268_v32 = vpop.xlane.xlu0 %4267  ;;  %v5634_v35 = vsel %vm4371_vm8, %v5633_v26, %v5629_v20 }
 0x4ed   :  { %v5722_v37 = vsel %vm11756_vm7, %v5721_v44, %v5717_v62  ;;  %v5726_v47 = vrot.slane %v4268_v32, %v8607_v46 }
 0x4ee   :  { %v4271_v57 = vpop.xlane.xlu1 %4270 }
 0x4ef   :  { %v5727_v29 = vsel %vm4364_vm12, %v5726_v47, %v5722_v37  ;;  %v5731_v7 = vrot.slane %v4271_v57, %v8610_v27  ;;  %v5638_v27 = vrot.slane %v11052_v23, %v8647_v28  ;;  %vm11760_vm12 = vmmov %vm11750_vm1 }
 0x4f0   :  { %v4274_v33 = vpop.xlane.xlu0 %4273 }
 0x4f1   :  { %v5732_v0 = vsel %vm4371_vm8, %v5731_v7, %v5727_v29  ;;  %v5736_v52 = vrot.slane %v4274_v33, %v8647_v28  ;;  %v5639_v3 = vsel %vm4378_vm9, %v5638_v27, %v5634_v35 }
 0x4f2   :  { %v4277_v58 = vpop.xlane.xlu1 %4276 }
 0x4f3   :  { %v5737_v14 = vsel %vm4378_vm9, %v5736_v52, %v5732_v0  ;;  %v5741_v8 = vrot.slane %v4277_v58, %v11657_v42 }
 0x4f4   :  { %v4229_v46 = vpop.xlane.xlu0 %4228 }
 0x4f5   :  { %v5742_v21 = vsel %vm11759_vm11, %v5741_v8, %v5737_v14  ;;  %v5643_v59 = vrot.slane %v4229_v46, %v11657_v42 }
 0x4f6   :  { %5744 = vst [vmem:[#allocation4 + $0x7] ss:$8 sm:$0x1] %v5742_v21 }
 0x4f7   :  { %v5644_v50 = vsel %vm11760_vm12, %v5643_v59, %v5639_v3 }
 0x4f8   :  { %5646 = vst [vmem:[#allocation4 + $0x6] ss:$8 sm:$0x1] %v5644_v50 }
 0x4f9   :  { %7069 = shalt.err (!%p7066_p9)
}
 0x4fa   :  { %5767 = dma.vmem_to_hbm [thread:$0]  %s5765_s12, 128, %s11134_s6, [#allocation5]  }
 0x4fb   :  { %7078 = dma.done.wait [#allocation3], 128  }
 0x4fc   :  { %7079 = vsyncadd [#allocation3], 4294967168 }
 0x4fd   :  { %7080 = dma.done.wait [#allocation5], 128  }
 0x4fe   :  { %7081 = vsyncadd [#allocation5], 4294967168 }
 0x4ff   :  { %5776 = vsyncpa [#allocation3], 1 }
 0x500   :  { %5777 = vsyncpa [#allocation5], 1 }

</bundles_post_ra>
